<compile_context>
chip_gen: v5e
topology: v5e:2x2
jax: 0.10.0
libtpu: 0.0.40
codegen_flags: <defaults>
</compile_context>

<pallas_src>
import functools

import jax
import jax.numpy as jnp
import numpy as np
from jax import lax
from jax.experimental import pallas as pl
from jax.experimental.pallas import tpu as pltpu


def _round_up(x, m):
    return ((x + m - 1) // m) * m


# --------------------------------------------------------------------------
# Kernel 1: recurrent attention + LSTM + first MLP layer (whole caption loop)
# --------------------------------------------------------------------------
def recurrent_kernel(
    emb_ref,                    # (T, tb, E)   compute dtype
    img_ref,                    # (tb, N, C)   compute dtype
    w_h0_ref, b_h0_ref,         # (C, U), (1, U)
    w_c0_ref, b_c0_ref,         # (C, U), (1, U)
    w_key_ref, b_key_ref,       # (C, U), (1, U)
    w_ie_ref, w_ic_ref,         # fused: (E,4U),(C,4U)   split: (4,E,U),(4,C,U)
    w_hh_ref, b_l_ref,          # fused: (U,4U),(1,4U)   split: (4,U,U),(4,1,U)
    w1h_ref, w1c_ref, w1e_ref,  # (U, Hd), (C, Hd), (E, Hd)
    b1_ref,                     # (1, Hd)
    hid_out_ref,                # (T, tb, Hd)  compute dtype
    attn_out_ref,               # (T, tb, N_pad) f32  (lane-dense padded)
    eg_ref,                     # fused: (T,tb,4U) f32   split: (4,T,tb,U) f32
    em_ref,                     # (T, tb, Hd)  f32
    *, fuse_gates, unroll,
):
    T, tb, E = emb_ref.shape
    img = img_ref[...]                                   # (tb, N, C)
    _, N, C = img.shape
    U = w1h_ref.shape[0]
    Hd = w1h_ref.shape[1]
    N_pad = attn_out_ref.shape[2]
    cd = img.dtype                                       # compute dtype
    f32 = jnp.float32

    # ---- one-time init: h0/c0 from mean image feature, attention keys ----
    # TODO(synk): in the bf16 path img is already bf16 here; pass an f32 img
    # tile if bit-faithful keys / initial state are required.
    mean_feat = jnp.mean(img.astype(f32), axis=1).astype(cd)                # (tb, C)
    h0 = (jnp.dot(mean_feat, w_h0_ref[...], preferred_element_type=f32)
          + b_h0_ref[...])                                                  # (tb, U) f32
    c0 = (jnp.dot(mean_feat, w_c0_ref[...], preferred_element_type=f32)
          + b_c0_ref[...])
    keys = (jnp.dot(img.reshape(tb * N, C), w_key_ref[...],
                    preferred_element_type=f32)
            + b_key_ref[...]).reshape(tb, N, U).astype(cd)                  # (tb, N, U)

    # ---- emb-dependent matmuls hoisted out of the serial recurrence ----
    emb_all = emb_ref[...].reshape(T * tb, E)
    if fuse_gates:
        eg_ref[...] = (jnp.dot(emb_all, w_ie_ref[...], preferred_element_type=f32)
                       + b_l_ref[...]).reshape(T, tb, 4 * U)
    else:
        for g in range(4):
            eg_ref[g] = (jnp.dot(emb_all, w_ie_ref[g], preferred_element_type=f32)
                         + b_l_ref[g]).reshape(T, tb, U)
    em_ref[...] = (jnp.dot(emb_all, w1e_ref[...], preferred_element_type=f32)
                   + b1_ref[...]).reshape(T, tb, Hd)

    scale = 1.0 / float(np.sqrt(U))
    if N_pad != N:
        attn_pad = jnp.zeros((tb, N_pad - N), f32)       # hoisted, loop-invariant

    def step(t, carry):
        h, c = carry                                     # f32 (tb, U)
        h_cd = h.astype(cd)

        # ---- scaled dot-product attention (MXU, batched dot_generals, q=1) ----
        q = h_cd[:, None, :]                             # (tb, 1, U)
        scores = jnp.einsum('bqu,bnu->bqn', q, keys,
                            preferred_element_type=f32) * scale             # (tb,1,N)
        m = jnp.max(scores, axis=-1, keepdims=True)
        e = jnp.exp(scores - m)
        denom = jnp.sum(e, axis=-1, keepdims=True)
        probs = e * pl.reciprocal(denom, approx=True)    # softmax, f32
        probs2d = probs[:, 0, :]
        if N_pad != N:                                   # lane-dense store
            attn_out_ref[t] = jnp.concatenate([probs2d, attn_pad], axis=-1)
        else:
            attn_out_ref[t] = probs2d
        ctx = jnp.einsum('bqn,bnc->bqc', probs.astype(cd), img,
                         preferred_element_type=f32)[:, 0, :]               # (tb, C)
        ctx_cd = ctx.astype(cd)

        # ---- LSTM cell, gate order (i, f, g, o); emb term precomputed ----
        if fuse_gates:
            gates = (eg_ref[t]
                     + jnp.dot(ctx_cd, w_ic_ref[...], preferred_element_type=f32)
                     + jnp.dot(h_cd, w_hh_ref[...], preferred_element_type=f32))
            i_g = jax.nn.sigmoid(gates[:, 0 * U:1 * U])
            f_g = jax.nn.sigmoid(gates[:, 1 * U:2 * U])
            g_g = jnp.tanh(gates[:, 2 * U:3 * U])
            o_g = jax.nn.sigmoid(gates[:, 3 * U:4 * U])
        else:
            def gate(g):
                return (eg_ref[g, t]
                        + jnp.dot(ctx_cd, w_ic_ref[g], preferred_element_type=f32)
                        + jnp.dot(h_cd, w_hh_ref[g], preferred_element_type=f32))
            i_g = jax.nn.sigmoid(gate(0))
            f_g = jax.nn.sigmoid(gate(1))
            g_g = jnp.tanh(gate(2))
            o_g = jax.nn.sigmoid(gate(3))
        c_new = f_g * c + i_g * g_g
        h_new = o_g * jnp.tanh(c_new)

        # ---- logits MLP hidden layer (emb term + bias precomputed) ----
        hid = jnp.maximum(
            em_ref[t]
            + jnp.dot(h_new.astype(cd), w1h_ref[...], preferred_element_type=f32)
            + jnp.dot(ctx_cd, w1c_ref[...], preferred_element_type=f32), 0.0)
        hid_out_ref[t] = hid.astype(hid_out_ref.dtype)
        return h_new, c_new

    lax.fori_loop(0, T, step, (h0, c0), unroll=unroll)


# --------------------------------------------------------------------------
# Kernel 2: vocab projection GEMM over stacked (B*T, Hd) hidden states
# --------------------------------------------------------------------------
def vocab_kernel(hid_ref, w2_ref, b2_ref, out_ref):
    out_ref[...] = (jnp.dot(hid_ref[...], w2_ref[...],
                            preferred_element_type=jnp.float32)
                    + b2_ref[...]).astype(out_ref.dtype)


def vocab_projection(hid_flat, w2, b2, *, vmem_limit):
    M, K = hid_flat.shape
    V = w2.shape[1]
    Vp = _round_up(V, 128)                              # lane-dense, no full-V block
    tn = 512 if Vp % 512 == 0 else (256 if Vp % 256 == 0 else 128)
    Mp = _round_up(M, 8)
    if Mp <= 1024:
        tm = Mp                                          # full-M block when it fits
    else:
        tm = 512
        Mp = _round_up(M, tm)
    if Mp != M:
        hid_flat = jnp.pad(hid_flat, ((0, Mp - M), (0, 0)))
    if Vp != V:
        w2 = jnp.pad(w2, ((0, 0), (0, Vp - V)))
        b2 = jnp.pad(b2, ((0, 0), (0, Vp - V)))
    out = pl.pallas_call(
        vocab_kernel,
        out_shape=jax.ShapeDtypeStruct((Mp, Vp), jnp.float32),
        grid_spec=pltpu.PrefetchScalarGridSpec(
            num_scalar_prefetch=0,
            # V is the OUTER axis: the (K, tn) w2 block depends only on it, so
            # the Hd x V weight is streamed from HBM exactly once.
            grid=(Vp // tn, Mp // tm),
            in_specs=[pl.BlockSpec((tm, K), lambda j, i: (i, 0)),
                      pl.BlockSpec((K, tn), lambda j, i: (0, j)),
                      pl.BlockSpec((1, tn), lambda j, i: (0, j))],
            out_specs=pl.BlockSpec((tm, tn), lambda j, i: (i, j))),
        compiler_params=pltpu.CompilerParams(
            dimension_semantics=("parallel", "parallel"),
            vmem_limit_bytes=vmem_limit),
    )(hid_flat, w2, b2)
    return out[:M, :V]


# --------------------------------------------------------------------------
# Wrapper helpers
# --------------------------------------------------------------------------
def _vmem_budget_bytes():
    """Per-generation VMEM budget (~85% of physical, <= 112 MiB)."""
    try:
        cap = int(pltpu.get_tpu_info().vmem_capacity_bytes)
    except Exception:
        cap = 0
    if cap <= 0:
        cap = 64 * 1024 * 1024          # conservative (v7x per-TC VMEM)
    return max(32 * 1024 * 1024, min(int(cap * 0.85), 112 * 1024 * 1024))


def _choose_batch_tile(B, T, E, C, N, N_pad, U, Hd, cd_bytes, vmem_budget):
    """Largest VMEM-fitting batch tile (<=64, aligned, and <=B/2 for large B
    so the v7x second TensorCore gets a grid iteration)."""
    def est(tb):
        blocks = (2 * T * tb * E * cd_bytes        # emb in  (double-buffered)
                  + 2 * tb * N * C * cd_bytes      # img in
                  + 2 * T * tb * Hd * cd_bytes     # hid out
                  + 2 * T * tb * N_pad * 4         # attn out (f32)
                  + T * tb * 4 * U * 4             # emb-gate scratch
                  + T * tb * Hd * 4                # emb-mlp scratch
                  + tb * N * U * cd_bytes          # attention keys (live)
                  + 16 * tb * max(4 * U, Hd, N_pad, C) * 4)   # step temporaries
        weights = (((3 * C * U) + (E + C) * 4 * U + U * 4 * U
                    + (U + C + E) * Hd) * cd_bytes
                   + (12 * U + Hd + N_pad) * 4)    # single-buffered + f32 biases
        return blocks + weights

    align = 16 if cd_bytes == 2 else 8
    if B < 2 * align:
        return B                                   # tiny batch: one full block
    cands = [tb for tb in range(min(B // 2, 64), 0, -1)
             if B % tb == 0 and tb % align == 0]
    if not cands:
        return B
    for tb in cands:
        if est(tb) <= int(0.75 * vmem_budget):
            return tb
    return cands[-1]


def _const_spec(arr):
    """Grid-invariant weight: constant index_map + single buffer (no re-DMA,
    no double-buffered VMEM copy)."""
    nd = arr.ndim
    imap = lambda b, _nd=nd: (0,) * _nd
    try:
        return pl.BlockSpec(arr.shape, imap, pipeline_mode=pl.Buffered(1))
    except Exception:
        return pl.BlockSpec(arr.shape, imap)


# --------------------------------------------------------------------------
# Forward wrapper
# --------------------------------------------------------------------------
def caption_net_forward(params, image_features, captions_ix, *,
                        compute_dtype=jnp.float32):
    """image_features: [B, cnn_channels, W*H] f32; captions_ix: [B, T] int32."""
    B, C, N = image_features.shape
    T = captions_ix.shape[1]
    E = params['emb'].shape[1]
    U = params['w_hh'].shape[0]
    Hd = params['w1'].shape[1]
    V = params['w2'].shape[1]
    cd = compute_dtype
    f32 = jnp.float32
    cd_bytes = jnp.dtype(cd).itemsize

    img = jnp.transpose(image_features, (0, 2, 1)).astype(cd)                  # (B,N,C)
    # embedding lookup (gather) is plain-JAX glue; fed time-major to the kernel
    emb_seq = jnp.transpose(params['emb'][captions_ix], (1, 0, 2)).astype(cd)  # (T,B,E)

    # weight layouts (gate order i,f,g,o): wide fused for U%128==0, stacked split otherwise
    fuse_gates = (U % 128 == 0)
    if fuse_gates:
        w_ie = params['w_ih'][:E].astype(cd)                                   # (E, 4U)
        w_ic = params['w_ih'][E:].astype(cd)                                   # (C, 4U)
        w_hh4 = params['w_hh'].astype(cd)                                      # (U, 4U)
        b_l4 = params['b_lstm'].astype(f32)                                    # (1, 4U)
    else:
        w_ie = jnp.transpose(params['w_ih'][:E].reshape(E, 4, U), (1, 0, 2)).astype(cd)
        w_ic = jnp.transpose(params['w_ih'][E:].reshape(C, 4, U), (1, 0, 2)).astype(cd)
        w_hh4 = jnp.transpose(params['w_hh'].reshape(U, 4, U), (1, 0, 2)).astype(cd)
        b_l4 = jnp.transpose(params['b_lstm'].reshape(1, 4, U), (1, 0, 2)).astype(f32)
    w1_h = params['w1'][:U].astype(cd)
    w1_c = params['w1'][U:U + C].astype(cd)
    w1_e = params['w1'][U + C:].astype(cd)

    consts = [
        params['w_h0'].astype(cd), params['b_h0'].astype(f32),
        params['w_c0'].astype(cd), params['b_c0'].astype(f32),
        params['w_key'].astype(cd), params['b_key'].astype(f32),
        w_ie, w_ic, w_hh4, b_l4,
        w1_h, w1_c, w1_e, params['b1'].astype(f32),
    ]

    N_pad = _round_up(N, 128)                      # lane-dense attention stores
    vmem_limit = _vmem_budget_bytes()
    tb = _choose_batch_tile(B, T, E, C, N, N_pad, U, Hd, cd_bytes, vmem_limit)

    in_specs = ([pl.BlockSpec((T, tb, E), lambda b: (0, b, 0)),
                 pl.BlockSpec((tb, N, C), lambda b: (b, 0, 0))]
                + [_const_spec(w) for w in consts])
    out_specs = [pl.BlockSpec((T, tb, Hd), lambda b: (0, b, 0)),
                 pl.BlockSpec((T, tb, N_pad), lambda b: (0, b, 0))]
    out_shape = [jax.ShapeDtypeStruct((T, B, Hd), cd),
                 jax.ShapeDtypeStruct((T, B, N_pad), jnp.float32)]
    if fuse_gates:
        eg_scratch = pltpu.VMEM((T, tb, 4 * U), f32)
    else:
        eg_scratch = pltpu.VMEM((4, T, tb, U), f32)
    scratch_shapes = [eg_scratch, pltpu.VMEM((T, tb, Hd), f32)]

    unroll = True if T <= 8 else 4                 # partial unroll for long captions

    hid_tbh, attn_tbn = pl.pallas_call(
        functools.partial(recurrent_kernel, fuse_gates=fuse_gates, unroll=unroll),
        out_shape=out_shape,
        grid_spec=pltpu.PrefetchScalarGridSpec(
            num_scalar_prefetch=0,
            grid=(B // tb,),
            in_specs=in_specs,
            out_specs=out_specs,
            scratch_shapes=scratch_shapes),
        compiler_params=pltpu.CompilerParams(
            dimension_semantics=("parallel",),
            vmem_limit_bytes=vmem_limit),
    )(emb_seq, img, *consts)

    # transpose the SMALL hid tensor (not the big logits) so the vocab GEMM
    # writes logits directly in (B, T, V) order
    hid_bt = jnp.transpose(hid_tbh, (1, 0, 2)).reshape(B * T, Hd)
    logits_flat = vocab_projection(hid_bt, params['w2'].astype(cd),
                                   params['b2'].astype(f32),
                                   vmem_limit=vmem_limit)
    logits = logits_flat.reshape(B, T, V)
    attn = jnp.transpose(attn_tbn[:, :, :N], (1, 0, 2))            # (B, T, N)
    return logits, attn


# --------------------------------------------------------------------------
# Parameter init (PyTorch-equivalent layout) and pure-JAX reference
# --------------------------------------------------------------------------
def init_params(key, n_tokens, cnn_channels, emb_size, lstm_units, hidden):
    ks = jax.random.split(key, 8)

    def lin(k, fan_in, fan_out):
        s = 1.0 / np.sqrt(fan_in)
        kw, kb = jax.random.split(k)
        w = jax.random.uniform(kw, (fan_in, fan_out), jnp.float32, -s, s)
        b = jax.random.uniform(kb, (1, fan_out), jnp.float32, -s, s)
        return w, b

    w_h0, b_h0 = lin(ks[0], cnn_channels, lstm_units)
    w_c0, b_c0 = lin(ks[1], cnn_channels, lstm_units)
    w_key, b_key = lin(ks[2], cnn_channels, lstm_units)
    emb = 0.1 * jax.random.normal(ks[3], (n_tokens, emb_size), jnp.float32)
    s = 1.0 / np.sqrt(lstm_units)
    w_ih = jax.random.uniform(ks[4], (emb_size + cnn_channels, 4 * lstm_units),
                              jnp.float32, -s, s)
    w_hh = jax.random.uniform(ks[5], (lstm_units, 4 * lstm_units),
                              jnp.float32, -s, s)
    # b_ih + b_hh folded into one bias (mathematically identical)
    b_lstm = jax.random.uniform(ks[6], (1, 4 * lstm_units), jnp.float32, -2 * s, 2 * s)
    kk = jax.random.split(ks[7], 2)
    w1, b1 = lin(kk[0], lstm_units + cnn_channels + emb_size, hidden)
    w2, b2 = lin(kk[1], hidden, n_tokens)
    return dict(w_h0=w_h0, b_h0=b_h0, w_c0=w_c0, b_c0=b_c0,
                w_key=w_key, b_key=b_key, emb=emb,
                w_ih=w_ih, w_hh=w_hh, b_lstm=b_lstm,
                w1=w1, b1=b1, w2=w2, b2=b2)


def reference_forward(params, image_features, captions_ix):
    """Pure-JAX reference mirroring the PyTorch forward (numerical check)."""
    B, C, N = image_features.shape
    T = captions_ix.shape[1]
    U = params['w_hh'].shape[0]
    img = jnp.transpose(image_features, (0, 2, 1)).astype(jnp.float32)
    mean_feat = jnp.mean(image_features, axis=2)
    h = mean_feat @ params['w_h0'] + params['b_h0']
    c = mean_feat @ params['w_c0'] + params['b_c0']
    keys = jnp.einsum('bnc,cu->bnu', img, params['w_key']) + params['b_key'][None]
    logits_list, attn_list = [], []
    for i in range(T):
        emb = params['emb'][captions_ix[:, i]]
        scores = jnp.einsum('bu,bnu->bn', h, keys) / np.sqrt(U)
        w = jax.nn.softmax(scores, axis=-1)
        ctx = jnp.einsum('bn,bnc->bc', w, img)
        x = jnp.concatenate([emb, ctx], axis=1)
        gates = x @ params['w_ih'] + h @ params['w_hh'] + params['b_lstm']
        ii = jax.nn.sigmoid(gates[:, :U])
        ff = jax.nn.sigmoid(gates[:, U:2 * U])
        gg = jnp.tanh(gates[:, 2 * U:3 * U])
        oo = jax.nn.sigmoid(gates[:, 3 * U:])
        c = ff * c + ii * gg
        h = oo * jnp.tanh(c)
        rec = jnp.concatenate([h, ctx, emb], axis=1)
        hid = jax.nn.relu(rec @ params['w1'] + params['b1'])
        logits_list.append(hid @ params['w2'] + params['b2'])
        attn_list.append(w)
    return jnp.stack(logits_list, 1), jnp.stack(attn_list, 1)


if __name__ == "__main__":
    def make_case(B, C, N, E, U, V, Hd, T, seed=0):
        key = jax.random.PRNGKey(seed)
        k_par, k_img, k_cap = jax.random.split(key, 3)
        params = init_params(k_par, V, C, E, U, Hd)
        image_features = jax.random.normal(k_img, (B, C, N), jnp.float32)
        captions_ix = jax.random.randint(k_cap, (B, T), 0, V, dtype=jnp.int32)
        ref = reference_forward(params, image_features, captions_ix)
        return params, image_features, captions_ix, ref

    fwd = jax.jit(caption_net_forward, static_argnames='compute_dtype')

    # ---- config A: small shapes, U < 128 -> per-gate split path ----
    B, C, N, E, U, V, Hd, T = 2, 32, 16, 16, 32, 40, 32, 6
    params, img_f, caps, (ref_logits, ref_attn) = make_case(B, C, N, E, U, V, Hd, T)

    logits, attn = fwd(params, img_f, caps, compute_dtype=jnp.float32)
    jax.block_until_ready((logits, attn))
    assert logits.shape == (B, T, V), logits.shape
    assert attn.shape == (B, T, N), attn.shape
    np.testing.assert_allclose(np.asarray(logits), np.asarray(ref_logits),
                               rtol=5e-3, atol=5e-3)
    np.testing.assert_allclose(np.asarray(attn), np.asarray(ref_attn),
                               rtol=5e-3, atol=5e-3)

    # bf16 matmul-operand path (halved VMEM/DMA, native MXU dtype): loose check
    logits_bf, attn_bf = fwd(params, img_f, caps, compute_dtype=jnp.bfloat16)
    jax.block_until_ready((logits_bf, attn_bf))
    np.testing.assert_allclose(np.asarray(logits_bf), np.asarray(ref_logits),
                               rtol=5e-2, atol=5e-2)
    np.testing.assert_allclose(np.asarray(attn_bf), np.asarray(ref_attn),
                               rtol=5e-2, atol=5e-2)

    # ---- config B: U = 128 -> fused wide-gate path ----
    params2, img_f2, caps2, (ref_logits2, ref_attn2) = make_case(
        2, 32, 16, 16, 128, 40, 32, 6, seed=1)
    logits2, attn2 = fwd(params2, img_f2, caps2, compute_dtype=jnp.float32)
    jax.block_until_ready((logits2, attn2))
    np.testing.assert_allclose(np.asarray(logits2), np.asarray(ref_logits2),
                               rtol=5e-3, atol=5e-3)
    np.testing.assert_allclose(np.asarray(attn2), np.asarray(ref_attn2),
                               rtol=5e-3, atol=5e-3)

    print("KERNEL_OK")
</pallas_src>

<mosaic_0001>
module attributes {stable_mosaic.version = 11 : i64} {
  func.func @vocab_kernel(%arg0: i32, %arg1: i32, %arg2: memref<16x32xf32, #tpu.memory_space<vmem>>, %arg3: memref<32x128xf32, #tpu.memory_space<vmem>>, %arg4: memref<1x128xf32, #tpu.memory_space<vmem>>, %arg5: memref<16x128xf32, #tpu.memory_space<vmem>>) attributes {dimension_semantics = [#tpu.dimension_semantics<parallel>, #tpu.dimension_semantics<parallel>], iteration_bounds = array<i64: 1, 1>, scalar_prefetch = 0 : i64, scratch_operands = 0 : i64, tpu.core_type = #tpu.core_type<tc>, window_params = [{transform_indices = @transform_0, window_bounds = array<i64: 16, 32>}, {transform_indices = @transform_1, window_bounds = array<i64: 32, 128>}, {transform_indices = @transform_2, window_bounds = array<i64: 1, 128>}, {transform_indices = @transform_3, window_bounds = array<i64: 16, 128>}]} {
    %c0 = arith.constant 0 : index
    %c0_0 = arith.constant 0 : index
    %0 = vector.load %arg2[%c0, %c0_0] : memref<16x32xf32, #tpu.memory_space<vmem>>, vector<16x32xf32>
    %c0_1 = arith.constant 0 : index
    %c0_2 = arith.constant 0 : index
    %1 = vector.load %arg3[%c0_1, %c0_2] : memref<32x128xf32, #tpu.memory_space<vmem>>, vector<32x128xf32>
    %cst = arith.constant dense<0.000000e+00> : vector<16x128xf32>
    %2 = tpu.matmul %0, %1, %cst {dimension_numbers = #tpu.dot_dimension_numbers<[1], [0], [0], [1], [0, 0, 1, 1], [], []>} : vector<16x32xf32>, vector<32x128xf32>, vector<16x128xf32> -> vector<16x128xf32>
    %c0_3 = arith.constant 0 : index
    %c0_4 = arith.constant 0 : index
    %3 = vector.load %arg4[%c0_3, %c0_4] : memref<1x128xf32, #tpu.memory_space<vmem>>, vector<1x128xf32>
    %4 = vector.broadcast %3 : vector<1x128xf32> to vector<16x128xf32>
    %5 = arith.addf %2, %4 : vector<16x128xf32>
    %c0_5 = arith.constant 0 : index
    %c0_6 = arith.constant 0 : index
    %6 = vector.load %arg5[%c0_5, %c0_6] : memref<16x128xf32, #tpu.memory_space<vmem>>, vector<16x128xf32>
    tpu.vector_store %arg5[%c0_5, %c0_6], %5 {strides = array<i32>} : memref<16x128xf32, #tpu.memory_space<vmem>>, vector<16x128xf32>,
    return
  }
  func.func @transform_0(%arg0: i32, %arg1: i32) -> (i32, i32) {
    %c0_i32 = arith.constant 0 : i32
    %c0_i32_0 = arith.constant 0 : i32
    return %arg1, %c0_i32 : i32, i32
  }
  func.func @transform_1(%arg0: i32, %arg1: i32) -> (i32, i32) {
    %c0_i32 = arith.constant 0 : i32
    %c0_i32_0 = arith.constant 0 : i32
    return %c0_i32, %arg0 : i32, i32
  }
  func.func @transform_2(%arg0: i32, %arg1: i32) -> (i32, i32) {
    %c0_i32 = arith.constant 0 : i32
    %c0_i32_0 = arith.constant 0 : i32
    return %c0_i32, %arg0 : i32, i32
  }
  func.func @transform_3(%arg0: i32, %arg1: i32) -> (i32, i32) {
    %c0_i32 = arith.constant 0 : i32
    return %arg1, %arg0 : i32, i32
  }
}

module attributes {stable_mosaic.version = 11 : i64} {
  func.func @recurrent_kernel(%arg0: i32, %arg1: memref<6x2x16xf32, #tpu.memory_space<vmem>>, %arg2: memref<2x16x32xf32, #tpu.memory_space<vmem>>, %arg3: memref<32x32xf32, #tpu.memory_space<vmem>>, %arg4: memref<1x32xf32, #tpu.memory_space<vmem>>, %arg5: memref<32x32xf32, #tpu.memory_space<vmem>>, %arg6: memref<1x32xf32, #tpu.memory_space<vmem>>, %arg7: memref<32x32xf32, #tpu.memory_space<vmem>>, %arg8: memref<1x32xf32, #tpu.memory_space<vmem>>, %arg9: memref<4x16x32xf32, #tpu.memory_space<vmem>>, %arg10: memref<4x32x32xf32, #tpu.memory_space<vmem>>, %arg11: memref<4x32x32xf32, #tpu.memory_space<vmem>>, %arg12: memref<4x1x32xf32, #tpu.memory_space<vmem>>, %arg13: memref<32x32xf32, #tpu.memory_space<vmem>>, %arg14: memref<32x32xf32, #tpu.memory_space<vmem>>, %arg15: memref<16x32xf32, #tpu.memory_space<vmem>>, %arg16: memref<1x32xf32, #tpu.memory_space<vmem>>, %arg17: memref<6x2x32xf32, #tpu.memory_space<vmem>>, %arg18: memref<6x2x128xf32, #tpu.memory_space<vmem>>, %arg19: memref<4x6x2x32xf32, #tpu.memory_space<vmem>>, %arg20: memref<6x2x32xf32, #tpu.memory_space<vmem>>) attributes {dimension_semantics = [#tpu.dimension_semantics<parallel>], iteration_bounds = array<i64: 1>, scalar_prefetch = 0 : i64, scratch_operands = 2 : i64, tpu.core_type = #tpu.core_type<tc>, window_params = [{transform_indices = @transform_0, window_bounds = array<i64: 6, 2, 16>}, {transform_indices = @transform_1, window_bounds = array<i64: 2, 16, 32>}, {pipeline_mode = #tpu.pipeline_mode<synchronous>, transform_indices = @transform_2, window_bounds = array<i64: 32, 32>}, {pipeline_mode = #tpu.pipeline_mode<synchronous>, transform_indices = @transform_3, window_bounds = array<i64: 1, 32>}, {pipeline_mode = #tpu.pipeline_mode<synchronous>, transform_indices = @transform_4, window_bounds = array<i64: 32, 32>}, {pipeline_mode = #tpu.pipeline_mode<synchronous>, transform_indices = @transform_5, window_bounds = array<i64: 1, 32>}, {pipeline_mode = #tpu.pipeline_mode<synchronous>, transform_indices = @transform_6, window_bounds = array<i64: 32, 32>}, {pipeline_mode = #tpu.pipeline_mode<synchronous>, transform_indices = @transform_7, window_bounds = array<i64: 1, 32>}, {pipeline_mode = #tpu.pipeline_mode<synchronous>, transform_indices = @transform_8, window_bounds = array<i64: 4, 16, 32>}, {pipeline_mode = #tpu.pipeline_mode<synchronous>, transform_indices = @transform_9, window_bounds = array<i64: 4, 32, 32>}, {pipeline_mode = #tpu.pipeline_mode<synchronous>, transform_indices = @transform_10, window_bounds = array<i64: 4, 32, 32>}, {pipeline_mode = #tpu.pipeline_mode<synchronous>, transform_indices = @transform_11, window_bounds = array<i64: 4, 1, 32>}, {pipeline_mode = #tpu.pipeline_mode<synchronous>, transform_indices = @transform_12, window_bounds = array<i64: 32, 32>}, {pipeline_mode = #tpu.pipeline_mode<synchronous>, transform_indices = @transform_13, window_bounds = array<i64: 32, 32>}, {pipeline_mode = #tpu.pipeline_mode<synchronous>, transform_indices = @transform_14, window_bounds = array<i64: 16, 32>}, {pipeline_mode = #tpu.pipeline_mode<synchronous>, transform_indices = @transform_15, window_bounds = array<i64: 1, 32>}, {transform_indices = @transform_16, window_bounds = array<i64: 6, 2, 32>}, {transform_indices = @transform_17, window_bounds = array<i64: 6, 2, 128>}]} {
    %c0 = arith.constant 0 : index
    %c0_0 = arith.constant 0 : index
    %c0_1 = arith.constant 0 : index
    %0 = vector.load %arg2[%c0, %c0_0, %c0_1] : memref<2x16x32xf32, #tpu.memory_space<vmem>>, vector<2x16x32xf32>
    %cst = arith.constant dense<0.000000e+00> : vector<2x32xf32>
    %1 = vector.multi_reduction <add>, %0, %cst [1] : vector<2x16x32xf32> to vector<2x32xf32>
    %cst_2 = arith.constant 1.600000e+01 : f32
    %2 = vector.broadcast %cst_2 : f32 to vector<2x32xf32>
    %3 = arith.divf %1, %2 : vector<2x32xf32>
    %c0_3 = arith.constant 0 : index
    %c0_4 = arith.constant 0 : index
    %4 = vector.load %arg3[%c0_3, %c0_4] : memref<32x32xf32, #tpu.memory_space<vmem>>, vector<32x32xf32>
    %cst_5 = arith.constant dense<0.000000e+00> : vector<2x32xf32>
    %5 = tpu.matmul %3, %4, %cst_5 {dimension_numbers = #tpu.dot_dimension_numbers<[1], [0], [0], [1], [0, 0, 1, 1], [], []>} : vector<2x32xf32>, vector<32x32xf32>, vector<2x32xf32> -> vector<2x32xf32>
    %c0_6 = arith.constant 0 : index
    %c0_7 = arith.constant 0 : index
    %6 = vector.load %arg4[%c0_6, %c0_7] : memref<1x32xf32, #tpu.memory_space<vmem>>, vector<1x32xf32>
    %7 = vector.broadcast %6 : vector<1x32xf32> to vector<2x32xf32>
    %8 = arith.addf %5, %7 : vector<2x32xf32>
    %c0_8 = arith.constant 0 : index
    %c0_9 = arith.constant 0 : index
    %9 = vector.load %arg5[%c0_8, %c0_9] : memref<32x32xf32, #tpu.memory_space<vmem>>, vector<32x32xf32>
    %cst_10 = arith.constant dense<0.000000e+00> : vector<2x32xf32>
    %10 = tpu.matmul %3, %9, %cst_10 {dimension_numbers = #tpu.dot_dimension_numbers<[1], [0], [0], [1], [0, 0, 1, 1], [], []>} : vector<2x32xf32>, vector<32x32xf32>, vector<2x32xf32> -> vector<2x32xf32>
    %c0_11 = arith.constant 0 : index
    %c0_12 = arith.constant 0 : index
    %11 = vector.load %arg6[%c0_11, %c0_12] : memref<1x32xf32, #tpu.memory_space<vmem>>, vector<1x32xf32>
    %12 = vector.broadcast %11 : vector<1x32xf32> to vector<2x32xf32>
    %13 = arith.addf %10, %12 : vector<2x32xf32>
    %14 = vector.shape_cast %0 : vector<2x16x32xf32> to vector<32x32xf32>
    %c0_13 = arith.constant 0 : index
    %c0_14 = arith.constant 0 : index
    %15 = vector.load %arg7[%c0_13, %c0_14] : memref<32x32xf32, #tpu.memory_space<vmem>>, vector<32x32xf32>
    %cst_15 = arith.constant dense<0.000000e+00> : vector<32x32xf32>
    %16 = tpu.matmul %14, %15, %cst_15 {dimension_numbers = #tpu.dot_dimension_numbers<[1], [0], [0], [1], [0, 0, 1, 1], [], []>} : vector<32x32xf32>, vector<32x32xf32>, vector<32x32xf32> -> vector<32x32xf32>
    %c0_16 = arith.constant 0 : index
    %c0_17 = arith.constant 0 : index
    %17 = vector.load %arg8[%c0_16, %c0_17] : memref<1x32xf32, #tpu.memory_space<vmem>>, vector<1x32xf32>
    %18 = vector.broadcast %17 : vector<1x32xf32> to vector<32x32xf32>
    %19 = arith.addf %16, %18 : vector<32x32xf32>
    %20 = vector.shape_cast %19 : vector<32x32xf32> to vector<2x16x32xf32>
    %c0_18 = arith.constant 0 : index
    %c0_19 = arith.constant 0 : index
    %c0_20 = arith.constant 0 : index
    %21 = vector.load %arg1[%c0_18, %c0_19, %c0_20] : memref<6x2x16xf32, #tpu.memory_space<vmem>>, vector<6x2x16xf32>
    %22 = vector.shape_cast %21 : vector<6x2x16xf32> to vector<12x16xf32>
    %c0_21 = arith.constant 0 : index
    %c0_22 = arith.constant 0 : index
    %c0_23 = arith.constant 0 : index
    %23 = vector.load %arg9[%c0_21, %c0_22, %c0_23] : memref<4x16x32xf32, #tpu.memory_space<vmem>>, vector<1x16x32xf32>
    %24 = vector.shape_cast %23 : vector<1x16x32xf32> to vector<16x32xf32>
    %cst_24 = arith.constant dense<0.000000e+00> : vector<12x32xf32>
    %25 = tpu.matmul %22, %24, %cst_24 {dimension_numbers = #tpu.dot_dimension_numbers<[1], [0], [0], [1], [0, 0, 1, 1], [], []>} : vector<12x16xf32>, vector<16x32xf32>, vector<12x32xf32> -> vector<12x32xf32>
    %c0_25 = arith.constant 0 : index
    %c0_26 = arith.constant 0 : index
    %c0_27 = arith.constant 0 : index
    %26 = vector.load %arg12[%c0_25, %c0_26, %c0_27] : memref<4x1x32xf32, #tpu.memory_space<vmem>>, vector<1x1x32xf32>
    %27 = vector.shape_cast %26 : vector<1x1x32xf32> to vector<1x32xf32>
    %28 = vector.broadcast %27 : vector<1x32xf32> to vector<12x32xf32>
    %29 = arith.addf %25, %28 : vector<12x32xf32>
    %30 = vector.shape_cast %29 : vector<12x32xf32> to vector<6x2x32xf32>
    %c0_28 = arith.constant 0 : index
    %c0_29 = arith.constant 0 : index
    %c0_30 = arith.constant 0 : index
    %c0_31 = arith.constant 0 : index
    %31 = vector.load %arg19[%c0_28, %c0_29, %c0_30, %c0_31] : memref<4x6x2x32xf32, #tpu.memory_space<vmem>>, vector<1x6x2x32xf32>
    %32 = vector.shape_cast %31 : vector<1x6x2x32xf32> to vector<6x2x32xf32>
    %33 = vector.shape_cast %30 : vector<6x2x32xf32> to vector<1x6x2x32xf32>
    tpu.vector_store %arg19[%c0_28, %c0_29, %c0_30, %c0_31], %33 {strides = array<i32>} : memref<4x6x2x32xf32, #tpu.memory_space<vmem>>, vector<1x6x2x32xf32>,
    %c1 = arith.constant 1 : index
    %c0_32 = arith.constant 0 : index
    %c0_33 = arith.constant 0 : index
    %34 = vector.load %arg9[%c1, %c0_32, %c0_33] : memref<4x16x32xf32, #tpu.memory_space<vmem>>, vector<1x16x32xf32>
    %35 = vector.shape_cast %34 : vector<1x16x32xf32> to vector<16x32xf32>
    %cst_34 = arith.constant dense<0.000000e+00> : vector<12x32xf32>
    %36 = tpu.matmul %22, %35, %cst_34 {dimension_numbers = #tpu.dot_dimension_numbers<[1], [0], [0], [1], [0, 0, 1, 1], [], []>} : vector<12x16xf32>, vector<16x32xf32>, vector<12x32xf32> -> vector<12x32xf32>
    %c1_35 = arith.constant 1 : index
    %c0_36 = arith.constant 0 : index
    %c0_37 = arith.constant 0 : index
    %37 = vector.load %arg12[%c1_35, %c0_36, %c0_37] : memref<4x1x32xf32, #tpu.memory_space<vmem>>, vector<1x1x32xf32>
    %38 = vector.shape_cast %37 : vector<1x1x32xf32> to vector<1x32xf32>
    %39 = vector.broadcast %38 : vector<1x32xf32> to vector<12x32xf32>
    %40 = arith.addf %36, %39 : vector<12x32xf32>
    %41 = vector.shape_cast %40 : vector<12x32xf32> to vector<6x2x32xf32>
    %c1_38 = arith.constant 1 : index
    %c0_39 = arith.constant 0 : index
    %c0_40 = arith.constant 0 : index
    %c0_41 = arith.constant 0 : index
    %42 = vector.load %arg19[%c1_38, %c0_39, %c0_40, %c0_41] : memref<4x6x2x32xf32, #tpu.memory_space<vmem>>, vector<1x6x2x32xf32>
    %43 = vector.shape_cast %42 : vector<1x6x2x32xf32> to vector<6x2x32xf32>
    %44 = vector.shape_cast %41 : vector<6x2x32xf32> to vector<1x6x2x32xf32>
    tpu.vector_store %arg19[%c1_38, %c0_39, %c0_40, %c0_41], %44 {strides = array<i32>} : memref<4x6x2x32xf32, #tpu.memory_space<vmem>>, vector<1x6x2x32xf32>,
    %c2 = arith.constant 2 : index
    %c0_42 = arith.constant 0 : index
    %c0_43 = arith.constant 0 : index
    %45 = vector.load %arg9[%c2, %c0_42, %c0_43] : memref<4x16x32xf32, #tpu.memory_space<vmem>>, vector<1x16x32xf32>
    %46 = vector.shape_cast %45 : vector<1x16x32xf32> to vector<16x32xf32>
    %cst_44 = arith.constant dense<0.000000e+00> : vector<12x32xf32>
    %47 = tpu.matmul %22, %46, %cst_44 {dimension_numbers = #tpu.dot_dimension_numbers<[1], [0], [0], [1], [0, 0, 1, 1], [], []>} : vector<12x16xf32>, vector<16x32xf32>, vector<12x32xf32> -> vector<12x32xf32>
    %c2_45 = arith.constant 2 : index
    %c0_46 = arith.constant 0 : index
    %c0_47 = arith.constant 0 : index
    %48 = vector.load %arg12[%c2_45, %c0_46, %c0_47] : memref<4x1x32xf32, #tpu.memory_space<vmem>>, vector<1x1x32xf32>
    %49 = vector.shape_cast %48 : vector<1x1x32xf32> to vector<1x32xf32>
    %50 = vector.broadcast %49 : vector<1x32xf32> to vector<12x32xf32>
    %51 = arith.addf %47, %50 : vector<12x32xf32>
    %52 = vector.shape_cast %51 : vector<12x32xf32> to vector<6x2x32xf32>
    %c2_48 = arith.constant 2 : index
    %c0_49 = arith.constant 0 : index
    %c0_50 = arith.constant 0 : index
    %c0_51 = arith.constant 0 : index
    %53 = vector.load %arg19[%c2_48, %c0_49, %c0_50, %c0_51] : memref<4x6x2x32xf32, #tpu.memory_space<vmem>>, vector<1x6x2x32xf32>
    %54 = vector.shape_cast %53 : vector<1x6x2x32xf32> to vector<6x2x32xf32>
    %55 = vector.shape_cast %52 : vector<6x2x32xf32> to vector<1x6x2x32xf32>
    tpu.vector_store %arg19[%c2_48, %c0_49, %c0_50, %c0_51], %55 {strides = array<i32>} : memref<4x6x2x32xf32, #tpu.memory_space<vmem>>, vector<1x6x2x32xf32>,
    %c3 = arith.constant 3 : index
    %c0_52 = arith.constant 0 : index
    %c0_53 = arith.constant 0 : index
    %56 = vector.load %arg9[%c3, %c0_52, %c0_53] : memref<4x16x32xf32, #tpu.memory_space<vmem>>, vector<1x16x32xf32>
    %57 = vector.shape_cast %56 : vector<1x16x32xf32> to vector<16x32xf32>
    %cst_54 = arith.constant dense<0.000000e+00> : vector<12x32xf32>
    %58 = tpu.matmul %22, %57, %cst_54 {dimension_numbers = #tpu.dot_dimension_numbers<[1], [0], [0], [1], [0, 0, 1, 1], [], []>} : vector<12x16xf32>, vector<16x32xf32>, vector<12x32xf32> -> vector<12x32xf32>
    %c3_55 = arith.constant 3 : index
    %c0_56 = arith.constant 0 : index
    %c0_57 = arith.constant 0 : index
    %59 = vector.load %arg12[%c3_55, %c0_56, %c0_57] : memref<4x1x32xf32, #tpu.memory_space<vmem>>, vector<1x1x32xf32>
    %60 = vector.shape_cast %59 : vector<1x1x32xf32> to vector<1x32xf32>
    %61 = vector.broadcast %60 : vector<1x32xf32> to vector<12x32xf32>
    %62 = arith.addf %58, %61 : vector<12x32xf32>
    %63 = vector.shape_cast %62 : vector<12x32xf32> to vector<6x2x32xf32>
    %c3_58 = arith.constant 3 : index
    %c0_59 = arith.constant 0 : index
    %c0_60 = arith.constant 0 : index
    %c0_61 = arith.constant 0 : index
    %64 = vector.load %arg19[%c3_58, %c0_59, %c0_60, %c0_61] : memref<4x6x2x32xf32, #tpu.memory_space<vmem>>, vector<1x6x2x32xf32>
    %65 = vector.shape_cast %64 : vector<1x6x2x32xf32> to vector<6x2x32xf32>
    %66 = vector.shape_cast %63 : vector<6x2x32xf32> to vector<1x6x2x32xf32>
    tpu.vector_store %arg19[%c3_58, %c0_59, %c0_60, %c0_61], %66 {strides = array<i32>} : memref<4x6x2x32xf32, #tpu.memory_space<vmem>>, vector<1x6x2x32xf32>,
    %c0_62 = arith.constant 0 : index
    %c0_63 = arith.constant 0 : index
    %67 = vector.load %arg15[%c0_62, %c0_63] : memref<16x32xf32, #tpu.memory_space<vmem>>, vector<16x32xf32>
    %cst_64 = arith.constant dense<0.000000e+00> : vector<12x32xf32>
    %68 = tpu.matmul %22, %67, %cst_64 {dimension_numbers = #tpu.dot_dimension_numbers<[1], [0], [0], [1], [0, 0, 1, 1], [], []>} : vector<12x16xf32>, vector<16x32xf32>, vector<12x32xf32> -> vector<12x32xf32>
    %c0_65 = arith.constant 0 : index
    %c0_66 = arith.constant 0 : index
    %69 = vector.load %arg16[%c0_65, %c0_66] : memref<1x32xf32, #tpu.memory_space<vmem>>, vector<1x32xf32>
    %70 = vector.broadcast %69 : vector<1x32xf32> to vector<12x32xf32>
    %71 = arith.addf %68, %70 : vector<12x32xf32>
    %72 = vector.shape_cast %71 : vector<12x32xf32> to vector<6x2x32xf32>
    %c0_67 = arith.constant 0 : index
    %c0_68 = arith.constant 0 : index
    %c0_69 = arith.constant 0 : index
    %73 = vector.load %arg20[%c0_67, %c0_68, %c0_69] : memref<6x2x32xf32, #tpu.memory_space<vmem>>, vector<6x2x32xf32>
    tpu.vector_store %arg20[%c0_67, %c0_68, %c0_69], %72 {strides = array<i32>} : memref<6x2x32xf32, #tpu.memory_space<vmem>>, vector<6x2x32xf32>,
    %cst_70 = arith.constant 0.000000e+00 : f32
    %74 = vector.broadcast %cst_70 : f32 to vector<2x112xf32>
    %c0_i32 = arith.constant 0 : i32
    %75 = vector.shape_cast %8 : vector<2x32xf32> to vector<2x1x32xf32>
    "tpu.trace_start"() <{level = 10 : i32, message = "bqu,bnu->bqn"}> : () -> ()
    %cst_71 = arith.constant dense<0.000000e+00> : vector<2x1x16xf32>
    %76 = tpu.matmul %75, %20, %cst_71 {dimension_numbers = #tpu.dot_dimension_numbers<[2], [2], [1], [1], [0, 0, 0, 1, 1, 1], [0], [0]>} : vector<2x1x32xf32>, vector<2x16x32xf32>, vector<2x1x16xf32> -> vector<2x1x16xf32>
    "tpu.trace_stop"() : () -> ()
    %cst_72 = arith.constant 0.176776692 : f32
    %77 = vector.broadcast %cst_72 : f32 to vector<2x1x16xf32>
    %78 = arith.mulf %76, %77 : vector<2x1x16xf32>
    %cst_73 = arith.constant dense<0xFF800000> : vector<2x1xf32>
    %79 = vector.multi_reduction <maximumf>, %78, %cst_73 [2] : vector<2x1x16xf32> to vector<2x1xf32>
    %80 = vector.shape_cast %79 : vector<2x1xf32> to vector<2x1x1xf32>
    %81 = vector.broadcast %80 : vector<2x1x1xf32> to vector<2x1x16xf32>
    %82 = arith.subf %78, %81 : vector<2x1x16xf32>
    %83 = math.exp %82 : vector<2x1x16xf32>
    %cst_74 = arith.constant dense<0.000000e+00> : vector<2x1xf32>
    %84 = vector.multi_reduction <add>, %83, %cst_74 [2] : vector<2x1x16xf32> to vector<2x1xf32>
    %85 = vector.shape_cast %84 : vector<2x1xf32> to vector<2x1x1xf32>
    %86 = tpu.reciprocal %85 {approx = true} : vector<2x1x1xf32> -> vector<2x1x1xf32>
    %87 = vector.broadcast %86 : vector<2x1x1xf32> to vector<2x1x16xf32>
    %88 = arith.mulf %83, %87 : vector<2x1x16xf32>
    %89 = vector.shape_cast %88 : vector<2x1x16xf32> to vector<2x16xf32>
    %90 = tpu.concatenate %89, %74 in 1 : vector<2x16xf32>, vector<2x112xf32> -> vector<2x128xf32>
    %91 = arith.index_cast %c0_i32 : i32 to index
    %c0_75 = arith.constant 0 : index
    %c0_76 = arith.constant 0 : index
    %92 = vector.load %arg18[%91, %c0_75, %c0_76] : memref<6x2x128xf32, #tpu.memory_space<vmem>>, vector<1x2x128xf32>
    %93 = vector.shape_cast %92 : vector<1x2x128xf32> to vector<2x128xf32>
    %94 = vector.shape_cast %90 : vector<2x128xf32> to vector<1x2x128xf32>
    tpu.vector_store %arg18[%91, %c0_75, %c0_76], %94 {strides = array<i32>} : memref<6x2x128xf32, #tpu.memory_space<vmem>>, vector<1x2x128xf32>,
    "tpu.trace_start"() <{level = 10 : i32, message = "bqn,bnc->bqc"}> : () -> ()
    %cst_77 = arith.constant dense<0.000000e+00> : vector<2x1x32xf32>
    %95 = tpu.matmul %88, %0, %cst_77 {dimension_numbers = #tpu.dot_dimension_numbers<[2], [1], [1], [2], [0, 0, 0, 1, 1, 2], [0], [0]>} : vector<2x1x16xf32>, vector<2x16x32xf32>, vector<2x1x32xf32> -> vector<2x1x32xf32>
    "tpu.trace_stop"() : () -> ()
    %96 = vector.shape_cast %95 : vector<2x1x32xf32> to vector<2x32xf32>
    %c0_78 = arith.constant 0 : index
    %97 = arith.index_cast %c0_i32 : i32 to index
    %c0_79 = arith.constant 0 : index
    %c0_80 = arith.constant 0 : index
    %98 = vector.load %arg19[%c0_78, %97, %c0_79, %c0_80] : memref<4x6x2x32xf32, #tpu.memory_space<vmem>>, vector<1x1x2x32xf32>
    %99 = vector.shape_cast %98 : vector<1x1x2x32xf32> to vector<2x32xf32>
    %c0_81 = arith.constant 0 : index
    %c0_82 = arith.constant 0 : index
    %c0_83 = arith.constant 0 : index
    %100 = vector.load %arg10[%c0_81, %c0_82, %c0_83] : memref<4x32x32xf32, #tpu.memory_space<vmem>>, vector<1x32x32xf32>
    %101 = vector.shape_cast %100 : vector<1x32x32xf32> to vector<32x32xf32>
    %cst_84 = arith.constant dense<0.000000e+00> : vector<2x32xf32>
    %102 = tpu.matmul %96, %101, %cst_84 {dimension_numbers = #tpu.dot_dimension_numbers<[1], [0], [0], [1], [0, 0, 1, 1], [], []>} : vector<2x32xf32>, vector<32x32xf32>, vector<2x32xf32> -> vector<2x32xf32>
    %103 = arith.addf %99, %102 : vector<2x32xf32>
    %c0_85 = arith.constant 0 : index
    %c0_86 = arith.constant 0 : index
    %c0_87 = arith.constant 0 : index
    %104 = vector.load %arg11[%c0_85, %c0_86, %c0_87] : memref<4x32x32xf32, #tpu.memory_space<vmem>>, vector<1x32x32xf32>
    %105 = vector.shape_cast %104 : vector<1x32x32xf32> to vector<32x32xf32>
    %cst_88 = arith.constant dense<0.000000e+00> : vector<2x32xf32>
    %106 = tpu.matmul %8, %105, %cst_88 {dimension_numbers = #tpu.dot_dimension_numbers<[1], [0], [0], [1], [0, 0, 1, 1], [], []>} : vector<2x32xf32>, vector<32x32xf32>, vector<2x32xf32> -> vector<2x32xf32>
    %107 = arith.addf %103, %106 : vector<2x32xf32>
    %108 = arith.negf %107 : vector<2x32xf32>
    %109 = math.exp %108 : vector<2x32xf32>
    %cst_89 = arith.constant 1.000000e+00 : f32
    %110 = vector.broadcast %cst_89 : f32 to vector<2x32xf32>
    %111 = arith.addf %110, %109 : vector<2x32xf32>
    %112 = arith.divf %110, %111 : vector<2x32xf32>
    %c1_90 = arith.constant 1 : index
    %113 = arith.index_cast %c0_i32 : i32 to index
    %c0_91 = arith.constant 0 : index
    %c0_92 = arith.constant 0 : index
    %114 = vector.load %arg19[%c1_90, %113, %c0_91, %c0_92] : memref<4x6x2x32xf32, #tpu.memory_space<vmem>>, vector<1x1x2x32xf32>
    %115 = vector.shape_cast %114 : vector<1x1x2x32xf32> to vector<2x32xf32>
    %c1_93 = arith.constant 1 : index
    %c0_94 = arith.constant 0 : index
    %c0_95 = arith.constant 0 : index
    %116 = vector.load %arg10[%c1_93, %c0_94, %c0_95] : memref<4x32x32xf32, #tpu.memory_space<vmem>>, vector<1x32x32xf32>
    %117 = vector.shape_cast %116 : vector<1x32x32xf32> to vector<32x32xf32>
    %cst_96 = arith.constant dense<0.000000e+00> : vector<2x32xf32>
    %118 = tpu.matmul %96, %117, %cst_96 {dimension_numbers = #tpu.dot_dimension_numbers<[1], [0], [0], [1], [0, 0, 1, 1], [], []>} : vector<2x32xf32>, vector<32x32xf32>, vector<2x32xf32> -> vector<2x32xf32>
    %119 = arith.addf %115, %118 : vector<2x32xf32>
    %c1_97 = arith.constant 1 : index
    %c0_98 = arith.constant 0 : index
    %c0_99 = arith.constant 0 : index
    %120 = vector.load %arg11[%c1_97, %c0_98, %c0_99] : memref<4x32x32xf32, #tpu.memory_space<vmem>>, vector<1x32x32xf32>
    %121 = vector.shape_cast %120 : vector<1x32x32xf32> to vector<32x32xf32>
    %cst_100 = arith.constant dense<0.000000e+00> : vector<2x32xf32>
    %122 = tpu.matmul %8, %121, %cst_100 {dimension_numbers = #tpu.dot_dimension_numbers<[1], [0], [0], [1], [0, 0, 1, 1], [], []>} : vector<2x32xf32>, vector<32x32xf32>, vector<2x32xf32> -> vector<2x32xf32>
    %123 = arith.addf %119, %122 : vector<2x32xf32>
    %124 = arith.negf %123 : vector<2x32xf32>
    %125 = math.exp %124 : vector<2x32xf32>
    %cst_101 = arith.constant 1.000000e+00 : f32
    %126 = vector.broadcast %cst_101 : f32 to vector<2x32xf32>
    %127 = arith.addf %126, %125 : vector<2x32xf32>
    %128 = arith.divf %126, %127 : vector<2x32xf32>
    %c2_102 = arith.constant 2 : index
    %129 = arith.index_cast %c0_i32 : i32 to index
    %c0_103 = arith.constant 0 : index
    %c0_104 = arith.constant 0 : index
    %130 = vector.load %arg19[%c2_102, %129, %c0_103, %c0_104] : memref<4x6x2x32xf32, #tpu.memory_space<vmem>>, vector<1x1x2x32xf32>
    %131 = vector.shape_cast %130 : vector<1x1x2x32xf32> to vector<2x32xf32>
    %c2_105 = arith.constant 2 : index
    %c0_106 = arith.constant 0 : index
    %c0_107 = arith.constant 0 : index
    %132 = vector.load %arg10[%c2_105, %c0_106, %c0_107] : memref<4x32x32xf32, #tpu.memory_space<vmem>>, vector<1x32x32xf32>
    %133 = vector.shape_cast %132 : vector<1x32x32xf32> to vector<32x32xf32>
    %cst_108 = arith.constant dense<0.000000e+00> : vector<2x32xf32>
    %134 = tpu.matmul %96, %133, %cst_108 {dimension_numbers = #tpu.dot_dimension_numbers<[1], [0], [0], [1], [0, 0, 1, 1], [], []>} : vector<2x32xf32>, vector<32x32xf32>, vector<2x32xf32> -> vector<2x32xf32>
    %135 = arith.addf %131, %134 : vector<2x32xf32>
    %c2_109 = arith.constant 2 : index
    %c0_110 = arith.constant 0 : index
    %c0_111 = arith.constant 0 : index
    %136 = vector.load %arg11[%c2_109, %c0_110, %c0_111] : memref<4x32x32xf32, #tpu.memory_space<vmem>>, vector<1x32x32xf32>
    %137 = vector.shape_cast %136 : vector<1x32x32xf32> to vector<32x32xf32>
    %cst_112 = arith.constant dense<0.000000e+00> : vector<2x32xf32>
    %138 = tpu.matmul %8, %137, %cst_112 {dimension_numbers = #tpu.dot_dimension_numbers<[1], [0], [0], [1], [0, 0, 1, 1], [], []>} : vector<2x32xf32>, vector<32x32xf32>, vector<2x32xf32> -> vector<2x32xf32>
    %139 = arith.addf %135, %138 : vector<2x32xf32>
    %140 = math.tanh %139 : vector<2x32xf32>
    %c3_113 = arith.constant 3 : index
    %141 = arith.index_cast %c0_i32 : i32 to index
    %c0_114 = arith.constant 0 : index
    %c0_115 = arith.constant 0 : index
    %142 = vector.load %arg19[%c3_113, %141, %c0_114, %c0_115] : memref<4x6x2x32xf32, #tpu.memory_space<vmem>>, vector<1x1x2x32xf32>
    %143 = vector.shape_cast %142 : vector<1x1x2x32xf32> to vector<2x32xf32>
    %c3_116 = arith.constant 3 : index
    %c0_117 = arith.constant 0 : index
    %c0_118 = arith.constant 0 : index
    %144 = vector.load %arg10[%c3_116, %c0_117, %c0_118] : memref<4x32x32xf32, #tpu.memory_space<vmem>>, vector<1x32x32xf32>
    %145 = vector.shape_cast %144 : vector<1x32x32xf32> to vector<32x32xf32>
    %cst_119 = arith.constant dense<0.000000e+00> : vector<2x32xf32>
    %146 = tpu.matmul %96, %145, %cst_119 {dimension_numbers = #tpu.dot_dimension_numbers<[1], [0], [0], [1], [0, 0, 1, 1], [], []>} : vector<2x32xf32>, vector<32x32xf32>, vector<2x32xf32> -> vector<2x32xf32>
    %147 = arith.addf %143, %146 : vector<2x32xf32>
    %c3_120 = arith.constant 3 : index
    %c0_121 = arith.constant 0 : index
    %c0_122 = arith.constant 0 : index
    %148 = vector.load %arg11[%c3_120, %c0_121, %c0_122] : memref<4x32x32xf32, #tpu.memory_space<vmem>>, vector<1x32x32xf32>
    %149 = vector.shape_cast %148 : vector<1x32x32xf32> to vector<32x32xf32>
    %cst_123 = arith.constant dense<0.000000e+00> : vector<2x32xf32>
    %150 = tpu.matmul %8, %149, %cst_123 {dimension_numbers = #tpu.dot_dimension_numbers<[1], [0], [0], [1], [0, 0, 1, 1], [], []>} : vector<2x32xf32>, vector<32x32xf32>, vector<2x32xf32> -> vector<2x32xf32>
    %151 = arith.addf %147, %150 : vector<2x32xf32>
    %152 = arith.negf %151 : vector<2x32xf32>
    %153 = math.exp %152 : vector<2x32xf32>
    %cst_124 = arith.constant 1.000000e+00 : f32
    %154 = vector.broadcast %cst_124 : f32 to vector<2x32xf32>
    %155 = arith.addf %154, %153 : vector<2x32xf32>
    %156 = arith.divf %154, %155 : vector<2x32xf32>
    %157 = arith.mulf %128, %13 : vector<2x32xf32>
    %158 = arith.mulf %112, %140 : vector<2x32xf32>
    %159 = arith.addf %157, %158 : vector<2x32xf32>
    %160 = math.tanh %159 : vector<2x32xf32>
    %161 = arith.mulf %156, %160 : vector<2x32xf32>
    %162 = arith.index_cast %c0_i32 : i32 to index
    %c0_125 = arith.constant 0 : index
    %c0_126 = arith.constant 0 : index
    %163 = vector.load %arg20[%162, %c0_125, %c0_126] : memref<6x2x32xf32, #tpu.memory_space<vmem>>, vector<1x2x32xf32>
    %164 = vector.shape_cast %163 : vector<1x2x32xf32> to vector<2x32xf32>
    %c0_127 = arith.constant 0 : index
    %c0_128 = arith.constant 0 : index
    %165 = vector.load %arg13[%c0_127, %c0_128] : memref<32x32xf32, #tpu.memory_space<vmem>>, vector<32x32xf32>
    %cst_129 = arith.constant dense<0.000000e+00> : vector<2x32xf32>
    %166 = tpu.matmul %161, %165, %cst_129 {dimension_numbers = #tpu.dot_dimension_numbers<[1], [0], [0], [1], [0, 0, 1, 1], [], []>} : vector<2x32xf32>, vector<32x32xf32>, vector<2x32xf32> -> vector<2x32xf32>
    %167 = arith.addf %164, %166 : vector<2x32xf32>
    %c0_130 = arith.constant 0 : index
    %c0_131 = arith.constant 0 : index
    %168 = vector.load %arg14[%c0_130, %c0_131] : memref<32x32xf32, #tpu.memory_space<vmem>>, vector<32x32xf32>
    %cst_132 = arith.constant dense<0.000000e+00> : vector<2x32xf32>
    %169 = tpu.matmul %96, %168, %cst_132 {dimension_numbers = #tpu.dot_dimension_numbers<[1], [0], [0], [1], [0, 0, 1, 1], [], []>} : vector<2x32xf32>, vector<32x32xf32>, vector<2x32xf32> -> vector<2x32xf32>
    %170 = arith.addf %167, %169 : vector<2x32xf32>
    %cst_133 = arith.constant 0.000000e+00 : f32
    %171 = vector.broadcast %cst_133 : f32 to vector<2x32xf32>
    %172 = arith.maximumf %170, %171 : vector<2x32xf32>
    %173 = arith.index_cast %c0_i32 : i32 to index
    %c0_134 = arith.constant 0 : index
    %c0_135 = arith.constant 0 : index
    %174 = vector.load %arg17[%173, %c0_134, %c0_135] : memref<6x2x32xf32, #tpu.memory_space<vmem>>, vector<1x2x32xf32>
    %175 = vector.shape_cast %174 : vector<1x2x32xf32> to vector<2x32xf32>
    %176 = vector.shape_cast %172 : vector<2x32xf32> to vector<1x2x32xf32>
    tpu.vector_store %arg17[%173, %c0_134, %c0_135], %176 {strides = array<i32>} : memref<6x2x32xf32, #tpu.memory_space<vmem>>, vector<1x2x32xf32>,
    %c1_i32 = arith.constant 1 : i32
    %177 = vector.shape_cast %161 : vector<2x32xf32> to vector<2x1x32xf32>
    "tpu.trace_start"() <{level = 10 : i32, message = "bqu,bnu->bqn"}> : () -> ()
    %cst_136 = arith.constant dense<0.000000e+00> : vector<2x1x16xf32>
    %178 = tpu.matmul %177, %20, %cst_136 {dimension_numbers = #tpu.dot_dimension_numbers<[2], [2], [1], [1], [0, 0, 0, 1, 1, 1], [0], [0]>} : vector<2x1x32xf32>, vector<2x16x32xf32>, vector<2x1x16xf32> -> vector<2x1x16xf32>
    "tpu.trace_stop"() : () -> ()
    %cst_137 = arith.constant 0.176776692 : f32
    %179 = vector.broadcast %cst_137 : f32 to vector<2x1x16xf32>
    %180 = arith.mulf %178, %179 : vector<2x1x16xf32>
    %cst_138 = arith.constant dense<0xFF800000> : vector<2x1xf32>
    %181 = vector.multi_reduction <maximumf>, %180, %cst_138 [2] : vector<2x1x16xf32> to vector<2x1xf32>
    %182 = vector.shape_cast %181 : vector<2x1xf32> to vector<2x1x1xf32>
    %183 = vector.broadcast %182 : vector<2x1x1xf32> to vector<2x1x16xf32>
    %184 = arith.subf %180, %183 : vector<2x1x16xf32>
    %185 = math.exp %184 : vector<2x1x16xf32>
    %cst_139 = arith.constant dense<0.000000e+00> : vector<2x1xf32>
    %186 = vector.multi_reduction <add>, %185, %cst_139 [2] : vector<2x1x16xf32> to vector<2x1xf32>
    %187 = vector.shape_cast %186 : vector<2x1xf32> to vector<2x1x1xf32>
    %188 = tpu.reciprocal %187 {approx = true} : vector<2x1x1xf32> -> vector<2x1x1xf32>
    %189 = vector.broadcast %188 : vector<2x1x1xf32> to vector<2x1x16xf32>
    %190 = arith.mulf %185, %189 : vector<2x1x16xf32>
    %191 = vector.shape_cast %190 : vector<2x1x16xf32> to vector<2x16xf32>
    %192 = tpu.concatenate %191, %74 in 1 : vector<2x16xf32>, vector<2x112xf32> -> vector<2x128xf32>
    %193 = arith.index_cast %c1_i32 : i32 to index
    %c0_140 = arith.constant 0 : index
    %c0_141 = arith.constant 0 : index
    %194 = vector.load %arg18[%193, %c0_140, %c0_141] : memref<6x2x128xf32, #tpu.memory_space<vmem>>, vector<1x2x128xf32>
    %195 = vector.shape_cast %194 : vector<1x2x128xf32> to vector<2x128xf32>
    %196 = vector.shape_cast %192 : vector<2x128xf32> to vector<1x2x128xf32>
    tpu.vector_store %arg18[%193, %c0_140, %c0_141], %196 {strides = array<i32>} : memref<6x2x128xf32, #tpu.memory_space<vmem>>, vector<1x2x128xf32>,
    "tpu.trace_start"() <{level = 10 : i32, message = "bqn,bnc->bqc"}> : () -> ()
    %cst_142 = arith.constant dense<0.000000e+00> : vector<2x1x32xf32>
    %197 = tpu.matmul %190, %0, %cst_142 {dimension_numbers = #tpu.dot_dimension_numbers<[2], [1], [1], [2], [0, 0, 0, 1, 1, 2], [0], [0]>} : vector<2x1x16xf32>, vector<2x16x32xf32>, vector<2x1x32xf32> -> vector<2x1x32xf32>
    "tpu.trace_stop"() : () -> ()
    %198 = vector.shape_cast %197 : vector<2x1x32xf32> to vector<2x32xf32>
    %c0_143 = arith.constant 0 : index
    %199 = arith.index_cast %c1_i32 : i32 to index
    %c0_144 = arith.constant 0 : index
    %c0_145 = arith.constant 0 : index
    %200 = vector.load %arg19[%c0_143, %199, %c0_144, %c0_145] : memref<4x6x2x32xf32, #tpu.memory_space<vmem>>, vector<1x1x2x32xf32>
    %201 = vector.shape_cast %200 : vector<1x1x2x32xf32> to vector<2x32xf32>
    %c0_146 = arith.constant 0 : index
    %c0_147 = arith.constant 0 : index
    %c0_148 = arith.constant 0 : index
    %202 = vector.load %arg10[%c0_146, %c0_147, %c0_148] : memref<4x32x32xf32, #tpu.memory_space<vmem>>, vector<1x32x32xf32>
    %203 = vector.shape_cast %202 : vector<1x32x32xf32> to vector<32x32xf32>
    %cst_149 = arith.constant dense<0.000000e+00> : vector<2x32xf32>
    %204 = tpu.matmul %198, %203, %cst_149 {dimension_numbers = #tpu.dot_dimension_numbers<[1], [0], [0], [1], [0, 0, 1, 1], [], []>} : vector<2x32xf32>, vector<32x32xf32>, vector<2x32xf32> -> vector<2x32xf32>
    %205 = arith.addf %201, %204 : vector<2x32xf32>
    %c0_150 = arith.constant 0 : index
    %c0_151 = arith.constant 0 : index
    %c0_152 = arith.constant 0 : index
    %206 = vector.load %arg11[%c0_150, %c0_151, %c0_152] : memref<4x32x32xf32, #tpu.memory_space<vmem>>, vector<1x32x32xf32>
    %207 = vector.shape_cast %206 : vector<1x32x32xf32> to vector<32x32xf32>
    %cst_153 = arith.constant dense<0.000000e+00> : vector<2x32xf32>
    %208 = tpu.matmul %161, %207, %cst_153 {dimension_numbers = #tpu.dot_dimension_numbers<[1], [0], [0], [1], [0, 0, 1, 1], [], []>} : vector<2x32xf32>, vector<32x32xf32>, vector<2x32xf32> -> vector<2x32xf32>
    %209 = arith.addf %205, %208 : vector<2x32xf32>
    %210 = arith.negf %209 : vector<2x32xf32>
    %211 = math.exp %210 : vector<2x32xf32>
    %cst_154 = arith.constant 1.000000e+00 : f32
    %212 = vector.broadcast %cst_154 : f32 to vector<2x32xf32>
    %213 = arith.addf %212, %211 : vector<2x32xf32>
    %214 = arith.divf %212, %213 : vector<2x32xf32>
    %c1_155 = arith.constant 1 : index
    %215 = arith.index_cast %c1_i32 : i32 to index
    %c0_156 = arith.constant 0 : index
    %c0_157 = arith.constant 0 : index
    %216 = vector.load %arg19[%c1_155, %215, %c0_156, %c0_157] : memref<4x6x2x32xf32, #tpu.memory_space<vmem>>, vector<1x1x2x32xf32>
    %217 = vector.shape_cast %216 : vector<1x1x2x32xf32> to vector<2x32xf32>
    %c1_158 = arith.constant 1 : index
    %c0_159 = arith.constant 0 : index
    %c0_160 = arith.constant 0 : index
    %218 = vector.load %arg10[%c1_158, %c0_159, %c0_160] : memref<4x32x32xf32, #tpu.memory_space<vmem>>, vector<1x32x32xf32>
    %219 = vector.shape_cast %218 : vector<1x32x32xf32> to vector<32x32xf32>
    %cst_161 = arith.constant dense<0.000000e+00> : vector<2x32xf32>
    %220 = tpu.matmul %198, %219, %cst_161 {dimension_numbers = #tpu.dot_dimension_numbers<[1], [0], [0], [1], [0, 0, 1, 1], [], []>} : vector<2x32xf32>, vector<32x32xf32>, vector<2x32xf32> -> vector<2x32xf32>
    %221 = arith.addf %217, %220 : vector<2x32xf32>
    %c1_162 = arith.constant 1 : index
    %c0_163 = arith.constant 0 : index
    %c0_164 = arith.constant 0 : index
    %222 = vector.load %arg11[%c1_162, %c0_163, %c0_164] : memref<4x32x32xf32, #tpu.memory_space<vmem>>, vector<1x32x32xf32>
    %223 = vector.shape_cast %222 : vector<1x32x32xf32> to vector<32x32xf32>
    %cst_165 = arith.constant dense<0.000000e+00> : vector<2x32xf32>
    %224 = tpu.matmul %161, %223, %cst_165 {dimension_numbers = #tpu.dot_dimension_numbers<[1], [0], [0], [1], [0, 0, 1, 1], [], []>} : vector<2x32xf32>, vector<32x32xf32>, vector<2x32xf32> -> vector<2x32xf32>
    %225 = arith.addf %221, %224 : vector<2x32xf32>
    %226 = arith.negf %225 : vector<2x32xf32>
    %227 = math.exp %226 : vector<2x32xf32>
    %cst_166 = arith.constant 1.000000e+00 : f32
    %228 = vector.broadcast %cst_166 : f32 to vector<2x32xf32>
    %229 = arith.addf %228, %227 : vector<2x32xf32>
    %230 = arith.divf %228, %229 : vector<2x32xf32>
    %c2_167 = arith.constant 2 : index
    %231 = arith.index_cast %c1_i32 : i32 to index
    %c0_168 = arith.constant 0 : index
    %c0_169 = arith.constant 0 : index
    %232 = vector.load %arg19[%c2_167, %231, %c0_168, %c0_169] : memref<4x6x2x32xf32, #tpu.memory_space<vmem>>, vector<1x1x2x32xf32>
    %233 = vector.shape_cast %232 : vector<1x1x2x32xf32> to vector<2x32xf32>
    %c2_170 = arith.constant 2 : index
    %c0_171 = arith.constant 0 : index
    %c0_172 = arith.constant 0 : index
    %234 = vector.load %arg10[%c2_170, %c0_171, %c0_172] : memref<4x32x32xf32, #tpu.memory_space<vmem>>, vector<1x32x32xf32>
    %235 = vector.shape_cast %234 : vector<1x32x32xf32> to vector<32x32xf32>
    %cst_173 = arith.constant dense<0.000000e+00> : vector<2x32xf32>
    %236 = tpu.matmul %198, %235, %cst_173 {dimension_numbers = #tpu.dot_dimension_numbers<[1], [0], [0], [1], [0, 0, 1, 1], [], []>} : vector<2x32xf32>, vector<32x32xf32>, vector<2x32xf32> -> vector<2x32xf32>
    %237 = arith.addf %233, %236 : vector<2x32xf32>
    %c2_174 = arith.constant 2 : index
    %c0_175 = arith.constant 0 : index
    %c0_176 = arith.constant 0 : index
    %238 = vector.load %arg11[%c2_174, %c0_175, %c0_176] : memref<4x32x32xf32, #tpu.memory_space<vmem>>, vector<1x32x32xf32>
    %239 = vector.shape_cast %238 : vector<1x32x32xf32> to vector<32x32xf32>
    %cst_177 = arith.constant dense<0.000000e+00> : vector<2x32xf32>
    %240 = tpu.matmul %161, %239, %cst_177 {dimension_numbers = #tpu.dot_dimension_numbers<[1], [0], [0], [1], [0, 0, 1, 1], [], []>} : vector<2x32xf32>, vector<32x32xf32>, vector<2x32xf32> -> vector<2x32xf32>
    %241 = arith.addf %237, %240 : vector<2x32xf32>
    %242 = math.tanh %241 : vector<2x32xf32>
    %c3_178 = arith.constant 3 : index
    %243 = arith.index_cast %c1_i32 : i32 to index
    %c0_179 = arith.constant 0 : index
    %c0_180 = arith.constant 0 : index
    %244 = vector.load %arg19[%c3_178, %243, %c0_179, %c0_180] : memref<4x6x2x32xf32, #tpu.memory_space<vmem>>, vector<1x1x2x32xf32>
    %245 = vector.shape_cast %244 : vector<1x1x2x32xf32> to vector<2x32xf32>
    %c3_181 = arith.constant 3 : index
    %c0_182 = arith.constant 0 : index
    %c0_183 = arith.constant 0 : index
    %246 = vector.load %arg10[%c3_181, %c0_182, %c0_183] : memref<4x32x32xf32, #tpu.memory_space<vmem>>, vector<1x32x32xf32>
    %247 = vector.shape_cast %246 : vector<1x32x32xf32> to vector<32x32xf32>
    %cst_184 = arith.constant dense<0.000000e+00> : vector<2x32xf32>
    %248 = tpu.matmul %198, %247, %cst_184 {dimension_numbers = #tpu.dot_dimension_numbers<[1], [0], [0], [1], [0, 0, 1, 1], [], []>} : vector<2x32xf32>, vector<32x32xf32>, vector<2x32xf32> -> vector<2x32xf32>
    %249 = arith.addf %245, %248 : vector<2x32xf32>
    %c3_185 = arith.constant 3 : index
    %c0_186 = arith.constant 0 : index
    %c0_187 = arith.constant 0 : index
    %250 = vector.load %arg11[%c3_185, %c0_186, %c0_187] : memref<4x32x32xf32, #tpu.memory_space<vmem>>, vector<1x32x32xf32>
    %251 = vector.shape_cast %250 : vector<1x32x32xf32> to vector<32x32xf32>
    %cst_188 = arith.constant dense<0.000000e+00> : vector<2x32xf32>
    %252 = tpu.matmul %161, %251, %cst_188 {dimension_numbers = #tpu.dot_dimension_numbers<[1], [0], [0], [1], [0, 0, 1, 1], [], []>} : vector<2x32xf32>, vector<32x32xf32>, vector<2x32xf32> -> vector<2x32xf32>
    %253 = arith.addf %249, %252 : vector<2x32xf32>
    %254 = arith.negf %253 : vector<2x32xf32>
    %255 = math.exp %254 : vector<2x32xf32>
    %cst_189 = arith.constant 1.000000e+00 : f32
    %256 = vector.broadcast %cst_189 : f32 to vector<2x32xf32>
    %257 = arith.addf %256, %255 : vector<2x32xf32>
    %258 = arith.divf %256, %257 : vector<2x32xf32>
    %259 = arith.mulf %230, %159 : vector<2x32xf32>
    %260 = arith.mulf %214, %242 : vector<2x32xf32>
    %261 = arith.addf %259, %260 : vector<2x32xf32>
    %262 = math.tanh %261 : vector<2x32xf32>
    %263 = arith.mulf %258, %262 : vector<2x32xf32>
    %264 = arith.index_cast %c1_i32 : i32 to index
    %c0_190 = arith.constant 0 : index
    %c0_191 = arith.constant 0 : index
    %265 = vector.load %arg20[%264, %c0_190, %c0_191] : memref<6x2x32xf32, #tpu.memory_space<vmem>>, vector<1x2x32xf32>
    %266 = vector.shape_cast %265 : vector<1x2x32xf32> to vector<2x32xf32>
    %c0_192 = arith.constant 0 : index
    %c0_193 = arith.constant 0 : index
    %267 = vector.load %arg13[%c0_192, %c0_193] : memref<32x32xf32, #tpu.memory_space<vmem>>, vector<32x32xf32>
    %cst_194 = arith.constant dense<0.000000e+00> : vector<2x32xf32>
    %268 = tpu.matmul %263, %267, %cst_194 {dimension_numbers = #tpu.dot_dimension_numbers<[1], [0], [0], [1], [0, 0, 1, 1], [], []>} : vector<2x32xf32>, vector<32x32xf32>, vector<2x32xf32> -> vector<2x32xf32>
    %269 = arith.addf %266, %268 : vector<2x32xf32>
    %c0_195 = arith.constant 0 : index
    %c0_196 = arith.constant 0 : index
    %270 = vector.load %arg14[%c0_195, %c0_196] : memref<32x32xf32, #tpu.memory_space<vmem>>, vector<32x32xf32>
    %cst_197 = arith.constant dense<0.000000e+00> : vector<2x32xf32>
    %271 = tpu.matmul %198, %270, %cst_197 {dimension_numbers = #tpu.dot_dimension_numbers<[1], [0], [0], [1], [0, 0, 1, 1], [], []>} : vector<2x32xf32>, vector<32x32xf32>, vector<2x32xf32> -> vector<2x32xf32>
    %272 = arith.addf %269, %271 : vector<2x32xf32>
    %cst_198 = arith.constant 0.000000e+00 : f32
    %273 = vector.broadcast %cst_198 : f32 to vector<2x32xf32>
    %274 = arith.maximumf %272, %273 : vector<2x32xf32>
    %275 = arith.index_cast %c1_i32 : i32 to index
    %c0_199 = arith.constant 0 : index
    %c0_200 = arith.constant 0 : index
    %276 = vector.load %arg17[%275, %c0_199, %c0_200] : memref<6x2x32xf32, #tpu.memory_space<vmem>>, vector<1x2x32xf32>
    %277 = vector.shape_cast %276 : vector<1x2x32xf32> to vector<2x32xf32>
    %278 = vector.shape_cast %274 : vector<2x32xf32> to vector<1x2x32xf32>
    tpu.vector_store %arg17[%275, %c0_199, %c0_200], %278 {strides = array<i32>} : memref<6x2x32xf32, #tpu.memory_space<vmem>>, vector<1x2x32xf32>,
    %c2_i32 = arith.constant 2 : i32
    %279 = vector.shape_cast %263 : vector<2x32xf32> to vector<2x1x32xf32>
    "tpu.trace_start"() <{level = 10 : i32, message = "bqu,bnu->bqn"}> : () -> ()
    %cst_201 = arith.constant dense<0.000000e+00> : vector<2x1x16xf32>
    %280 = tpu.matmul %279, %20, %cst_201 {dimension_numbers = #tpu.dot_dimension_numbers<[2], [2], [1], [1], [0, 0, 0, 1, 1, 1], [0], [0]>} : vector<2x1x32xf32>, vector<2x16x32xf32>, vector<2x1x16xf32> -> vector<2x1x16xf32>
    "tpu.trace_stop"() : () -> ()
    %cst_202 = arith.constant 0.176776692 : f32
    %281 = vector.broadcast %cst_202 : f32 to vector<2x1x16xf32>
    %282 = arith.mulf %280, %281 : vector<2x1x16xf32>
    %cst_203 = arith.constant dense<0xFF800000> : vector<2x1xf32>
    %283 = vector.multi_reduction <maximumf>, %282, %cst_203 [2] : vector<2x1x16xf32> to vector<2x1xf32>
    %284 = vector.shape_cast %283 : vector<2x1xf32> to vector<2x1x1xf32>
    %285 = vector.broadcast %284 : vector<2x1x1xf32> to vector<2x1x16xf32>
    %286 = arith.subf %282, %285 : vector<2x1x16xf32>
    %287 = math.exp %286 : vector<2x1x16xf32>
    %cst_204 = arith.constant dense<0.000000e+00> : vector<2x1xf32>
    %288 = vector.multi_reduction <add>, %287, %cst_204 [2] : vector<2x1x16xf32> to vector<2x1xf32>
    %289 = vector.shape_cast %288 : vector<2x1xf32> to vector<2x1x1xf32>
    %290 = tpu.reciprocal %289 {approx = true} : vector<2x1x1xf32> -> vector<2x1x1xf32>
    %291 = vector.broadcast %290 : vector<2x1x1xf32> to vector<2x1x16xf32>
    %292 = arith.mulf %287, %291 : vector<2x1x16xf32>
    %293 = vector.shape_cast %292 : vector<2x1x16xf32> to vector<2x16xf32>
    %294 = tpu.concatenate %293, %74 in 1 : vector<2x16xf32>, vector<2x112xf32> -> vector<2x128xf32>
    %295 = arith.index_cast %c2_i32 : i32 to index
    %c0_205 = arith.constant 0 : index
    %c0_206 = arith.constant 0 : index
    %296 = vector.load %arg18[%295, %c0_205, %c0_206] : memref<6x2x128xf32, #tpu.memory_space<vmem>>, vector<1x2x128xf32>
    %297 = vector.shape_cast %296 : vector<1x2x128xf32> to vector<2x128xf32>
    %298 = vector.shape_cast %294 : vector<2x128xf32> to vector<1x2x128xf32>
    tpu.vector_store %arg18[%295, %c0_205, %c0_206], %298 {strides = array<i32>} : memref<6x2x128xf32, #tpu.memory_space<vmem>>, vector<1x2x128xf32>,
    "tpu.trace_start"() <{level = 10 : i32, message = "bqn,bnc->bqc"}> : () -> ()
    %cst_207 = arith.constant dense<0.000000e+00> : vector<2x1x32xf32>
    %299 = tpu.matmul %292, %0, %cst_207 {dimension_numbers = #tpu.dot_dimension_numbers<[2], [1], [1], [2], [0, 0, 0, 1, 1, 2], [0], [0]>} : vector<2x1x16xf32>, vector<2x16x32xf32>, vector<2x1x32xf32> -> vector<2x1x32xf32>
    "tpu.trace_stop"() : () -> ()
    %300 = vector.shape_cast %299 : vector<2x1x32xf32> to vector<2x32xf32>
    %c0_208 = arith.constant 0 : index
    %301 = arith.index_cast %c2_i32 : i32 to index
    %c0_209 = arith.constant 0 : index
    %c0_210 = arith.constant 0 : index
    %302 = vector.load %arg19[%c0_208, %301, %c0_209, %c0_210] : memref<4x6x2x32xf32, #tpu.memory_space<vmem>>, vector<1x1x2x32xf32>
    %303 = vector.shape_cast %302 : vector<1x1x2x32xf32> to vector<2x32xf32>
    %c0_211 = arith.constant 0 : index
    %c0_212 = arith.constant 0 : index
    %c0_213 = arith.constant 0 : index
    %304 = vector.load %arg10[%c0_211, %c0_212, %c0_213] : memref<4x32x32xf32, #tpu.memory_space<vmem>>, vector<1x32x32xf32>
    %305 = vector.shape_cast %304 : vector<1x32x32xf32> to vector<32x32xf32>
    %cst_214 = arith.constant dense<0.000000e+00> : vector<2x32xf32>
    %306 = tpu.matmul %300, %305, %cst_214 {dimension_numbers = #tpu.dot_dimension_numbers<[1], [0], [0], [1], [0, 0, 1, 1], [], []>} : vector<2x32xf32>, vector<32x32xf32>, vector<2x32xf32> -> vector<2x32xf32>
    %307 = arith.addf %303, %306 : vector<2x32xf32>
    %c0_215 = arith.constant 0 : index
    %c0_216 = arith.constant 0 : index
    %c0_217 = arith.constant 0 : index
    %308 = vector.load %arg11[%c0_215, %c0_216, %c0_217] : memref<4x32x32xf32, #tpu.memory_space<vmem>>, vector<1x32x32xf32>
    %309 = vector.shape_cast %308 : vector<1x32x32xf32> to vector<32x32xf32>
    %cst_218 = arith.constant dense<0.000000e+00> : vector<2x32xf32>
    %310 = tpu.matmul %263, %309, %cst_218 {dimension_numbers = #tpu.dot_dimension_numbers<[1], [0], [0], [1], [0, 0, 1, 1], [], []>} : vector<2x32xf32>, vector<32x32xf32>, vector<2x32xf32> -> vector<2x32xf32>
    %311 = arith.addf %307, %310 : vector<2x32xf32>
    %312 = arith.negf %311 : vector<2x32xf32>
    %313 = math.exp %312 : vector<2x32xf32>
    %cst_219 = arith.constant 1.000000e+00 : f32
    %314 = vector.broadcast %cst_219 : f32 to vector<2x32xf32>
    %315 = arith.addf %314, %313 : vector<2x32xf32>
    %316 = arith.divf %314, %315 : vector<2x32xf32>
    %c1_220 = arith.constant 1 : index
    %317 = arith.index_cast %c2_i32 : i32 to index
    %c0_221 = arith.constant 0 : index
    %c0_222 = arith.constant 0 : index
    %318 = vector.load %arg19[%c1_220, %317, %c0_221, %c0_222] : memref<4x6x2x32xf32, #tpu.memory_space<vmem>>, vector<1x1x2x32xf32>
    %319 = vector.shape_cast %318 : vector<1x1x2x32xf32> to vector<2x32xf32>
    %c1_223 = arith.constant 1 : index
    %c0_224 = arith.constant 0 : index
    %c0_225 = arith.constant 0 : index
    %320 = vector.load %arg10[%c1_223, %c0_224, %c0_225] : memref<4x32x32xf32, #tpu.memory_space<vmem>>, vector<1x32x32xf32>
    %321 = vector.shape_cast %320 : vector<1x32x32xf32> to vector<32x32xf32>
    %cst_226 = arith.constant dense<0.000000e+00> : vector<2x32xf32>
    %322 = tpu.matmul %300, %321, %cst_226 {dimension_numbers = #tpu.dot_dimension_numbers<[1], [0], [0], [1], [0, 0, 1, 1], [], []>} : vector<2x32xf32>, vector<32x32xf32>, vector<2x32xf32> -> vector<2x32xf32>
    %323 = arith.addf %319, %322 : vector<2x32xf32>
    %c1_227 = arith.constant 1 : index
    %c0_228 = arith.constant 0 : index
    %c0_229 = arith.constant 0 : index
    %324 = vector.load %arg11[%c1_227, %c0_228, %c0_229] : memref<4x32x32xf32, #tpu.memory_space<vmem>>, vector<1x32x32xf32>
    %325 = vector.shape_cast %324 : vector<1x32x32xf32> to vector<32x32xf32>
    %cst_230 = arith.constant dense<0.000000e+00> : vector<2x32xf32>
    %326 = tpu.matmul %263, %325, %cst_230 {dimension_numbers = #tpu.dot_dimension_numbers<[1], [0], [0], [1], [0, 0, 1, 1], [], []>} : vector<2x32xf32>, vector<32x32xf32>, vector<2x32xf32> -> vector<2x32xf32>
    %327 = arith.addf %323, %326 : vector<2x32xf32>
    %328 = arith.negf %327 : vector<2x32xf32>
    %329 = math.exp %328 : vector<2x32xf32>
    %cst_231 = arith.constant 1.000000e+00 : f32
    %330 = vector.broadcast %cst_231 : f32 to vector<2x32xf32>
    %331 = arith.addf %330, %329 : vector<2x32xf32>
    %332 = arith.divf %330, %331 : vector<2x32xf32>
    %c2_232 = arith.constant 2 : index
    %333 = arith.index_cast %c2_i32 : i32 to index
    %c0_233 = arith.constant 0 : index
    %c0_234 = arith.constant 0 : index
    %334 = vector.load %arg19[%c2_232, %333, %c0_233, %c0_234] : memref<4x6x2x32xf32, #tpu.memory_space<vmem>>, vector<1x1x2x32xf32>
    %335 = vector.shape_cast %334 : vector<1x1x2x32xf32> to vector<2x32xf32>
    %c2_235 = arith.constant 2 : index
    %c0_236 = arith.constant 0 : index
    %c0_237 = arith.constant 0 : index
    %336 = vector.load %arg10[%c2_235, %c0_236, %c0_237] : memref<4x32x32xf32, #tpu.memory_space<vmem>>, vector<1x32x32xf32>
    %337 = vector.shape_cast %336 : vector<1x32x32xf32> to vector<32x32xf32>
    %cst_238 = arith.constant dense<0.000000e+00> : vector<2x32xf32>
    %338 = tpu.matmul %300, %337, %cst_238 {dimension_numbers = #tpu.dot_dimension_numbers<[1], [0], [0], [1], [0, 0, 1, 1], [], []>} : vector<2x32xf32>, vector<32x32xf32>, vector<2x32xf32> -> vector<2x32xf32>
    %339 = arith.addf %335, %338 : vector<2x32xf32>
    %c2_239 = arith.constant 2 : index
    %c0_240 = arith.constant 0 : index
    %c0_241 = arith.constant 0 : index
    %340 = vector.load %arg11[%c2_239, %c0_240, %c0_241] : memref<4x32x32xf32, #tpu.memory_space<vmem>>, vector<1x32x32xf32>
    %341 = vector.shape_cast %340 : vector<1x32x32xf32> to vector<32x32xf32>
    %cst_242 = arith.constant dense<0.000000e+00> : vector<2x32xf32>
    %342 = tpu.matmul %263, %341, %cst_242 {dimension_numbers = #tpu.dot_dimension_numbers<[1], [0], [0], [1], [0, 0, 1, 1], [], []>} : vector<2x32xf32>, vector<32x32xf32>, vector<2x32xf32> -> vector<2x32xf32>
    %343 = arith.addf %339, %342 : vector<2x32xf32>
    %344 = math.tanh %343 : vector<2x32xf32>
    %c3_243 = arith.constant 3 : index
    %345 = arith.index_cast %c2_i32 : i32 to index
    %c0_244 = arith.constant 0 : index
    %c0_245 = arith.constant 0 : index
    %346 = vector.load %arg19[%c3_243, %345, %c0_244, %c0_245] : memref<4x6x2x32xf32, #tpu.memory_space<vmem>>, vector<1x1x2x32xf32>
    %347 = vector.shape_cast %346 : vector<1x1x2x32xf32> to vector<2x32xf32>
    %c3_246 = arith.constant 3 : index
    %c0_247 = arith.constant 0 : index
    %c0_248 = arith.constant 0 : index
    %348 = vector.load %arg10[%c3_246, %c0_247, %c0_248] : memref<4x32x32xf32, #tpu.memory_space<vmem>>, vector<1x32x32xf32>
    %349 = vector.shape_cast %348 : vector<1x32x32xf32> to vector<32x32xf32>
    %cst_249 = arith.constant dense<0.000000e+00> : vector<2x32xf32>
    %350 = tpu.matmul %300, %349, %cst_249 {dimension_numbers = #tpu.dot_dimension_numbers<[1], [0], [0], [1], [0, 0, 1, 1], [], []>} : vector<2x32xf32>, vector<32x32xf32>, vector<2x32xf32> -> vector<2x32xf32>
    %351 = arith.addf %347, %350 : vector<2x32xf32>
    %c3_250 = arith.constant 3 : index
    %c0_251 = arith.constant 0 : index
    %c0_252 = arith.constant 0 : index
    %352 = vector.load %arg11[%c3_250, %c0_251, %c0_252] : memref<4x32x32xf32, #tpu.memory_space<vmem>>, vector<1x32x32xf32>
    %353 = vector.shape_cast %352 : vector<1x32x32xf32> to vector<32x32xf32>
    %cst_253 = arith.constant dense<0.000000e+00> : vector<2x32xf32>
    %354 = tpu.matmul %263, %353, %cst_253 {dimension_numbers = #tpu.dot_dimension_numbers<[1], [0], [0], [1], [0, 0, 1, 1], [], []>} : vector<2x32xf32>, vector<32x32xf32>, vector<2x32xf32> -> vector<2x32xf32>
    %355 = arith.addf %351, %354 : vector<2x32xf32>
    %356 = arith.negf %355 : vector<2x32xf32>
    %357 = math.exp %356 : vector<2x32xf32>
    %cst_254 = arith.constant 1.000000e+00 : f32
    %358 = vector.broadcast %cst_254 : f32 to vector<2x32xf32>
    %359 = arith.addf %358, %357 : vector<2x32xf32>
    %360 = arith.divf %358, %359 : vector<2x32xf32>
    %361 = arith.mulf %332, %261 : vector<2x32xf32>
    %362 = arith.mulf %316, %344 : vector<2x32xf32>
    %363 = arith.addf %361, %362 : vector<2x32xf32>
    %364 = math.tanh %363 : vector<2x32xf32>
    %365 = arith.mulf %360, %364 : vector<2x32xf32>
    %366 = arith.index_cast %c2_i32 : i32 to index
    %c0_255 = arith.constant 0 : index
    %c0_256 = arith.constant 0 : index
    %367 = vector.load %arg20[%366, %c0_255, %c0_256] : memref<6x2x32xf32, #tpu.memory_space<vmem>>, vector<1x2x32xf32>
    %368 = vector.shape_cast %367 : vector<1x2x32xf32> to vector<2x32xf32>
    %c0_257 = arith.constant 0 : index
    %c0_258 = arith.constant 0 : index
    %369 = vector.load %arg13[%c0_257, %c0_258] : memref<32x32xf32, #tpu.memory_space<vmem>>, vector<32x32xf32>
    %cst_259 = arith.constant dense<0.000000e+00> : vector<2x32xf32>
    %370 = tpu.matmul %365, %369, %cst_259 {dimension_numbers = #tpu.dot_dimension_numbers<[1], [0], [0], [1], [0, 0, 1, 1], [], []>} : vector<2x32xf32>, vector<32x32xf32>, vector<2x32xf32> -> vector<2x32xf32>
    %371 = arith.addf %368, %370 : vector<2x32xf32>
    %c0_260 = arith.constant 0 : index
    %c0_261 = arith.constant 0 : index
    %372 = vector.load %arg14[%c0_260, %c0_261] : memref<32x32xf32, #tpu.memory_space<vmem>>, vector<32x32xf32>
    %cst_262 = arith.constant dense<0.000000e+00> : vector<2x32xf32>
    %373 = tpu.matmul %300, %372, %cst_262 {dimension_numbers = #tpu.dot_dimension_numbers<[1], [0], [0], [1], [0, 0, 1, 1], [], []>} : vector<2x32xf32>, vector<32x32xf32>, vector<2x32xf32> -> vector<2x32xf32>
    %374 = arith.addf %371, %373 : vector<2x32xf32>
    %cst_263 = arith.constant 0.000000e+00 : f32
    %375 = vector.broadcast %cst_263 : f32 to vector<2x32xf32>
    %376 = arith.maximumf %374, %375 : vector<2x32xf32>
    %377 = arith.index_cast %c2_i32 : i32 to index
    %c0_264 = arith.constant 0 : index
    %c0_265 = arith.constant 0 : index
    %378 = vector.load %arg17[%377, %c0_264, %c0_265] : memref<6x2x32xf32, #tpu.memory_space<vmem>>, vector<1x2x32xf32>
    %379 = vector.shape_cast %378 : vector<1x2x32xf32> to vector<2x32xf32>
    %380 = vector.shape_cast %376 : vector<2x32xf32> to vector<1x2x32xf32>
    tpu.vector_store %arg17[%377, %c0_264, %c0_265], %380 {strides = array<i32>} : memref<6x2x32xf32, #tpu.memory_space<vmem>>, vector<1x2x32xf32>,
    %c3_i32 = arith.constant 3 : i32
    %381 = vector.shape_cast %365 : vector<2x32xf32> to vector<2x1x32xf32>
    "tpu.trace_start"() <{level = 10 : i32, message = "bqu,bnu->bqn"}> : () -> ()
    %cst_266 = arith.constant dense<0.000000e+00> : vector<2x1x16xf32>
    %382 = tpu.matmul %381, %20, %cst_266 {dimension_numbers = #tpu.dot_dimension_numbers<[2], [2], [1], [1], [0, 0, 0, 1, 1, 1], [0], [0]>} : vector<2x1x32xf32>, vector<2x16x32xf32>, vector<2x1x16xf32> -> vector<2x1x16xf32>
    "tpu.trace_stop"() : () -> ()
    %cst_267 = arith.constant 0.176776692 : f32
    %383 = vector.broadcast %cst_267 : f32 to vector<2x1x16xf32>
    %384 = arith.mulf %382, %383 : vector<2x1x16xf32>
    %cst_268 = arith.constant dense<0xFF800000> : vector<2x1xf32>
    %385 = vector.multi_reduction <maximumf>, %384, %cst_268 [2] : vector<2x1x16xf32> to vector<2x1xf32>
    %386 = vector.shape_cast %385 : vector<2x1xf32> to vector<2x1x1xf32>
    %387 = vector.broadcast %386 : vector<2x1x1xf32> to vector<2x1x16xf32>
    %388 = arith.subf %384, %387 : vector<2x1x16xf32>
    %389 = math.exp %388 : vector<2x1x16xf32>
    %cst_269 = arith.constant dense<0.000000e+00> : vector<2x1xf32>
    %390 = vector.multi_reduction <add>, %389, %cst_269 [2] : vector<2x1x16xf32> to vector<2x1xf32>
    %391 = vector.shape_cast %390 : vector<2x1xf32> to vector<2x1x1xf32>
    %392 = tpu.reciprocal %391 {approx = true} : vector<2x1x1xf32> -> vector<2x1x1xf32>
    %393 = vector.broadcast %392 : vector<2x1x1xf32> to vector<2x1x16xf32>
    %394 = arith.mulf %389, %393 : vector<2x1x16xf32>
    %395 = vector.shape_cast %394 : vector<2x1x16xf32> to vector<2x16xf32>
    %396 = tpu.concatenate %395, %74 in 1 : vector<2x16xf32>, vector<2x112xf32> -> vector<2x128xf32>
    %397 = arith.index_cast %c3_i32 : i32 to index
    %c0_270 = arith.constant 0 : index
    %c0_271 = arith.constant 0 : index
    %398 = vector.load %arg18[%397, %c0_270, %c0_271] : memref<6x2x128xf32, #tpu.memory_space<vmem>>, vector<1x2x128xf32>
    %399 = vector.shape_cast %398 : vector<1x2x128xf32> to vector<2x128xf32>
    %400 = vector.shape_cast %396 : vector<2x128xf32> to vector<1x2x128xf32>
    tpu.vector_store %arg18[%397, %c0_270, %c0_271], %400 {strides = array<i32>} : memref<6x2x128xf32, #tpu.memory_space<vmem>>, vector<1x2x128xf32>,
    "tpu.trace_start"() <{level = 10 : i32, message = "bqn,bnc->bqc"}> : () -> ()
    %cst_272 = arith.constant dense<0.000000e+00> : vector<2x1x32xf32>
    %401 = tpu.matmul %394, %0, %cst_272 {dimension_numbers = #tpu.dot_dimension_numbers<[2], [1], [1], [2], [0, 0, 0, 1, 1, 2], [0], [0]>} : vector<2x1x16xf32>, vector<2x16x32xf32>, vector<2x1x32xf32> -> vector<2x1x32xf32>
    "tpu.trace_stop"() : () -> ()
    %402 = vector.shape_cast %401 : vector<2x1x32xf32> to vector<2x32xf32>
    %c0_273 = arith.constant 0 : index
    %403 = arith.index_cast %c3_i32 : i32 to index
    %c0_274 = arith.constant 0 : index
    %c0_275 = arith.constant 0 : index
    %404 = vector.load %arg19[%c0_273, %403, %c0_274, %c0_275] : memref<4x6x2x32xf32, #tpu.memory_space<vmem>>, vector<1x1x2x32xf32>
    %405 = vector.shape_cast %404 : vector<1x1x2x32xf32> to vector<2x32xf32>
    %c0_276 = arith.constant 0 : index
    %c0_277 = arith.constant 0 : index
    %c0_278 = arith.constant 0 : index
    %406 = vector.load %arg10[%c0_276, %c0_277, %c0_278] : memref<4x32x32xf32, #tpu.memory_space<vmem>>, vector<1x32x32xf32>
    %407 = vector.shape_cast %406 : vector<1x32x32xf32> to vector<32x32xf32>
    %cst_279 = arith.constant dense<0.000000e+00> : vector<2x32xf32>
    %408 = tpu.matmul %402, %407, %cst_279 {dimension_numbers = #tpu.dot_dimension_numbers<[1], [0], [0], [1], [0, 0, 1, 1], [], []>} : vector<2x32xf32>, vector<32x32xf32>, vector<2x32xf32> -> vector<2x32xf32>
    %409 = arith.addf %405, %408 : vector<2x32xf32>
    %c0_280 = arith.constant 0 : index
    %c0_281 = arith.constant 0 : index
    %c0_282 = arith.constant 0 : index
    %410 = vector.load %arg11[%c0_280, %c0_281, %c0_282] : memref<4x32x32xf32, #tpu.memory_space<vmem>>, vector<1x32x32xf32>
    %411 = vector.shape_cast %410 : vector<1x32x32xf32> to vector<32x32xf32>
    %cst_283 = arith.constant dense<0.000000e+00> : vector<2x32xf32>
    %412 = tpu.matmul %365, %411, %cst_283 {dimension_numbers = #tpu.dot_dimension_numbers<[1], [0], [0], [1], [0, 0, 1, 1], [], []>} : vector<2x32xf32>, vector<32x32xf32>, vector<2x32xf32> -> vector<2x32xf32>
    %413 = arith.addf %409, %412 : vector<2x32xf32>
    %414 = arith.negf %413 : vector<2x32xf32>
    %415 = math.exp %414 : vector<2x32xf32>
    %cst_284 = arith.constant 1.000000e+00 : f32
    %416 = vector.broadcast %cst_284 : f32 to vector<2x32xf32>
    %417 = arith.addf %416, %415 : vector<2x32xf32>
    %418 = arith.divf %416, %417 : vector<2x32xf32>
    %c1_285 = arith.constant 1 : index
    %419 = arith.index_cast %c3_i32 : i32 to index
    %c0_286 = arith.constant 0 : index
    %c0_287 = arith.constant 0 : index
    %420 = vector.load %arg19[%c1_285, %419, %c0_286, %c0_287] : memref<4x6x2x32xf32, #tpu.memory_space<vmem>>, vector<1x1x2x32xf32>
    %421 = vector.shape_cast %420 : vector<1x1x2x32xf32> to vector<2x32xf32>
    %c1_288 = arith.constant 1 : index
    %c0_289 = arith.constant 0 : index
    %c0_290 = arith.constant 0 : index
    %422 = vector.load %arg10[%c1_288, %c0_289, %c0_290] : memref<4x32x32xf32, #tpu.memory_space<vmem>>, vector<1x32x32xf32>
    %423 = vector.shape_cast %422 : vector<1x32x32xf32> to vector<32x32xf32>
    %cst_291 = arith.constant dense<0.000000e+00> : vector<2x32xf32>
    %424 = tpu.matmul %402, %423, %cst_291 {dimension_numbers = #tpu.dot_dimension_numbers<[1], [0], [0], [1], [0, 0, 1, 1], [], []>} : vector<2x32xf32>, vector<32x32xf32>, vector<2x32xf32> -> vector<2x32xf32>
    %425 = arith.addf %421, %424 : vector<2x32xf32>
    %c1_292 = arith.constant 1 : index
    %c0_293 = arith.constant 0 : index
    %c0_294 = arith.constant 0 : index
    %426 = vector.load %arg11[%c1_292, %c0_293, %c0_294] : memref<4x32x32xf32, #tpu.memory_space<vmem>>, vector<1x32x32xf32>
    %427 = vector.shape_cast %426 : vector<1x32x32xf32> to vector<32x32xf32>
    %cst_295 = arith.constant dense<0.000000e+00> : vector<2x32xf32>
    %428 = tpu.matmul %365, %427, %cst_295 {dimension_numbers = #tpu.dot_dimension_numbers<[1], [0], [0], [1], [0, 0, 1, 1], [], []>} : vector<2x32xf32>, vector<32x32xf32>, vector<2x32xf32> -> vector<2x32xf32>
    %429 = arith.addf %425, %428 : vector<2x32xf32>
    %430 = arith.negf %429 : vector<2x32xf32>
    %431 = math.exp %430 : vector<2x32xf32>
    %cst_296 = arith.constant 1.000000e+00 : f32
    %432 = vector.broadcast %cst_296 : f32 to vector<2x32xf32>
    %433 = arith.addf %432, %431 : vector<2x32xf32>
    %434 = arith.divf %432, %433 : vector<2x32xf32>
    %c2_297 = arith.constant 2 : index
    %435 = arith.index_cast %c3_i32 : i32 to index
    %c0_298 = arith.constant 0 : index
    %c0_299 = arith.constant 0 : index
    %436 = vector.load %arg19[%c2_297, %435, %c0_298, %c0_299] : memref<4x6x2x32xf32, #tpu.memory_space<vmem>>, vector<1x1x2x32xf32>
    %437 = vector.shape_cast %436 : vector<1x1x2x32xf32> to vector<2x32xf32>
    %c2_300 = arith.constant 2 : index
    %c0_301 = arith.constant 0 : index
    %c0_302 = arith.constant 0 : index
    %438 = vector.load %arg10[%c2_300, %c0_301, %c0_302] : memref<4x32x32xf32, #tpu.memory_space<vmem>>, vector<1x32x32xf32>
    %439 = vector.shape_cast %438 : vector<1x32x32xf32> to vector<32x32xf32>
    %cst_303 = arith.constant dense<0.000000e+00> : vector<2x32xf32>
    %440 = tpu.matmul %402, %439, %cst_303 {dimension_numbers = #tpu.dot_dimension_numbers<[1], [0], [0], [1], [0, 0, 1, 1], [], []>} : vector<2x32xf32>, vector<32x32xf32>, vector<2x32xf32> -> vector<2x32xf32>
    %441 = arith.addf %437, %440 : vector<2x32xf32>
    %c2_304 = arith.constant 2 : index
    %c0_305 = arith.constant 0 : index
    %c0_306 = arith.constant 0 : index
    %442 = vector.load %arg11[%c2_304, %c0_305, %c0_306] : memref<4x32x32xf32, #tpu.memory_space<vmem>>, vector<1x32x32xf32>
    %443 = vector.shape_cast %442 : vector<1x32x32xf32> to vector<32x32xf32>
    %cst_307 = arith.constant dense<0.000000e+00> : vector<2x32xf32>
    %444 = tpu.matmul %365, %443, %cst_307 {dimension_numbers = #tpu.dot_dimension_numbers<[1], [0], [0], [1], [0, 0, 1, 1], [], []>} : vector<2x32xf32>, vector<32x32xf32>, vector<2x32xf32> -> vector<2x32xf32>
    %445 = arith.addf %441, %444 : vector<2x32xf32>
    %446 = math.tanh %445 : vector<2x32xf32>
    %c3_308 = arith.constant 3 : index
    %447 = arith.index_cast %c3_i32 : i32 to index
    %c0_309 = arith.constant 0 : index
    %c0_310 = arith.constant 0 : index
    %448 = vector.load %arg19[%c3_308, %447, %c0_309, %c0_310] : memref<4x6x2x32xf32, #tpu.memory_space<vmem>>, vector<1x1x2x32xf32>
    %449 = vector.shape_cast %448 : vector<1x1x2x32xf32> to vector<2x32xf32>
    %c3_311 = arith.constant 3 : index
    %c0_312 = arith.constant 0 : index
    %c0_313 = arith.constant 0 : index
    %450 = vector.load %arg10[%c3_311, %c0_312, %c0_313] : memref<4x32x32xf32, #tpu.memory_space<vmem>>, vector<1x32x32xf32>
    %451 = vector.shape_cast %450 : vector<1x32x32xf32> to vector<32x32xf32>
    %cst_314 = arith.constant dense<0.000000e+00> : vector<2x32xf32>
    %452 = tpu.matmul %402, %451, %cst_314 {dimension_numbers = #tpu.dot_dimension_numbers<[1], [0], [0], [1], [0, 0, 1, 1], [], []>} : vector<2x32xf32>, vector<32x32xf32>, vector<2x32xf32> -> vector<2x32xf32>
    %453 = arith.addf %449, %452 : vector<2x32xf32>
    %c3_315 = arith.constant 3 : index
    %c0_316 = arith.constant 0 : index
    %c0_317 = arith.constant 0 : index
    %454 = vector.load %arg11[%c3_315, %c0_316, %c0_317] : memref<4x32x32xf32, #tpu.memory_space<vmem>>, vector<1x32x32xf32>
    %455 = vector.shape_cast %454 : vector<1x32x32xf32> to vector<32x32xf32>
    %cst_318 = arith.constant dense<0.000000e+00> : vector<2x32xf32>
    %456 = tpu.matmul %365, %455, %cst_318 {dimension_numbers = #tpu.dot_dimension_numbers<[1], [0], [0], [1], [0, 0, 1, 1], [], []>} : vector<2x32xf32>, vector<32x32xf32>, vector<2x32xf32> -> vector<2x32xf32>
    %457 = arith.addf %453, %456 : vector<2x32xf32>
    %458 = arith.negf %457 : vector<2x32xf32>
    %459 = math.exp %458 : vector<2x32xf32>
    %cst_319 = arith.constant 1.000000e+00 : f32
    %460 = vector.broadcast %cst_319 : f32 to vector<2x32xf32>
    %461 = arith.addf %460, %459 : vector<2x32xf32>
    %462 = arith.divf %460, %461 : vector<2x32xf32>
    %463 = arith.mulf %434, %363 : vector<2x32xf32>
    %464 = arith.mulf %418, %446 : vector<2x32xf32>
    %465 = arith.addf %463, %464 : vector<2x32xf32>
    %466 = math.tanh %465 : vector<2x32xf32>
    %467 = arith.mulf %462, %466 : vector<2x32xf32>
    %468 = arith.index_cast %c3_i32 : i32 to index
    %c0_320 = arith.constant 0 : index
    %c0_321 = arith.constant 0 : index
    %469 = vector.load %arg20[%468, %c0_320, %c0_321] : memref<6x2x32xf32, #tpu.memory_space<vmem>>, vector<1x2x32xf32>
    %470 = vector.shape_cast %469 : vector<1x2x32xf32> to vector<2x32xf32>
    %c0_322 = arith.constant 0 : index
    %c0_323 = arith.constant 0 : index
    %471 = vector.load %arg13[%c0_322, %c0_323] : memref<32x32xf32, #tpu.memory_space<vmem>>, vector<32x32xf32>
    %cst_324 = arith.constant dense<0.000000e+00> : vector<2x32xf32>
    %472 = tpu.matmul %467, %471, %cst_324 {dimension_numbers = #tpu.dot_dimension_numbers<[1], [0], [0], [1], [0, 0, 1, 1], [], []>} : vector<2x32xf32>, vector<32x32xf32>, vector<2x32xf32> -> vector<2x32xf32>
    %473 = arith.addf %470, %472 : vector<2x32xf32>
    %c0_325 = arith.constant 0 : index
    %c0_326 = arith.constant 0 : index
    %474 = vector.load %arg14[%c0_325, %c0_326] : memref<32x32xf32, #tpu.memory_space<vmem>>, vector<32x32xf32>
    %cst_327 = arith.constant dense<0.000000e+00> : vector<2x32xf32>
    %475 = tpu.matmul %402, %474, %cst_327 {dimension_numbers = #tpu.dot_dimension_numbers<[1], [0], [0], [1], [0, 0, 1, 1], [], []>} : vector<2x32xf32>, vector<32x32xf32>, vector<2x32xf32> -> vector<2x32xf32>
    %476 = arith.addf %473, %475 : vector<2x32xf32>
    %cst_328 = arith.constant 0.000000e+00 : f32
    %477 = vector.broadcast %cst_328 : f32 to vector<2x32xf32>
    %478 = arith.maximumf %476, %477 : vector<2x32xf32>
    %479 = arith.index_cast %c3_i32 : i32 to index
    %c0_329 = arith.constant 0 : index
    %c0_330 = arith.constant 0 : index
    %480 = vector.load %arg17[%479, %c0_329, %c0_330] : memref<6x2x32xf32, #tpu.memory_space<vmem>>, vector<1x2x32xf32>
    %481 = vector.shape_cast %480 : vector<1x2x32xf32> to vector<2x32xf32>
    %482 = vector.shape_cast %478 : vector<2x32xf32> to vector<1x2x32xf32>
    tpu.vector_store %arg17[%479, %c0_329, %c0_330], %482 {strides = array<i32>} : memref<6x2x32xf32, #tpu.memory_space<vmem>>, vector<1x2x32xf32>,
    %c4_i32 = arith.constant 4 : i32
    %483 = vector.shape_cast %467 : vector<2x32xf32> to vector<2x1x32xf32>
    "tpu.trace_start"() <{level = 10 : i32, message = "bqu,bnu->bqn"}> : () -> ()
    %cst_331 = arith.constant dense<0.000000e+00> : vector<2x1x16xf32>
    %484 = tpu.matmul %483, %20, %cst_331 {dimension_numbers = #tpu.dot_dimension_numbers<[2], [2], [1], [1], [0, 0, 0, 1, 1, 1], [0], [0]>} : vector<2x1x32xf32>, vector<2x16x32xf32>, vector<2x1x16xf32> -> vector<2x1x16xf32>
    "tpu.trace_stop"() : () -> ()
    %cst_332 = arith.constant 0.176776692 : f32
    %485 = vector.broadcast %cst_332 : f32 to vector<2x1x16xf32>
    %486 = arith.mulf %484, %485 : vector<2x1x16xf32>
    %cst_333 = arith.constant dense<0xFF800000> : vector<2x1xf32>
    %487 = vector.multi_reduction <maximumf>, %486, %cst_333 [2] : vector<2x1x16xf32> to vector<2x1xf32>
    %488 = vector.shape_cast %487 : vector<2x1xf32> to vector<2x1x1xf32>
    %489 = vector.broadcast %488 : vector<2x1x1xf32> to vector<2x1x16xf32>
    %490 = arith.subf %486, %489 : vector<2x1x16xf32>
    %491 = math.exp %490 : vector<2x1x16xf32>
    %cst_334 = arith.constant dense<0.000000e+00> : vector<2x1xf32>
    %492 = vector.multi_reduction <add>, %491, %cst_334 [2] : vector<2x1x16xf32> to vector<2x1xf32>
    %493 = vector.shape_cast %492 : vector<2x1xf32> to vector<2x1x1xf32>
    %494 = tpu.reciprocal %493 {approx = true} : vector<2x1x1xf32> -> vector<2x1x1xf32>
    %495 = vector.broadcast %494 : vector<2x1x1xf32> to vector<2x1x16xf32>
    %496 = arith.mulf %491, %495 : vector<2x1x16xf32>
    %497 = vector.shape_cast %496 : vector<2x1x16xf32> to vector<2x16xf32>
    %498 = tpu.concatenate %497, %74 in 1 : vector<2x16xf32>, vector<2x112xf32> -> vector<2x128xf32>
    %499 = arith.index_cast %c4_i32 : i32 to index
    %c0_335 = arith.constant 0 : index
    %c0_336 = arith.constant 0 : index
    %500 = vector.load %arg18[%499, %c0_335, %c0_336] : memref<6x2x128xf32, #tpu.memory_space<vmem>>, vector<1x2x128xf32>
    %501 = vector.shape_cast %500 : vector<1x2x128xf32> to vector<2x128xf32>
    %502 = vector.shape_cast %498 : vector<2x128xf32> to vector<1x2x128xf32>
    tpu.vector_store %arg18[%499, %c0_335, %c0_336], %502 {strides = array<i32>} : memref<6x2x128xf32, #tpu.memory_space<vmem>>, vector<1x2x128xf32>,
    "tpu.trace_start"() <{level = 10 : i32, message = "bqn,bnc->bqc"}> : () -> ()
    %cst_337 = arith.constant dense<0.000000e+00> : vector<2x1x32xf32>
    %503 = tpu.matmul %496, %0, %cst_337 {dimension_numbers = #tpu.dot_dimension_numbers<[2], [1], [1], [2], [0, 0, 0, 1, 1, 2], [0], [0]>} : vector<2x1x16xf32>, vector<2x16x32xf32>, vector<2x1x32xf32> -> vector<2x1x32xf32>
    "tpu.trace_stop"() : () -> ()
    %504 = vector.shape_cast %503 : vector<2x1x32xf32> to vector<2x32xf32>
    %c0_338 = arith.constant 0 : index
    %505 = arith.index_cast %c4_i32 : i32 to index
    %c0_339 = arith.constant 0 : index
    %c0_340 = arith.constant 0 : index
    %506 = vector.load %arg19[%c0_338, %505, %c0_339, %c0_340] : memref<4x6x2x32xf32, #tpu.memory_space<vmem>>, vector<1x1x2x32xf32>
    %507 = vector.shape_cast %506 : vector<1x1x2x32xf32> to vector<2x32xf32>
    %c0_341 = arith.constant 0 : index
    %c0_342 = arith.constant 0 : index
    %c0_343 = arith.constant 0 : index
    %508 = vector.load %arg10[%c0_341, %c0_342, %c0_343] : memref<4x32x32xf32, #tpu.memory_space<vmem>>, vector<1x32x32xf32>
    %509 = vector.shape_cast %508 : vector<1x32x32xf32> to vector<32x32xf32>
    %cst_344 = arith.constant dense<0.000000e+00> : vector<2x32xf32>
    %510 = tpu.matmul %504, %509, %cst_344 {dimension_numbers = #tpu.dot_dimension_numbers<[1], [0], [0], [1], [0, 0, 1, 1], [], []>} : vector<2x32xf32>, vector<32x32xf32>, vector<2x32xf32> -> vector<2x32xf32>
    %511 = arith.addf %507, %510 : vector<2x32xf32>
    %c0_345 = arith.constant 0 : index
    %c0_346 = arith.constant 0 : index
    %c0_347 = arith.constant 0 : index
    %512 = vector.load %arg11[%c0_345, %c0_346, %c0_347] : memref<4x32x32xf32, #tpu.memory_space<vmem>>, vector<1x32x32xf32>
    %513 = vector.shape_cast %512 : vector<1x32x32xf32> to vector<32x32xf32>
    %cst_348 = arith.constant dense<0.000000e+00> : vector<2x32xf32>
    %514 = tpu.matmul %467, %513, %cst_348 {dimension_numbers = #tpu.dot_dimension_numbers<[1], [0], [0], [1], [0, 0, 1, 1], [], []>} : vector<2x32xf32>, vector<32x32xf32>, vector<2x32xf32> -> vector<2x32xf32>
    %515 = arith.addf %511, %514 : vector<2x32xf32>
    %516 = arith.negf %515 : vector<2x32xf32>
    %517 = math.exp %516 : vector<2x32xf32>
    %cst_349 = arith.constant 1.000000e+00 : f32
    %518 = vector.broadcast %cst_349 : f32 to vector<2x32xf32>
    %519 = arith.addf %518, %517 : vector<2x32xf32>
    %520 = arith.divf %518, %519 : vector<2x32xf32>
    %c1_350 = arith.constant 1 : index
    %521 = arith.index_cast %c4_i32 : i32 to index
    %c0_351 = arith.constant 0 : index
    %c0_352 = arith.constant 0 : index
    %522 = vector.load %arg19[%c1_350, %521, %c0_351, %c0_352] : memref<4x6x2x32xf32, #tpu.memory_space<vmem>>, vector<1x1x2x32xf32>
    %523 = vector.shape_cast %522 : vector<1x1x2x32xf32> to vector<2x32xf32>
    %c1_353 = arith.constant 1 : index
    %c0_354 = arith.constant 0 : index
    %c0_355 = arith.constant 0 : index
    %524 = vector.load %arg10[%c1_353, %c0_354, %c0_355] : memref<4x32x32xf32, #tpu.memory_space<vmem>>, vector<1x32x32xf32>
    %525 = vector.shape_cast %524 : vector<1x32x32xf32> to vector<32x32xf32>
    %cst_356 = arith.constant dense<0.000000e+00> : vector<2x32xf32>
    %526 = tpu.matmul %504, %525, %cst_356 {dimension_numbers = #tpu.dot_dimension_numbers<[1], [0], [0], [1], [0, 0, 1, 1], [], []>} : vector<2x32xf32>, vector<32x32xf32>, vector<2x32xf32> -> vector<2x32xf32>
    %527 = arith.addf %523, %526 : vector<2x32xf32>
    %c1_357 = arith.constant 1 : index
    %c0_358 = arith.constant 0 : index
    %c0_359 = arith.constant 0 : index
    %528 = vector.load %arg11[%c1_357, %c0_358, %c0_359] : memref<4x32x32xf32, #tpu.memory_space<vmem>>, vector<1x32x32xf32>
    %529 = vector.shape_cast %528 : vector<1x32x32xf32> to vector<32x32xf32>
    %cst_360 = arith.constant dense<0.000000e+00> : vector<2x32xf32>
    %530 = tpu.matmul %467, %529, %cst_360 {dimension_numbers = #tpu.dot_dimension_numbers<[1], [0], [0], [1], [0, 0, 1, 1], [], []>} : vector<2x32xf32>, vector<32x32xf32>, vector<2x32xf32> -> vector<2x32xf32>
    %531 = arith.addf %527, %530 : vector<2x32xf32>
    %532 = arith.negf %531 : vector<2x32xf32>
    %533 = math.exp %532 : vector<2x32xf32>
    %cst_361 = arith.constant 1.000000e+00 : f32
    %534 = vector.broadcast %cst_361 : f32 to vector<2x32xf32>
    %535 = arith.addf %534, %533 : vector<2x32xf32>
    %536 = arith.divf %534, %535 : vector<2x32xf32>
    %c2_362 = arith.constant 2 : index
    %537 = arith.index_cast %c4_i32 : i32 to index
    %c0_363 = arith.constant 0 : index
    %c0_364 = arith.constant 0 : index
    %538 = vector.load %arg19[%c2_362, %537, %c0_363, %c0_364] : memref<4x6x2x32xf32, #tpu.memory_space<vmem>>, vector<1x1x2x32xf32>
    %539 = vector.shape_cast %538 : vector<1x1x2x32xf32> to vector<2x32xf32>
    %c2_365 = arith.constant 2 : index
    %c0_366 = arith.constant 0 : index
    %c0_367 = arith.constant 0 : index
    %540 = vector.load %arg10[%c2_365, %c0_366, %c0_367] : memref<4x32x32xf32, #tpu.memory_space<vmem>>, vector<1x32x32xf32>
    %541 = vector.shape_cast %540 : vector<1x32x32xf32> to vector<32x32xf32>
    %cst_368 = arith.constant dense<0.000000e+00> : vector<2x32xf32>
    %542 = tpu.matmul %504, %541, %cst_368 {dimension_numbers = #tpu.dot_dimension_numbers<[1], [0], [0], [1], [0, 0, 1, 1], [], []>} : vector<2x32xf32>, vector<32x32xf32>, vector<2x32xf32> -> vector<2x32xf32>
    %543 = arith.addf %539, %542 : vector<2x32xf32>
    %c2_369 = arith.constant 2 : index
    %c0_370 = arith.constant 0 : index
    %c0_371 = arith.constant 0 : index
    %544 = vector.load %arg11[%c2_369, %c0_370, %c0_371] : memref<4x32x32xf32, #tpu.memory_space<vmem>>, vector<1x32x32xf32>
    %545 = vector.shape_cast %544 : vector<1x32x32xf32> to vector<32x32xf32>
    %cst_372 = arith.constant dense<0.000000e+00> : vector<2x32xf32>
    %546 = tpu.matmul %467, %545, %cst_372 {dimension_numbers = #tpu.dot_dimension_numbers<[1], [0], [0], [1], [0, 0, 1, 1], [], []>} : vector<2x32xf32>, vector<32x32xf32>, vector<2x32xf32> -> vector<2x32xf32>
    %547 = arith.addf %543, %546 : vector<2x32xf32>
    %548 = math.tanh %547 : vector<2x32xf32>
    %c3_373 = arith.constant 3 : index
    %549 = arith.index_cast %c4_i32 : i32 to index
    %c0_374 = arith.constant 0 : index
    %c0_375 = arith.constant 0 : index
    %550 = vector.load %arg19[%c3_373, %549, %c0_374, %c0_375] : memref<4x6x2x32xf32, #tpu.memory_space<vmem>>, vector<1x1x2x32xf32>
    %551 = vector.shape_cast %550 : vector<1x1x2x32xf32> to vector<2x32xf32>
    %c3_376 = arith.constant 3 : index
    %c0_377 = arith.constant 0 : index
    %c0_378 = arith.constant 0 : index
    %552 = vector.load %arg10[%c3_376, %c0_377, %c0_378] : memref<4x32x32xf32, #tpu.memory_space<vmem>>, vector<1x32x32xf32>
    %553 = vector.shape_cast %552 : vector<1x32x32xf32> to vector<32x32xf32>
    %cst_379 = arith.constant dense<0.000000e+00> : vector<2x32xf32>
    %554 = tpu.matmul %504, %553, %cst_379 {dimension_numbers = #tpu.dot_dimension_numbers<[1], [0], [0], [1], [0, 0, 1, 1], [], []>} : vector<2x32xf32>, vector<32x32xf32>, vector<2x32xf32> -> vector<2x32xf32>
    %555 = arith.addf %551, %554 : vector<2x32xf32>
    %c3_380 = arith.constant 3 : index
    %c0_381 = arith.constant 0 : index
    %c0_382 = arith.constant 0 : index
    %556 = vector.load %arg11[%c3_380, %c0_381, %c0_382] : memref<4x32x32xf32, #tpu.memory_space<vmem>>, vector<1x32x32xf32>
    %557 = vector.shape_cast %556 : vector<1x32x32xf32> to vector<32x32xf32>
    %cst_383 = arith.constant dense<0.000000e+00> : vector<2x32xf32>
    %558 = tpu.matmul %467, %557, %cst_383 {dimension_numbers = #tpu.dot_dimension_numbers<[1], [0], [0], [1], [0, 0, 1, 1], [], []>} : vector<2x32xf32>, vector<32x32xf32>, vector<2x32xf32> -> vector<2x32xf32>
    %559 = arith.addf %555, %558 : vector<2x32xf32>
    %560 = arith.negf %559 : vector<2x32xf32>
    %561 = math.exp %560 : vector<2x32xf32>
    %cst_384 = arith.constant 1.000000e+00 : f32
    %562 = vector.broadcast %cst_384 : f32 to vector<2x32xf32>
    %563 = arith.addf %562, %561 : vector<2x32xf32>
    %564 = arith.divf %562, %563 : vector<2x32xf32>
    %565 = arith.mulf %536, %465 : vector<2x32xf32>
    %566 = arith.mulf %520, %548 : vector<2x32xf32>
    %567 = arith.addf %565, %566 : vector<2x32xf32>
    %568 = math.tanh %567 : vector<2x32xf32>
    %569 = arith.mulf %564, %568 : vector<2x32xf32>
    %570 = arith.index_cast %c4_i32 : i32 to index
    %c0_385 = arith.constant 0 : index
    %c0_386 = arith.constant 0 : index
    %571 = vector.load %arg20[%570, %c0_385, %c0_386] : memref<6x2x32xf32, #tpu.memory_space<vmem>>, vector<1x2x32xf32>
    %572 = vector.shape_cast %571 : vector<1x2x32xf32> to vector<2x32xf32>
    %c0_387 = arith.constant 0 : index
    %c0_388 = arith.constant 0 : index
    %573 = vector.load %arg13[%c0_387, %c0_388] : memref<32x32xf32, #tpu.memory_space<vmem>>, vector<32x32xf32>
    %cst_389 = arith.constant dense<0.000000e+00> : vector<2x32xf32>
    %574 = tpu.matmul %569, %573, %cst_389 {dimension_numbers = #tpu.dot_dimension_numbers<[1], [0], [0], [1], [0, 0, 1, 1], [], []>} : vector<2x32xf32>, vector<32x32xf32>, vector<2x32xf32> -> vector<2x32xf32>
    %575 = arith.addf %572, %574 : vector<2x32xf32>
    %c0_390 = arith.constant 0 : index
    %c0_391 = arith.constant 0 : index
    %576 = vector.load %arg14[%c0_390, %c0_391] : memref<32x32xf32, #tpu.memory_space<vmem>>, vector<32x32xf32>
    %cst_392 = arith.constant dense<0.000000e+00> : vector<2x32xf32>
    %577 = tpu.matmul %504, %576, %cst_392 {dimension_numbers = #tpu.dot_dimension_numbers<[1], [0], [0], [1], [0, 0, 1, 1], [], []>} : vector<2x32xf32>, vector<32x32xf32>, vector<2x32xf32> -> vector<2x32xf32>
    %578 = arith.addf %575, %577 : vector<2x32xf32>
    %cst_393 = arith.constant 0.000000e+00 : f32
    %579 = vector.broadcast %cst_393 : f32 to vector<2x32xf32>
    %580 = arith.maximumf %578, %579 : vector<2x32xf32>
    %581 = arith.index_cast %c4_i32 : i32 to index
    %c0_394 = arith.constant 0 : index
    %c0_395 = arith.constant 0 : index
    %582 = vector.load %arg17[%581, %c0_394, %c0_395] : memref<6x2x32xf32, #tpu.memory_space<vmem>>, vector<1x2x32xf32>
    %583 = vector.shape_cast %582 : vector<1x2x32xf32> to vector<2x32xf32>
    %584 = vector.shape_cast %580 : vector<2x32xf32> to vector<1x2x32xf32>
    tpu.vector_store %arg17[%581, %c0_394, %c0_395], %584 {strides = array<i32>} : memref<6x2x32xf32, #tpu.memory_space<vmem>>, vector<1x2x32xf32>,
    %c5_i32 = arith.constant 5 : i32
    %585 = vector.shape_cast %569 : vector<2x32xf32> to vector<2x1x32xf32>
    "tpu.trace_start"() <{level = 10 : i32, message = "bqu,bnu->bqn"}> : () -> ()
    %cst_396 = arith.constant dense<0.000000e+00> : vector<2x1x16xf32>
    %586 = tpu.matmul %585, %20, %cst_396 {dimension_numbers = #tpu.dot_dimension_numbers<[2], [2], [1], [1], [0, 0, 0, 1, 1, 1], [0], [0]>} : vector<2x1x32xf32>, vector<2x16x32xf32>, vector<2x1x16xf32> -> vector<2x1x16xf32>
    "tpu.trace_stop"() : () -> ()
    %cst_397 = arith.constant 0.176776692 : f32
    %587 = vector.broadcast %cst_397 : f32 to vector<2x1x16xf32>
    %588 = arith.mulf %586, %587 : vector<2x1x16xf32>
    %cst_398 = arith.constant dense<0xFF800000> : vector<2x1xf32>
    %589 = vector.multi_reduction <maximumf>, %588, %cst_398 [2] : vector<2x1x16xf32> to vector<2x1xf32>
    %590 = vector.shape_cast %589 : vector<2x1xf32> to vector<2x1x1xf32>
    %591 = vector.broadcast %590 : vector<2x1x1xf32> to vector<2x1x16xf32>
    %592 = arith.subf %588, %591 : vector<2x1x16xf32>
    %593 = math.exp %592 : vector<2x1x16xf32>
    %cst_399 = arith.constant dense<0.000000e+00> : vector<2x1xf32>
    %594 = vector.multi_reduction <add>, %593, %cst_399 [2] : vector<2x1x16xf32> to vector<2x1xf32>
    %595 = vector.shape_cast %594 : vector<2x1xf32> to vector<2x1x1xf32>
    %596 = tpu.reciprocal %595 {approx = true} : vector<2x1x1xf32> -> vector<2x1x1xf32>
    %597 = vector.broadcast %596 : vector<2x1x1xf32> to vector<2x1x16xf32>
    %598 = arith.mulf %593, %597 : vector<2x1x16xf32>
    %599 = vector.shape_cast %598 : vector<2x1x16xf32> to vector<2x16xf32>
    %600 = tpu.concatenate %599, %74 in 1 : vector<2x16xf32>, vector<2x112xf32> -> vector<2x128xf32>
    %601 = arith.index_cast %c5_i32 : i32 to index
    %c0_400 = arith.constant 0 : index
    %c0_401 = arith.constant 0 : index
    %602 = vector.load %arg18[%601, %c0_400, %c0_401] : memref<6x2x128xf32, #tpu.memory_space<vmem>>, vector<1x2x128xf32>
    %603 = vector.shape_cast %602 : vector<1x2x128xf32> to vector<2x128xf32>
    %604 = vector.shape_cast %600 : vector<2x128xf32> to vector<1x2x128xf32>
    tpu.vector_store %arg18[%601, %c0_400, %c0_401], %604 {strides = array<i32>} : memref<6x2x128xf32, #tpu.memory_space<vmem>>, vector<1x2x128xf32>,
    "tpu.trace_start"() <{level = 10 : i32, message = "bqn,bnc->bqc"}> : () -> ()
    %cst_402 = arith.constant dense<0.000000e+00> : vector<2x1x32xf32>
    %605 = tpu.matmul %598, %0, %cst_402 {dimension_numbers = #tpu.dot_dimension_numbers<[2], [1], [1], [2], [0, 0, 0, 1, 1, 2], [0], [0]>} : vector<2x1x16xf32>, vector<2x16x32xf32>, vector<2x1x32xf32> -> vector<2x1x32xf32>
    "tpu.trace_stop"() : () -> ()
    %606 = vector.shape_cast %605 : vector<2x1x32xf32> to vector<2x32xf32>
    %c0_403 = arith.constant 0 : index
    %607 = arith.index_cast %c5_i32 : i32 to index
    %c0_404 = arith.constant 0 : index
    %c0_405 = arith.constant 0 : index
    %608 = vector.load %arg19[%c0_403, %607, %c0_404, %c0_405] : memref<4x6x2x32xf32, #tpu.memory_space<vmem>>, vector<1x1x2x32xf32>
    %609 = vector.shape_cast %608 : vector<1x1x2x32xf32> to vector<2x32xf32>
    %c0_406 = arith.constant 0 : index
    %c0_407 = arith.constant 0 : index
    %c0_408 = arith.constant 0 : index
    %610 = vector.load %arg10[%c0_406, %c0_407, %c0_408] : memref<4x32x32xf32, #tpu.memory_space<vmem>>, vector<1x32x32xf32>
    %611 = vector.shape_cast %610 : vector<1x32x32xf32> to vector<32x32xf32>
    %cst_409 = arith.constant dense<0.000000e+00> : vector<2x32xf32>
    %612 = tpu.matmul %606, %611, %cst_409 {dimension_numbers = #tpu.dot_dimension_numbers<[1], [0], [0], [1], [0, 0, 1, 1], [], []>} : vector<2x32xf32>, vector<32x32xf32>, vector<2x32xf32> -> vector<2x32xf32>
    %613 = arith.addf %609, %612 : vector<2x32xf32>
    %c0_410 = arith.constant 0 : index
    %c0_411 = arith.constant 0 : index
    %c0_412 = arith.constant 0 : index
    %614 = vector.load %arg11[%c0_410, %c0_411, %c0_412] : memref<4x32x32xf32, #tpu.memory_space<vmem>>, vector<1x32x32xf32>
    %615 = vector.shape_cast %614 : vector<1x32x32xf32> to vector<32x32xf32>
    %cst_413 = arith.constant dense<0.000000e+00> : vector<2x32xf32>
    %616 = tpu.matmul %569, %615, %cst_413 {dimension_numbers = #tpu.dot_dimension_numbers<[1], [0], [0], [1], [0, 0, 1, 1], [], []>} : vector<2x32xf32>, vector<32x32xf32>, vector<2x32xf32> -> vector<2x32xf32>
    %617 = arith.addf %613, %616 : vector<2x32xf32>
    %618 = arith.negf %617 : vector<2x32xf32>
    %619 = math.exp %618 : vector<2x32xf32>
    %cst_414 = arith.constant 1.000000e+00 : f32
    %620 = vector.broadcast %cst_414 : f32 to vector<2x32xf32>
    %621 = arith.addf %620, %619 : vector<2x32xf32>
    %622 = arith.divf %620, %621 : vector<2x32xf32>
    %c1_415 = arith.constant 1 : index
    %623 = arith.index_cast %c5_i32 : i32 to index
    %c0_416 = arith.constant 0 : index
    %c0_417 = arith.constant 0 : index
    %624 = vector.load %arg19[%c1_415, %623, %c0_416, %c0_417] : memref<4x6x2x32xf32, #tpu.memory_space<vmem>>, vector<1x1x2x32xf32>
    %625 = vector.shape_cast %624 : vector<1x1x2x32xf32> to vector<2x32xf32>
    %c1_418 = arith.constant 1 : index
    %c0_419 = arith.constant 0 : index
    %c0_420 = arith.constant 0 : index
    %626 = vector.load %arg10[%c1_418, %c0_419, %c0_420] : memref<4x32x32xf32, #tpu.memory_space<vmem>>, vector<1x32x32xf32>
    %627 = vector.shape_cast %626 : vector<1x32x32xf32> to vector<32x32xf32>
    %cst_421 = arith.constant dense<0.000000e+00> : vector<2x32xf32>
    %628 = tpu.matmul %606, %627, %cst_421 {dimension_numbers = #tpu.dot_dimension_numbers<[1], [0], [0], [1], [0, 0, 1, 1], [], []>} : vector<2x32xf32>, vector<32x32xf32>, vector<2x32xf32> -> vector<2x32xf32>
    %629 = arith.addf %625, %628 : vector<2x32xf32>
    %c1_422 = arith.constant 1 : index
    %c0_423 = arith.constant 0 : index
    %c0_424 = arith.constant 0 : index
    %630 = vector.load %arg11[%c1_422, %c0_423, %c0_424] : memref<4x32x32xf32, #tpu.memory_space<vmem>>, vector<1x32x32xf32>
    %631 = vector.shape_cast %630 : vector<1x32x32xf32> to vector<32x32xf32>
    %cst_425 = arith.constant dense<0.000000e+00> : vector<2x32xf32>
    %632 = tpu.matmul %569, %631, %cst_425 {dimension_numbers = #tpu.dot_dimension_numbers<[1], [0], [0], [1], [0, 0, 1, 1], [], []>} : vector<2x32xf32>, vector<32x32xf32>, vector<2x32xf32> -> vector<2x32xf32>
    %633 = arith.addf %629, %632 : vector<2x32xf32>
    %634 = arith.negf %633 : vector<2x32xf32>
    %635 = math.exp %634 : vector<2x32xf32>
    %cst_426 = arith.constant 1.000000e+00 : f32
    %636 = vector.broadcast %cst_426 : f32 to vector<2x32xf32>
    %637 = arith.addf %636, %635 : vector<2x32xf32>
    %638 = arith.divf %636, %637 : vector<2x32xf32>
    %c2_427 = arith.constant 2 : index
    %639 = arith.index_cast %c5_i32 : i32 to index
    %c0_428 = arith.constant 0 : index
    %c0_429 = arith.constant 0 : index
    %640 = vector.load %arg19[%c2_427, %639, %c0_428, %c0_429] : memref<4x6x2x32xf32, #tpu.memory_space<vmem>>, vector<1x1x2x32xf32>
    %641 = vector.shape_cast %640 : vector<1x1x2x32xf32> to vector<2x32xf32>
    %c2_430 = arith.constant 2 : index
    %c0_431 = arith.constant 0 : index
    %c0_432 = arith.constant 0 : index
    %642 = vector.load %arg10[%c2_430, %c0_431, %c0_432] : memref<4x32x32xf32, #tpu.memory_space<vmem>>, vector<1x32x32xf32>
    %643 = vector.shape_cast %642 : vector<1x32x32xf32> to vector<32x32xf32>
    %cst_433 = arith.constant dense<0.000000e+00> : vector<2x32xf32>
    %644 = tpu.matmul %606, %643, %cst_433 {dimension_numbers = #tpu.dot_dimension_numbers<[1], [0], [0], [1], [0, 0, 1, 1], [], []>} : vector<2x32xf32>, vector<32x32xf32>, vector<2x32xf32> -> vector<2x32xf32>
    %645 = arith.addf %641, %644 : vector<2x32xf32>
    %c2_434 = arith.constant 2 : index
    %c0_435 = arith.constant 0 : index
    %c0_436 = arith.constant 0 : index
    %646 = vector.load %arg11[%c2_434, %c0_435, %c0_436] : memref<4x32x32xf32, #tpu.memory_space<vmem>>, vector<1x32x32xf32>
    %647 = vector.shape_cast %646 : vector<1x32x32xf32> to vector<32x32xf32>
    %cst_437 = arith.constant dense<0.000000e+00> : vector<2x32xf32>
    %648 = tpu.matmul %569, %647, %cst_437 {dimension_numbers = #tpu.dot_dimension_numbers<[1], [0], [0], [1], [0, 0, 1, 1], [], []>} : vector<2x32xf32>, vector<32x32xf32>, vector<2x32xf32> -> vector<2x32xf32>
    %649 = arith.addf %645, %648 : vector<2x32xf32>
    %650 = math.tanh %649 : vector<2x32xf32>
    %c3_438 = arith.constant 3 : index
    %651 = arith.index_cast %c5_i32 : i32 to index
    %c0_439 = arith.constant 0 : index
    %c0_440 = arith.constant 0 : index
    %652 = vector.load %arg19[%c3_438, %651, %c0_439, %c0_440] : memref<4x6x2x32xf32, #tpu.memory_space<vmem>>, vector<1x1x2x32xf32>
    %653 = vector.shape_cast %652 : vector<1x1x2x32xf32> to vector<2x32xf32>
    %c3_441 = arith.constant 3 : index
    %c0_442 = arith.constant 0 : index
    %c0_443 = arith.constant 0 : index
    %654 = vector.load %arg10[%c3_441, %c0_442, %c0_443] : memref<4x32x32xf32, #tpu.memory_space<vmem>>, vector<1x32x32xf32>
    %655 = vector.shape_cast %654 : vector<1x32x32xf32> to vector<32x32xf32>
    %cst_444 = arith.constant dense<0.000000e+00> : vector<2x32xf32>
    %656 = tpu.matmul %606, %655, %cst_444 {dimension_numbers = #tpu.dot_dimension_numbers<[1], [0], [0], [1], [0, 0, 1, 1], [], []>} : vector<2x32xf32>, vector<32x32xf32>, vector<2x32xf32> -> vector<2x32xf32>
    %657 = arith.addf %653, %656 : vector<2x32xf32>
    %c3_445 = arith.constant 3 : index
    %c0_446 = arith.constant 0 : index
    %c0_447 = arith.constant 0 : index
    %658 = vector.load %arg11[%c3_445, %c0_446, %c0_447] : memref<4x32x32xf32, #tpu.memory_space<vmem>>, vector<1x32x32xf32>
    %659 = vector.shape_cast %658 : vector<1x32x32xf32> to vector<32x32xf32>
    %cst_448 = arith.constant dense<0.000000e+00> : vector<2x32xf32>
    %660 = tpu.matmul %569, %659, %cst_448 {dimension_numbers = #tpu.dot_dimension_numbers<[1], [0], [0], [1], [0, 0, 1, 1], [], []>} : vector<2x32xf32>, vector<32x32xf32>, vector<2x32xf32> -> vector<2x32xf32>
    %661 = arith.addf %657, %660 : vector<2x32xf32>
    %662 = arith.negf %661 : vector<2x32xf32>
    %663 = math.exp %662 : vector<2x32xf32>
    %cst_449 = arith.constant 1.000000e+00 : f32
    %664 = vector.broadcast %cst_449 : f32 to vector<2x32xf32>
    %665 = arith.addf %664, %663 : vector<2x32xf32>
    %666 = arith.divf %664, %665 : vector<2x32xf32>
    %667 = arith.mulf %638, %567 : vector<2x32xf32>
    %668 = arith.mulf %622, %650 : vector<2x32xf32>
    %669 = arith.addf %667, %668 : vector<2x32xf32>
    %670 = math.tanh %669 : vector<2x32xf32>
    %671 = arith.mulf %666, %670 : vector<2x32xf32>
    %672 = arith.index_cast %c5_i32 : i32 to index
    %c0_450 = arith.constant 0 : index
    %c0_451 = arith.constant 0 : index
    %673 = vector.load %arg20[%672, %c0_450, %c0_451] : memref<6x2x32xf32, #tpu.memory_space<vmem>>, vector<1x2x32xf32>
    %674 = vector.shape_cast %673 : vector<1x2x32xf32> to vector<2x32xf32>
    %c0_452 = arith.constant 0 : index
    %c0_453 = arith.constant 0 : index
    %675 = vector.load %arg13[%c0_452, %c0_453] : memref<32x32xf32, #tpu.memory_space<vmem>>, vector<32x32xf32>
    %cst_454 = arith.constant dense<0.000000e+00> : vector<2x32xf32>
    %676 = tpu.matmul %671, %675, %cst_454 {dimension_numbers = #tpu.dot_dimension_numbers<[1], [0], [0], [1], [0, 0, 1, 1], [], []>} : vector<2x32xf32>, vector<32x32xf32>, vector<2x32xf32> -> vector<2x32xf32>
    %677 = arith.addf %674, %676 : vector<2x32xf32>
    %c0_455 = arith.constant 0 : index
    %c0_456 = arith.constant 0 : index
    %678 = vector.load %arg14[%c0_455, %c0_456] : memref<32x32xf32, #tpu.memory_space<vmem>>, vector<32x32xf32>
    %cst_457 = arith.constant dense<0.000000e+00> : vector<2x32xf32>
    %679 = tpu.matmul %606, %678, %cst_457 {dimension_numbers = #tpu.dot_dimension_numbers<[1], [0], [0], [1], [0, 0, 1, 1], [], []>} : vector<2x32xf32>, vector<32x32xf32>, vector<2x32xf32> -> vector<2x32xf32>
    %680 = arith.addf %677, %679 : vector<2x32xf32>
    %cst_458 = arith.constant 0.000000e+00 : f32
    %681 = vector.broadcast %cst_458 : f32 to vector<2x32xf32>
    %682 = arith.maximumf %680, %681 : vector<2x32xf32>
    %683 = arith.index_cast %c5_i32 : i32 to index
    %c0_459 = arith.constant 0 : index
    %c0_460 = arith.constant 0 : index
    %684 = vector.load %arg17[%683, %c0_459, %c0_460] : memref<6x2x32xf32, #tpu.memory_space<vmem>>, vector<1x2x32xf32>
    %685 = vector.shape_cast %684 : vector<1x2x32xf32> to vector<2x32xf32>
    %686 = vector.shape_cast %682 : vector<2x32xf32> to vector<1x2x32xf32>
    tpu.vector_store %arg17[%683, %c0_459, %c0_460], %686 {strides = array<i32>} : memref<6x2x32xf32, #tpu.memory_space<vmem>>, vector<1x2x32xf32>,
    %c6_i32 = arith.constant 6 : i32
    return
  }
  func.func @transform_0(%arg0: i32) -> (i32, i32, i32) {
    %c0_i32 = arith.constant 0 : i32
    %c0_i32_0 = arith.constant 0 : i32
    %c0_i32_1 = arith.constant 0 : i32
    return %c0_i32, %arg0, %c0_i32_0 : i32, i32, i32
  }
  func.func @transform_1(%arg0: i32) -> (i32, i32, i32) {
    %c0_i32 = arith.constant 0 : i32
    %c0_i32_0 = arith.constant 0 : i32
    %c0_i32_1 = arith.constant 0 : i32
    return %arg0, %c0_i32, %c0_i32_0 : i32, i32, i32
  }
  func.func @transform_2(%arg0: i32) -> (i32, i32) {
    %c0_i32 = arith.constant 0 : i32
    %c0_i32_0 = arith.constant 0 : i32
    %c0_i32_1 = arith.constant 0 : i32
    return %c0_i32, %c0_i32_0 : i32, i32
  }
  func.func @transform_3(%arg0: i32) -> (i32, i32) {
    %c0_i32 = arith.constant 0 : i32
    %c0_i32_0 = arith.constant 0 : i32
    %c0_i32_1 = arith.constant 0 : i32
    return %c0_i32, %c0_i32_0 : i32, i32
  }
  func.func @transform_4(%arg0: i32) -> (i32, i32) {
    %c0_i32 = arith.constant 0 : i32
    %c0_i32_0 = arith.constant 0 : i32
    %c0_i32_1 = arith.constant 0 : i32
    return %c0_i32, %c0_i32_0 : i32, i32
  }
  func.func @transform_5(%arg0: i32) -> (i32, i32) {
    %c0_i32 = arith.constant 0 : i32
    %c0_i32_0 = arith.constant 0 : i32
    %c0_i32_1 = arith.constant 0 : i32
    return %c0_i32, %c0_i32_0 : i32, i32
  }
  func.func @transform_6(%arg0: i32) -> (i32, i32) {
    %c0_i32 = arith.constant 0 : i32
    %c0_i32_0 = arith.constant 0 : i32
    %c0_i32_1 = arith.constant 0 : i32
    return %c0_i32, %c0_i32_0 : i32, i32
  }
  func.func @transform_7(%arg0: i32) -> (i32, i32) {
    %c0_i32 = arith.constant 0 : i32
    %c0_i32_0 = arith.constant 0 : i32
    %c0_i32_1 = arith.constant 0 : i32
    return %c0_i32, %c0_i32_0 : i32, i32
  }
  func.func @transform_8(%arg0: i32) -> (i32, i32, i32) {
    %c0_i32 = arith.constant 0 : i32
    %c0_i32_0 = arith.constant 0 : i32
    %c0_i32_1 = arith.constant 0 : i32
    %c0_i32_2 = arith.constant 0 : i32
    return %c0_i32, %c0_i32_0, %c0_i32_1 : i32, i32, i32
  }
  func.func @transform_9(%arg0: i32) -> (i32, i32, i32) {
    %c0_i32 = arith.constant 0 : i32
    %c0_i32_0 = arith.constant 0 : i32
    %c0_i32_1 = arith.constant 0 : i32
    %c0_i32_2 = arith.constant 0 : i32
    return %c0_i32, %c0_i32_0, %c0_i32_1 : i32, i32, i32
  }
  func.func @transform_10(%arg0: i32) -> (i32, i32, i32) {
    %c0_i32 = arith.constant 0 : i32
    %c0_i32_0 = arith.constant 0 : i32
    %c0_i32_1 = arith.constant 0 : i32
    %c0_i32_2 = arith.constant 0 : i32
    return %c0_i32, %c0_i32_0, %c0_i32_1 : i32, i32, i32
  }
  func.func @transform_11(%arg0: i32) -> (i32, i32, i32) {
    %c0_i32 = arith.constant 0 : i32
    %c0_i32_0 = arith.constant 0 : i32
    %c0_i32_1 = arith.constant 0 : i32
    %c0_i32_2 = arith.constant 0 : i32
    return %c0_i32, %c0_i32_0, %c0_i32_1 : i32, i32, i32
  }
  func.func @transform_12(%arg0: i32) -> (i32, i32) {
    %c0_i32 = arith.constant 0 : i32
    %c0_i32_0 = arith.constant 0 : i32
    %c0_i32_1 = arith.constant 0 : i32
    return %c0_i32, %c0_i32_0 : i32, i32
  }
  func.func @transform_13(%arg0: i32) -> (i32, i32) {
    %c0_i32 = arith.constant 0 : i32
    %c0_i32_0 = arith.constant 0 : i32
    %c0_i32_1 = arith.constant 0 : i32
    return %c0_i32, %c0_i32_0 : i32, i32
  }
  func.func @transform_14(%arg0: i32) -> (i32, i32) {
    %c0_i32 = arith.constant 0 : i32
    %c0_i32_0 = arith.constant 0 : i32
    %c0_i32_1 = arith.constant 0 : i32
    return %c0_i32, %c0_i32_0 : i32, i32
  }
  func.func @transform_15(%arg0: i32) -> (i32, i32) {
    %c0_i32 = arith.constant 0 : i32
    %c0_i32_0 = arith.constant 0 : i32
    %c0_i32_1 = arith.constant 0 : i32
    return %c0_i32, %c0_i32_0 : i32, i32
  }
  func.func @transform_16(%arg0: i32) -> (i32, i32, i32) {
    %c0_i32 = arith.constant 0 : i32
    %c0_i32_0 = arith.constant 0 : i32
    %c0_i32_1 = arith.constant 0 : i32
    return %c0_i32, %arg0, %c0_i32_0 : i32, i32, i32
  }
  func.func @transform_17(%arg0: i32) -> (i32, i32, i32) {
    %c0_i32 = arith.constant 0 : i32
    %c0_i32_0 = arith.constant 0 : i32
    %c0_i32_1 = arith.constant 0 : i32
    return %c0_i32, %arg0, %c0_i32_0 : i32, i32, i32
  }
}

</mosaic_0001>

<bundles_post_ra>
// kernel: caption_net_forward.3
= control target key start
LH: loop header
LB: loop body
LE: loop exit
PB: predicated region body
PF: predicated region fallthrough
CT: control target
= control target key end

     0   :  { %vm24_vm0 = vcmask 261120   ;;  %s114_s1 = inlined_call_operand.vmem [shape: f32[32,128], index: 1, kind: input, shape index: {}]   ;;  %s115_s2 = inlined_call_operand.vmem [shape: f32[1,128], index: 2, kind: input, shape index: {}]   ;;  %s116_s0 = inlined_call_operand.vmem [shape: f32[16,32], index: 0, kind: input, shape index: {}]   ;;  %s117_s3 = inlined_call_operand.vmem [shape: f32[16,128], index: 3, kind: output, shape index: {}]  }
   0x1   :  { %v19_v0 = vld [vmem:[%s114_s1 + $0x18] sm:$0xff]  ;;  %v18_v1 = vld [vmem:[%s114_s1 + $0x10] sm:$0xff]  ;;  %v17_v2 = vld [vmem:[%s114_s1 + $0x8] sm:$0xff] }
   0x2   :  { %43 = vmatpush.msra.mxu0 %v19_v0  ;;  %62 = vmatpush.msra.mxu1 %v19_v0  ;;  %v16_v3 = vld [vmem:[%s114_s1] sm:$0xff]  ;;  %v15_v5 = vld [vmem:[%s116_s0 + $0x8] sm:$0xff] }
   0x3   :  { %v14_v4 = vld [vmem:[%s116_s0] sm:$0xff] }
   0x4   :  { %44 = vmatpush.msra.mxu0 %v18_v1  ;;  %63 = vmatpush.msra.mxu1 %v18_v1  ;;  %v66_v6 = vld [vmem:[%s115_s2] ss:$0 sm:$0xff] }
   0x6   :  { %45 = vmatpush.msra.mxu0 %v17_v2  ;;  %64 = vmatpush.msra.mxu1 %v17_v2 }
   0x8   :  { %46 = vmatpush.msra.mxu0 %v16_v3  ;;  %65 = vmatpush.msra.mxu1 %v16_v3 }
   0x9   :  { %60 = vmatmul.msk.f32.vlgmr.msra.gmra.mxu0 %vm24_vm0, %v14_v4  ;;  %61 = vmatmul.msk.f32.vlgmr.msra.gmra.mxu1 %vm24_vm0, %v15_v5 }
  0x86   :  { %v48_v7 = vpop.f32.mrf.mxu0  ;;  %v51_v8 = vpop.f32.mrf.mxu1 }
  0x87   :  { %v49_v9 = vadd.f32 %v66_v6, %v48_v7  ;;  %v52_v10 = vadd.f32 %v66_v6, %v51_v8 }
  0x89   :  { %54 = vst [vmem:[%s117_s3] sm:$0xff] %v49_v9 }
  0x8a   :  { %55 = vst [vmem:[%s117_s3 + $0x8] sm:$0xff] %v52_v10 }

// kernel: caption_net_forward.2
= control target key start
LH: loop header
LB: loop body
LE: loop exit
PB: predicated region body
PF: predicated region fallthrough
CT: control target
= control target key end

     0   :  { %v3746_v2 = vmov 16.0   ;;  %vm59_vm0 = vcmask 261120   ;;  %vm97_vm2 = vcmask 1041409   ;;  %vm229_vm3 = vcmask 130048   ;;  %s5070_s6 = inlined_call_operand.vmem [shape: f32[32,32], index: 6, kind: input, shape index: {}]   ;;  %s5071_s1 = inlined_call_operand.vmem [shape: f32[2,16,32], index: 1, kind: input, shape index: {}]   ;;  %s5072_s2 = inlined_call_operand.vmem [shape: f32[32,32], index: 2, kind: input, shape index: {}]   ;;  %s5073_s8 = inlined_call_operand.vmem [shape: f32[4,16,32], index: 8, kind: input, shape index: {}]   ;;  %s5074_s7 = inlined_call_operand.vmem [shape: f32[1,32], index: 7, kind: input, shape index: {}]   ;;  %s5075_s3 = inlined_call_operand.vmem [shape: f32[1,32], index: 3, kind: input, shape index: {}]   ;;  %s5076_s11 = inlined_call_operand.vmem [shape: f32[4,1,32], index: 11, kind: input, shape index: {}]   ;;  %s5077_s0 = inlined_call_operand.vmem [shape: f32[6,2,16], index: 0, kind: input, shape index: {}]   ;;  %s5078_s4 = inlined_call_operand.vmem [shape: f32[32,32], index: 4, kind: input, shape index: {}]   ;;  %s5079_s14 = inlined_call_operand.vmem [shape: f32[16,32], index: 14, kind: input, shape index: {}]   ;;  %s5080_s10 = inlined_call_operand.vmem [shape: f32[4,32,32], index: 10, kind: input, shape index: {}]   ;;  %s5081_s5 = inlined_call_operand.vmem [shape: f32[1,32], index: 5, kind: input, shape index: {}]   ;;  %s5082_s15 = inlined_call_operand.vmem [shape: f32[1,32], index: 15, kind: input, shape index: {}]   ;;  %s5083_s9 = inlined_call_operand.vmem [shape: f32[4,32,32], index: 9, kind: input, shape index: {}]   ;;  %s5084_s13 = inlined_call_operand.vmem [shape: f32[32,32], index: 13, kind: input, shape index: {}]   ;;  %s5085_s17 = inlined_call_operand.vmem [shape: f32[6,2,128], index: 17, kind: output, shape index: {1}]   ;;  %s5086_s12 = inlined_call_operand.vmem [shape: f32[32,32], index: 12, kind: input, shape index: {}]   ;;  %s5087_s16 = inlined_call_operand.vmem [shape: f32[6,2,32], index: 16, kind: output, shape index: {0}]  }
   0x1   :  { %5096 = sst [smem:[#allocation9_spill]] %s5070_s6  ;;  %3592 = vrcp.f32 %v3746_v2  ;;  %v90_v8 = vld [vmem:[%s5072_s2 + $0x18] sm:$0xff]  ;;  %v89_v12 = vld [vmem:[%s5072_s2 + $0x10] sm:$0xff]  ;;  %v88_v16 = vld [vmem:[%s5072_s2 + $0x8] sm:$0xff]  ;;  %vm267_vm4 = vcmask 254976   ;;  %vm591_vm5 = vcmask 122880  }
   0x2   :  { %5097 = sst [smem:[#allocation10_spill]] %s5071_s1  ;;  %113 = vmatpush.msra.mxu0 %v90_v8  ;;  %v205_v18 = vld [vmem:[%s5073_s8 + $0x8] sm:$0xff]  ;;  %v87_v21 = vld [vmem:[%s5072_s2] sm:$0xff]  ;;  %v3287_v25 = vld [vmem:[%s5073_s8 + $0x18] sm:$0xff] }
   0x3   :  { %s5098_s26 = sld [smem:[#allocation9_spill]]  ;;  %248 = vmatpush.msra.mxu3 %v205_v18  ;;  %v3913_v42 = vld [vmem:[%s5077_s0] sm:$0x3]  ;;  %v3918_v43 = vld [vmem:[%s5077_s0 + $0x2] sm:$0x3]  ;;  %v3286_v51 = vld [vmem:[%s5073_s8 + $0x10] sm:$0xff] }
   0x4   :  { %s5099_s19 = sld [smem:[#allocation10_spill]]  ;;  %114 = vmatpush.msra.mxu0 %v89_v12  ;;  %v3923_v44 = vld [vmem:[%s5077_s0 + $0x4] sm:$0x3]  ;;  %v3928_v45 = vld [vmem:[%s5077_s0 + $0x6] sm:$0x3]  ;;  %v124_v53 = vld [vmem:[%s5078_s4 + $0x18] sm:$0xff] }
   0x5   :  { %216 = vst [vmem:[#allocation1] ss:$4 sm:$0xff] %v3913_v42  ;;  %v202_v46 = vld [vmem:[%s5077_s0 + $0x8] sm:$0x3]  ;;  %v203_v47 = vld [vmem:[%s5077_s0 + $0xa] sm:$0x3]  ;;  %141 = vmatpush.msra.mxu1 %v124_v53 }
   0x6   :  { %115 = vmatpush.msra.mxu0 %v88_v16  ;;  %218 = vst [vmem:[#allocation1 + $0x1] ss:$4 sm:$0xff] %v3918_v43  ;;  %v204_v54 = vld [vmem:[%s5073_s8] sm:$0xff]  ;;  %v123_v56 = vld [vmem:[%s5078_s4 + $0x10] sm:$0xff]  ;;  %v122_v57 = vld [vmem:[%s5078_s4 + $0x8] sm:$0xff] }
   0x7   :  { %v3593_v20 = vpop.eup %3592  ;;  %220 = vst [vmem:[#allocation1 + $0x2] ss:$4 sm:$0xff] %v3923_v44  ;;  %249 = vmatpush.msra.mxu3 %v204_v54  ;;  %142 = vmatpush.msra.mxu1 %v123_v56  ;;  %v121_v59 = vld [vmem:[%s5078_s4] sm:$0xff]  ;;  %v470_v60 = vld [vmem:[%s5079_s14 + $0x8] sm:$0xff]  ;;  %v4000_v8 = vld [vmem:[%s5080_s10 + $0x18] sm:$0xff] }
   0x8   :  { %v79_v24 = vmul.f32 16.0, %v3593_v20  ;;  %116 = vmatpush.msra.mxu0 %v87_v21  ;;  %vm83_vm1 = vweird.f32 %v3593_v20  ;;  %222 = vst [vmem:[#allocation1 + $0x3] ss:$4 sm:$0xff] %v3928_v45  ;;  %v469_v61 = vld [vmem:[%s5079_s14] sm:$0xff]  ;;  %v3292_v62 = vld [vmem:[%s5073_s8 + $0x28] sm:$0xff] }
   0x9   :  { %v152_v0 = vld [vmem:[%s5098_s26 + $0x18] sm:$0xff]  ;;  %v151_v1 = vld [vmem:[%s5098_s26 + $0x10] sm:$0xff]  ;;  %v150_v3 = vld [vmem:[%s5098_s26 + $0x8] sm:$0xff]  ;;  %224 = vst [vmem:[#allocation1 + $0x20] ss:$4 sm:$0xff] %v202_v46  ;;  %143 = vmatpush.msra.mxu1 %v122_v57 }
   0xa   :  { %181 = vmatpush.msra.mxu2 %v152_v0  ;;  %v3849_v4 = vld [vmem:[%s5099_s19] sm:$0xff]  ;;  %v3854_v5 = vld [vmem:[%s5099_s19 + $0x8] sm:$0xff]  ;;  %v3859_v6 = vld [vmem:[%s5099_s19 + $0x10] sm:$0xff]  ;;  %v80_v28 = vsub.f32 1.0, %v79_v24  ;;  %313 = vmatpush.msrb.mxu0 %v3287_v25  ;;  %226 = vst [vmem:[#allocation1 + $0x21] ss:$4 sm:$0xff] %v203_v47 }
   0xb   :  { %v3864_v7 = vld [vmem:[%s5099_s19 + $0x18] sm:$0xff]  ;;  %v60_v9 = vsel %vm59_vm0, %v3849_v4, 0.0  ;;  %v61_v10 = vsel %vm59_vm0, %v3854_v5, 0.0  ;;  %v149_v11 = vld [vmem:[%s5098_s26] sm:$0xff]  ;;  %v69_v14 = vsel %vm59_vm0, %v3859_v6, 0.0  ;;  %144 = vmatpush.msra.mxu1 %v121_v59 }
   0xc   :  { %182 = vmatpush.msra.mxu2 %v151_v1  ;;  %v62_v13 = vadd.f32 %v61_v10, %v60_v9  ;;  %v70_v15 = vsel %vm59_vm0, %v3864_v7, 0.0  ;;  %v81_v31 = vmul.f32 %v3593_v20, %v80_v28  ;;  %314 = vmatpush.msrb.mxu0 %v3286_v51  ;;  %v3291_v63 = vld [vmem:[%s5073_s8 + $0x20] sm:$0xff]  ;;  %v3297_v0 = vld [vmem:[%s5073_s8 + $0x38] sm:$0xff]  ;;  %v4009_v9 = vld [vmem:[%s5080_s10 + $0x10] sm:$0xff] }
   0xd   :  { %v71_v17 = vadd.f32 %v70_v15, %v69_v14  ;;  %378 = vmatpush.msrb.mxu1 %v3292_v62  ;;  %443 = vmatpush.msrb.mxu3 %v3297_v0  ;;  %v4015_v10 = vld [vmem:[%s5080_s10 + $0x8] sm:$0xff]  ;;  %v4036_v14 = vld [vmem:[%s5080_s10 + $0x50] sm:$0xff]  ;;  %v3590_v56 = vld [vmem:[%s5076_s11 + $0x3] ss:$0 sm:$0xff] }
   0xe   :  { %183 = vmatpush.msra.mxu2 %v150_v3  ;;  %v63_v19 = vrot.slane %v62_v13, 4  ;;  %v82_v34 = vadd.f32 %v3593_v20, %v81_v31  ;;  %v3296_v3 = vld [vmem:[%s5073_s8 + $0x30] sm:$0xff]  ;;  %v4042_v15 = vld [vmem:[%s5080_s10 + $0x48] sm:$0xff]  ;;  %v3586_v31 = vld [vmem:[%s5076_s11 + $0x1] ss:$0 sm:$0xff] }
   0xf   :  { %v72_v22 = vrot.slane %v71_v17, 4  ;;  %v227_v48 = vld.sshfl [vmem:[#allocation1] sm:$0xff pattern:$0x73625140]  ;;  %379 = vmatpush.msrb.mxu1 %v3291_v63  ;;  %444 = vmatpush.msrb.mxu3 %v3296_v3 }
  0x10   :  { %184 = vmatpush.msra.mxu2 %v149_v11  ;;  %v64_v23 = vadd.f32 %v63_v19, %v62_v13  ;;  %v84_v37 = vsel %vm83_vm1, %v3593_v20, %v82_v34  ;;  %282 = vst [vmem:[#allocation1] ss:$4 sm:$0xff] %v3913_v42  ;;  %3284 = vmatmul.msk.f32.vlgmr.msra.gmra.mxu3 %vm229_vm3, %v227_v48  ;;  %v4021_v11 = vld [vmem:[%s5080_s10] sm:$0xff]  ;;  %v4027_v13 = vld [vmem:[%s5080_s10 + $0x58] sm:$0xff] }
  0x11   :  { %3280 = vmatmul.msk.f32.vlgmr.msra.gmra.mxu2 %vm59_vm0, %v3849_v4  ;;  %v73_v26 = vadd.f32 %v72_v22, %v71_v17  ;;  %284 = vst [vmem:[#allocation1 + $0x1] ss:$4 sm:$0xff] %v3918_v43  ;;  %v228_v49 = vld.sshfl [vmem:[#allocation1 + $0x20] sm:$0xff pattern:$0x73625140] }
  0x12   :  { %v65_v27 = vrot.slane %v64_v23, 2  ;;  %659 = vmatpush.msrb.mxu2 %v3864_v7  ;;  %286 = vst [vmem:[#allocation1 + $0x2] ss:$4 sm:$0xff] %v3923_v44  ;;  %v4048_v17 = vld [vmem:[%s5080_s10 + $0x40] sm:$0xff] }
  0x13   :  { %v74_v29 = vrot.slane %v73_v26, 2  ;;  %288 = vst [vmem:[#allocation1 + $0x3] ss:$4 sm:$0xff] %v3928_v45  ;;  %v3585_v19 = vld [vmem:[%s5075_s3] ss:$0 sm:$0xff] }
  0x14   :  { %v66_v30 = vadd.f32 %v65_v27, %v64_v23  ;;  %660 = vmatpush.msrb.mxu2 %v3859_v6  ;;  %290 = vst [vmem:[#allocation1 + $0x20] ss:$4 sm:$0xff] %v202_v46  ;;  %v3584_v20 = vld [vmem:[%s5074_s7] ss:$0 sm:$0xff] }
  0x15   :  { %v75_v32 = vadd.f32 %v74_v29, %v73_v26  ;;  %292 = vst [vmem:[#allocation1 + $0x21] ss:$4 sm:$0xff] %v203_v47  ;;  %v3589_v57 = vld [vmem:[%s5082_s15] ss:$0 sm:$0xff] }
  0x16   :  { %v67_v33 = vrot.slane %v66_v30, 1 }
  0x17   :  { %v76_v35 = vrot.slane %v75_v32, 1 }
  0x18   :  { %v68_v36 = vadd.f32 %v67_v33, %v66_v30  ;;  %3285 = vmatmul.msk.f32.gmra.mxu3 %vm229_vm3, %v228_v49 }
  0x19   :  { %3281 = vmatmul.msk.f32.gmra.mxu2 %vm59_vm0, %v3854_v5  ;;  %v77_v38 = vadd.f32 %v76_v35, %v75_v32 }
  0x1a   :  { %v85_v39 = vmul.f32 %v84_v37, %v68_v36  ;;  %v293_v50 = vld.sshfl [vmem:[#allocation1] sm:$0xff pattern:$0x73625140] }
  0x1b   :  { %v86_v40 = vmul.f32 %v84_v37, %v77_v38  ;;  %347 = vst [vmem:[#allocation1] ss:$4 sm:$0xff] %v3913_v42 }
  0x1c   :  { %349 = vst [vmem:[#allocation1 + $0x1] ss:$4 sm:$0xff] %v3918_v43  ;;  %v294_v52 = vld.sshfl [vmem:[#allocation1 + $0x20] sm:$0xff pattern:$0x73625140] }
  0x1d   :  { %v3902_v41 = vsel %vm97_vm2, %v86_v40, %v85_v39  ;;  %351 = vst [vmem:[#allocation1 + $0x2] ss:$4 sm:$0xff] %v3923_v44  ;;  %v3587_v40 = vld [vmem:[%s5076_s11] ss:$0 sm:$0xff] }
  0x1e   :  { %3278 = vmatmul.msk.f32.vlgmr.msra.gmra.mxu0 %vm59_vm0, %v3902_v41  ;;  %353 = vst [vmem:[#allocation1 + $0x3] ss:$4 sm:$0xff] %v3928_v45  ;;  %3279 = vmatmul.msk.f32.vlgmr.msra.gmra.mxu1 %vm59_vm0, %v3902_v41 }
  0x1f   :  { %355 = vst [vmem:[#allocation1 + $0x20] ss:$4 sm:$0xff] %v202_v46  ;;  %506 = vmatpush.msra.mxu0 %v470_v60 }
  0x20   :  { %357 = vst [vmem:[#allocation1 + $0x21] ss:$4 sm:$0xff] %v203_v47 }
  0x21   :  { %3282 = vmatmul.msk.f32.gmra.mxu2 %vm59_vm0, %v3859_v6  ;;  %507 = vmatpush.msra.mxu0 %v469_v61 }
  0x25   :  { %v358_v55 = vld.sshfl [vmem:[#allocation1] sm:$0xff pattern:$0x73625140] }
  0x26   :  { %3289 = vmatmul.msk.f32.vlgmr.msrb.gmra.mxu0 %vm229_vm3, %v293_v50  ;;  %412 = vst [vmem:[#allocation1] ss:$4 sm:$0xff] %v3913_v42  ;;  %3294 = vmatmul.msk.f32.vlgmr.msrb.gmra.mxu1 %vm229_vm3, %v358_v55 }
  0x27   :  { %v359_v58 = vld.sshfl [vmem:[#allocation1 + $0x20] sm:$0xff pattern:$0x73625140]  ;;  %414 = vst [vmem:[#allocation1 + $0x1] ss:$4 sm:$0xff] %v3918_v43  ;;  %713 = vmatpush.msrb.mxu0 %v4000_v8 }
  0x28   :  { %420 = vst [vmem:[#allocation1 + $0x20] ss:$4 sm:$0xff] %v202_v46 }
  0x29   :  { %3283 = vmatmul.msk.f32.gmra.mxu2 %vm59_vm0, %v3864_v7  ;;  %422 = vst [vmem:[#allocation1 + $0x21] ss:$4 sm:$0xff] %v203_v47  ;;  %714 = vmatpush.msrb.mxu0 %v4009_v9 }
  0x2a   :  { %416 = vst [vmem:[#allocation1 + $0x2] ss:$4 sm:$0xff] %v3923_v44 }
  0x2b   :  { %418 = vst [vmem:[#allocation1 + $0x3] ss:$4 sm:$0xff] %v3928_v45  ;;  %715 = vmatpush.msrb.mxu0 %v4015_v10 }
  0x2d   :  { %716 = vmatpush.msrb.mxu0 %v4021_v11 }
  0x2e   :  { %3290 = vmatmul.msk.f32.gmra.mxu0 %vm229_vm3, %v294_v52  ;;  %3295 = vmatmul.msk.f32.gmra.mxu1 %vm229_vm3, %v359_v58 }
  0x30   :  { %v424_v1 = vld.sshfl [vmem:[#allocation1 + $0x20] sm:$0xff pattern:$0x73625140] }
  0x31   :  { %483 = vst [vmem:[#allocation1 + $0x20] ss:$4 sm:$0xff] %v202_v46 }
  0x32   :  { %485 = vst [vmem:[#allocation1 + $0x21] ss:$4 sm:$0xff] %v203_v47  ;;  %v423_v2 = vld.sshfl [vmem:[#allocation1] sm:$0xff pattern:$0x73625140] }
  0x33   :  { %475 = vst [vmem:[#allocation1] ss:$4 sm:$0xff] %v3913_v42  ;;  %3299 = vmatmul.msk.f32.vlgmr.msrb.gmra.mxu3 %vm229_vm3, %v423_v2  ;;  %v3591_v47 = vld [vmem:[%s5076_s11 + $0x2] ss:$0 sm:$0xff] }
  0x34   :  { %477 = vst [vmem:[#allocation1 + $0x1] ss:$4 sm:$0xff] %v3918_v43 }
  0x35   :  { %479 = vst [vmem:[#allocation1 + $0x2] ss:$4 sm:$0xff] %v3923_v44 }
  0x36   :  { %481 = vst [vmem:[#allocation1 + $0x3] ss:$4 sm:$0xff] %v3928_v45 }
  0x39   :  { %v487_v16 = vld.sshfl [vmem:[#allocation1 + $0x20] sm:$0xff pattern:$0x73625140] }
  0x3b   :  { %3300 = vmatmul.msk.f32.gmra.mxu3 %vm229_vm3, %v424_v1 }
  0x3d   :  { %v486_v12 = vld.sshfl [vmem:[#allocation1] sm:$0xff pattern:$0x73625140] }
  0x3e   :  { %3301 = vmatmul.msk.f32.vlgmr.msra.gmra.mxu0 %vm229_vm3, %v486_v12 }
  0x3f   :  { %857 = vmatpush.msra.mxu0 %v4027_v13 }
  0x41   :  { %858 = vmatpush.msra.mxu0 %v4036_v14 }
  0x43   :  { %859 = vmatpush.msra.mxu0 %v4042_v15 }
  0x45   :  { %860 = vmatpush.msra.mxu0 %v4048_v17 }
  0x46   :  { %3302 = vmatmul.msk.f32.gmra.mxu0 %vm229_vm3, %v487_v16 }
  0x93   :  { %v251_v41 = vpop.f32.mrf.mxu3 }
  0x94   :  { %v186_v18 = vpop.f32.mrf.mxu2  ;;  %v252_v42 = vadd.f32 %v3587_v40, %v251_v41 }
  0x95   :  { %v4066_v25 = vadd.f32 %v3584_v20, %v186_v18 }
  0x96   :  { %v259_v44 = vrot.slane %v252_v42, 2  ;;  %v260_v45 = vrot.slane %v252_v42, 4  ;;  %v261_v46 = vrot.slane %v252_v42, 6  ;;  %268 = vst.msk [vmem:[#allocation2] sm:$0x3] %vm267_vm4, %v252_v42 }
  0x98   :  { %269 = vst.msk [vmem:[#allocation2 + $0x2] sm:$0x3] %vm267_vm4, %v259_v44 }
  0x99   :  { %270 = vst.msk [vmem:[#allocation2 + $0x4] sm:$0x3] %vm267_vm4, %v260_v45 }
  0x9a   :  { %271 = vst.msk [vmem:[#allocation2 + $0x6] sm:$0x3] %vm267_vm4, %v261_v46 }
  0x9b   :  { %v118_v21 = vpop.f32.mrf.mxu0  ;;  %v4098_v43 = vpop.f32.mrf.mxu1 }
  0x9c   :  { %v189_v22 = vpop.f32.mrf.mxu2  ;;  %v4058_v23 = vadd.f32 %v3585_v19, %v118_v21  ;;  %v254_v48 = vpop.f32.mrf.mxu3 }
  0x9d   :  { %v4060_v24 = vadd.f32 %v3584_v20, %v189_v22  ;;  %v255_v49 = vadd.f32 %v3587_v40, %v254_v48  ;;  %v4145_v48 = vld [vmem:[%s5080_s10 + $0x30] sm:$0xff] }
  0x9e   :  { %3312 = vmatmul.msk.f32.vlgmr.msrb.gmra.mxu0 %vm59_vm0, %v4058_v23  ;;  %v532_v30 = vrot.slane %v4058_v23, 1 }
  0x9f   :  { %3303 = vmatpush.xpose.msk.msra.mxu1 %vm59_vm0, %v4060_v24  ;;  %v262_v52 = vrot.slane %v255_v49, 2  ;;  %272 = vst.msk [vmem:[#allocation2 + $0x8] sm:$0x3] %vm267_vm4, %v255_v49  ;;  %v4151_v49 = vld [vmem:[%s5080_s10 + $0x28] sm:$0xff] }
  0xa1   :  { %273 = vst.msk [vmem:[#allocation2 + $0xa] sm:$0x3] %vm267_vm4, %v262_v52  ;;  %v4169_v52 = vld [vmem:[%s5083_s9 + $0x30] sm:$0xff] }
  0xa3   :  { %3304 = vmatpush.xpose.msk.msra.mxu1 %vm59_vm0, %v4066_v25  ;;  %v316_v32 = vpop.f32.mrf.mxu0  ;;  %v381_v50 = vpop.f32.mrf.mxu1 }
  0xa4   :  { %v192_v26 = vpop.f32.mrf.mxu2  ;;  %v317_v33 = vadd.f32 %v3586_v31, %v316_v32  ;;  %v382_v51 = vadd.f32 %v3591_v47, %v381_v50  ;;  %v4158_v50 = vld [vmem:[%s5080_s10 + $0x20] sm:$0xff] }
  0xa5   :  { %v4080_v29 = vadd.f32 %v3584_v20, %v192_v26  ;;  %5100 = vst [vmem:[#allocation4_spill] sm:$0xff] %v4158_v50 }
  0xa6   :  { %3305 = vmatmul.msk.f32.vlgmr.msra.gmra.mxu1 %vm59_vm0, %v4058_v23  ;;  %3334 = vmatmul.msk.f32.vlgmr.msra.gmra.mxu0 %vm59_vm0, %v4058_v23  ;;  %v324_v34 = vrot.slane %v317_v33, 2  ;;  %v325_v35 = vrot.slane %v317_v33, 4  ;;  %v326_v36 = vrot.slane %v317_v33, 6  ;;  %333 = vst.msk [vmem:[#allocation2 + $0xc] sm:$0x3] %vm267_vm4, %v317_v33  ;;  %v389_v53 = vrot.slane %v382_v51, 2 }
  0xa7   :  { %637 = vmatpush.msrb.mxu1 %v3854_v5  ;;  %v390_v54 = vrot.slane %v382_v51, 4  ;;  %v391_v55 = vrot.slane %v382_v51, 6  ;;  %398 = vst.msk [vmem:[#allocation2 + $0x18] sm:$0x3] %vm267_vm4, %v382_v51  ;;  %v4164_v51 = vld [vmem:[%s5083_s9 + $0x38] sm:$0xff] }
  0xa8   :  { %334 = vst.msk [vmem:[#allocation2 + $0xe] sm:$0x3] %vm267_vm4, %v324_v34 }
  0xa9   :  { %638 = vmatpush.msrb.mxu1 %v3849_v4  ;;  %335 = vst.msk [vmem:[#allocation2 + $0x10] sm:$0x3] %vm267_vm4, %v325_v35 }
  0xaa   :  { %336 = vst.msk [vmem:[#allocation2 + $0x12] sm:$0x3] %vm267_vm4, %v326_v36 }
  0xab   :  { %v319_v37 = vpop.f32.mrf.mxu0  ;;  %399 = vst.msk [vmem:[#allocation2 + $0x1a] sm:$0x3] %vm267_vm4, %v389_v53  ;;  %v384_v12 = vpop.f32.mrf.mxu1  ;;  %759 = vmatpush.msra.mxu1 %v4164_v51  ;;  %v4175_v53 = vld [vmem:[%s5083_s9 + $0x18] sm:$0xff] }
  0xac   :  { %v195_v27 = vpop.f32.mrf.mxu2  ;;  %v320_v38 = vadd.f32 %v3586_v31, %v319_v37  ;;  %400 = vst.msk [vmem:[#allocation2 + $0x1c] sm:$0x3] %vm267_vm4, %v390_v54  ;;  %v385_v18 = vadd.f32 %v3591_v47, %v384_v12  ;;  %v4140_v47 = vld [vmem:[%s5080_s10 + $0x38] sm:$0xff]  ;;  %v4180_v54 = vld [vmem:[%s5083_s9 + $0x28] sm:$0xff] }
  0xad   :  { %v4076_v28 = vadd.f32 %v3584_v20, %v195_v27  ;;  %401 = vst.msk [vmem:[#allocation2 + $0x1e] sm:$0x3] %vm267_vm4, %v391_v55  ;;  %785 = vmatpush.msra.mxu2 %v4140_v47  ;;  %v4186_v55 = vld [vmem:[%s5084_s13 + $0x18] sm:$0xff]  ;;  %760 = vmatpush.msra.mxu1 %v4169_v52 }
  0xae   :  { %v327_v39 = vrot.slane %v320_v38, 2  ;;  %337 = vst.msk [vmem:[#allocation2 + $0x14] sm:$0x3] %vm267_vm4, %v320_v38  ;;  %v392_v27 = vrot.slane %v385_v18, 2  ;;  %989 = vmatpush.msrb.mxu0 %v4186_v55 }
  0xaf   :  { %3306 = vmatpush.xpose.msk.msra.mxu3 %vm59_vm0, %v4076_v28  ;;  %402 = vst.msk [vmem:[#allocation2 + $0x20] sm:$0x3] %vm267_vm4, %v385_v18  ;;  %786 = vmatpush.msra.mxu2 %v4145_v48  ;;  %v4236_v18 = vld [vmem:[%s5083_s9 + $0x78] sm:$0xff] }
  0xb0   :  { %338 = vst.msk [vmem:[#allocation2 + $0x16] sm:$0x3] %vm267_vm4, %v327_v39  ;;  %761 = vmatpush.msra.mxu1 %v4180_v54 }
  0xb1   :  { %403 = vst.msk [vmem:[#allocation2 + $0x22] sm:$0x3] %vm267_vm4, %v392_v27  ;;  %787 = vmatpush.msra.mxu2 %v4151_v49  ;;  %v4308_v27 = vld [vmem:[%s5083_s9 + $0x50] sm:$0xff] }
  0xb2   :  { %5101 = vst [vmem:[#allocation5_spill] sm:$0xff] %v4175_v53 }
  0xb3   :  { %3307 = vmatpush.xpose.msk.msra.mxu3 %vm59_vm0, %v4080_v29  ;;  %788 = vmatpush.msra.mxu2 %v4158_v50 }
  0xb6   :  { %3308 = vmatmul.msk.f32.vlgmr.msra.gmra.mxu3 %vm59_vm0, %v532_v30  ;;  %v446_v58 = vpop.f32.mrf.mxu3 }
  0xb7   :  { %v447_v60 = vadd.f32 %v3590_v56, %v446_v58  ;;  %688 = vmatpush.msrb.mxu3 %v4175_v53  ;;  %v4203_v58 = vld [vmem:[%s5083_s9 + $0x20] sm:$0xff] }
  0xb8   :  { %762 = vmatpush.msra.mxu1 %v4203_v58 }
  0xb9   :  { %v454_v62 = vrot.slane %v447_v60, 2  ;;  %463 = vst.msk [vmem:[#allocation2 + $0x24] sm:$0x3] %vm267_vm4, %v447_v60  ;;  %v455_v2 = vrot.slane %v447_v60, 4  ;;  %v456_v3 = vrot.slane %v447_v60, 6 }
  0xbb   :  { %v509_v59 = vpop.f32.mrf.mxu0  ;;  %464 = vst.msk [vmem:[#allocation2 + $0x26] sm:$0x3] %vm267_vm4, %v454_v62 }
  0xbc   :  { %v510_v61 = vadd.f32 %v3589_v57, %v509_v59  ;;  %465 = vst.msk [vmem:[#allocation2 + $0x28] sm:$0x3] %vm267_vm4, %v455_v2  ;;  %v4230_v2 = vld [vmem:[%s5080_s10 + $0x60] sm:$0xff] }
  0xbd   :  { %466 = vst.msk [vmem:[#allocation2 + $0x2a] sm:$0x3] %vm267_vm4, %v456_v3 }
  0xbe   :  { %v517_v63 = vrot.slane %v510_v61, 2  ;;  %v518_v0 = vrot.slane %v510_v61, 4  ;;  %v519_v1 = vrot.slane %v510_v61, 6  ;;  %525 = vst.msk [vmem:[#allocation3] sm:$0x3] %vm267_vm4, %v510_v61  ;;  %v449_v16 = vpop.f32.mrf.mxu3 }
  0xbf   :  { %v450_v20 = vadd.f32 %v3590_v56, %v449_v16  ;;  %v4191_v56 = vld [vmem:[%s5083_s9 + $0x10] sm:$0xff] }
  0xc0   :  { %526 = vst.msk [vmem:[#allocation3 + $0x2] sm:$0x3] %vm267_vm4, %v517_v63  ;;  %689 = vmatpush.msrb.mxu3 %v4191_v56  ;;  %v4212_v63 = vld [vmem:[%s5080_s10 + $0x78] sm:$0xff] }
  0xc1   :  { %527 = vst.msk [vmem:[#allocation3 + $0x4] sm:$0x3] %vm267_vm4, %v518_v0  ;;  %v457_v22 = vrot.slane %v450_v20, 2  ;;  %v4218_v0 = vld [vmem:[%s5080_s10 + $0x70] sm:$0xff] }
  0xc2   :  { %528 = vst.msk [vmem:[#allocation3 + $0x6] sm:$0x3] %vm267_vm4, %v519_v1  ;;  %v4224_v1 = vld [vmem:[%s5080_s10 + $0x68] sm:$0xff] }
  0xc3   :  { %v512_v19 = vpop.f32.mrf.mxu0  ;;  %467 = vst.msk [vmem:[#allocation2 + $0x2c] sm:$0x3] %vm267_vm4, %v450_v20  ;;  %v4246_v20 = vld [vmem:[%s5083_s9 + $0x70] sm:$0xff] }
  0xc4   :  { %v513_v21 = vadd.f32 %v3589_v57, %v512_v19  ;;  %468 = vst.msk [vmem:[#allocation2 + $0x2e] sm:$0x3] %vm267_vm4, %v457_v22  ;;  %v4198_v57 = vld [vmem:[%s5084_s13 + $0x10] sm:$0xff]  ;;  %v4267_v22 = vld [vmem:[%s5083_s9 + $0x8] sm:$0xff] }
  0xc5   :  { %5102 = vst [vmem:[#allocation6_spill] sm:$0xff] %v4191_v56  ;;  %990 = vmatpush.msrb.mxu0 %v4198_v57  ;;  %690 = vmatpush.msrb.mxu3 %v4267_v22 }
  0xc6   :  { %v520_v26 = vrot.slane %v513_v21, 2  ;;  %529 = vst.msk [vmem:[#allocation3 + $0x8] sm:$0x3] %vm267_vm4, %v513_v21 }
  0xc7   :  { %5103 = vst [vmem:[#allocation7_spill] sm:$0xff] %v4267_v22 }
  0xc8   :  { %530 = vst.msk [vmem:[#allocation3 + $0xa] sm:$0x3] %vm267_vm4, %v520_v26  ;;  %v4272_v26 = vld [vmem:[%s5083_s9 + $0x68] sm:$0xff] }
 0x123   :  { %v558_v33 = vpop.f32.mrf.mxu1 }
 0x124   :  { %v589_v34 = vmul.f32 0.17677669, %v558_v33 }
 0x126   :  { %v592_v35 = vsel %vm591_vm5, %v589_v34, -inf }
 0x139   :  { %v586_v30 = vpop.f32.mrf.mxu3 }
 0x13a   :  { %v590_v31 = vmul.f32 0.17677669, %v586_v30  ;;  %v4317_v30 = vld [vmem:[%s5083_s9 + $0x48] sm:$0xff] }
 0x13c   :  { %v595_v32 = vsel %vm591_vm5, %v590_v31, -inf }
 0x13d   :  { %596 = vmax.xlane.f32.xlu0 %v595_v32 }
 0x145   :  { %593 = vmax.xlane.f32.xlu0 %v592_v35  ;;  %v741_v35 = vld [vmem:[#allocation2 + $0xc] sm:$0x3] }
 0x1b0   :  { %v597_v36 = vpop.xlane.xlu0 %596 }
 0x1b1   :  { %v599_v37 = vsub.f32 %v590_v31, %v597_v36  ;;  %v4322_v31 = vld [vmem:[%s5083_s9 + $0x40] sm:$0xff] }
 0x1b3   :  { %v602_v38 = vmul.f32 1.442695, %v599_v37 }
 0x1b5   :  { %3594 = vpow2.f32 %v602_v38 }
 0x1b8   :  { %v594_v39 = vpop.xlane.xlu0 %593 }
 0x1b9   :  { %v598_v40 = vsub.f32 %v589_v34, %v594_v39 }
 0x1bb   :  { %v3595_v41 = vpop.eup %3594  ;;  %v600_v42 = vmul.f32 1.442695, %v598_v40  ;;  %v665_v40 = vld [vmem:[#allocation2] sm:$0x3] }
 0x1bc   :  { %v607_v44 = vsel %vm591_vm5, %v3595_v41, 0.0 }
 0x1bd   :  { %3596 = vpow2.f32 %v600_v42  ;;  %608 = vadd.xlane.f32.xlu1 %v607_v44  ;;  %v718_v44 = vpop.f32.mrf.mxu0 }
 0x1c3   :  { %v3597_v45 = vpop.eup %3596 }
 0x1c4   :  { %v604_v46 = vsel %vm591_vm5, %v3597_v45, 0.0 }
 0x1c5   :  { %605 = vadd.xlane.f32.xlu1 %v604_v46 }
 0x230   :  { %v609_v59 = vpop.xlane.xlu1 %608 }
 0x231   :  { %3598 = vrcp.f32 %v609_v59 }
 0x237   :  { %v3599_v60 = vpop.eup %3598 }
 0x238   :  { %v606_v61 = vpop.xlane.xlu1 %605  ;;  %v613_v62 = vmul.f32 %v3599_v60, %v3595_v41 }
 0x239   :  { %3600 = vrcp.f32 %v606_v61 }
 0x23a   :  { %3310 = vmatmul.msk.f32.vlgmr.msrb.gmra.mxu2 %vm229_vm3, %v613_v62  ;;  %v616_v16 = vrot.slane %v613_v62, 7 }
 0x23b   :  { %911 = vmatpush.msrb.mxu2 %v4212_v63 }
 0x23d   :  { %912 = vmatpush.msrb.mxu2 %v4218_v0 }
 0x23f   :  { %v3601_v3 = vpop.eup %3600  ;;  %913 = vmatpush.msrb.mxu2 %v4224_v1 }
 0x240   :  { %v612_v12 = vmul.f32 %v3601_v3, %v3597_v45  ;;  %v867_v45 = vld [vmem:[#allocation2 + $0x24] sm:$0x3] }
 0x241   :  { %914 = vmatpush.msrb.mxu2 %v4230_v2 }
 0x242   :  { %v617_v19 = vsel %vm97_vm2, %v616_v16, %v612_v12  ;;  %3309 = vmatmul.msk.f32.vlgmr.msrb.gmra.mxu1 %vm229_vm3, %v612_v12  ;;  %3323 = vmatmul.msk.f32.vlgmr.msra.gmra.mxu2 %vm59_vm0, %v4058_v23 }
 0x243   :  { %v619_v21 = vsel %vm229_vm3, %v617_v19, 0.0  ;;  %3351 = vmatpush.xpose.msk.msra.mxu2 %vm59_vm0, %v4076_v28  ;;  %885 = vmatpush.msrb.mxu1 %v4236_v18  ;;  %v4347_v19 = vld [vmem:[%s5086_s12 + $0x18] sm:$0xff] }
 0x244   :  { %620 = vst [vmem:[%s5085_s17] sm:$0x3] %v619_v21 }
 0x245   :  { %886 = vmatpush.msrb.mxu1 %v4246_v20 }
 0x247   :  { %3352 = vmatpush.xpose.msk.msra.mxu2 %vm59_vm0, %v4080_v29  ;;  %887 = vmatpush.msrb.mxu1 %v4272_v26 }
 0x24a   :  { %3344 = vmatmul.msk.f32.vlgmr.msrb.gmra.mxu2 %vm59_vm0, %v4058_v23  ;;  %v4303_v23 = vld [vmem:[%s5083_s9 + $0x58] sm:$0xff] }
 0x24b   :  { %1168 = vmatpush.msrb.mxu2 %v4000_v8  ;;  %v4277_v8 = vld [vmem:[%s5084_s13 + $0x8] sm:$0xff] }
 0x24c   :  { %991 = vmatpush.msrb.mxu0 %v4277_v8 }
 0x24d   :  { %1169 = vmatpush.msrb.mxu2 %v4009_v9  ;;  %v4285_v9 = vld [vmem:[%s5083_s9] sm:$0xff] }
 0x24e   :  { %5104 = vst [vmem:[#allocation8_spill] sm:$0xff] %v4285_v9  ;;  %691 = vmatpush.msrb.mxu3 %v4285_v9 }
 0x24f   :  { %1170 = vmatpush.msrb.mxu2 %v4015_v10  ;;  %v4290_v10 = vld [vmem:[%s5083_s9 + $0x60] sm:$0xff] }
 0x250   :  { %888 = vmatpush.msrb.mxu1 %v4290_v10  ;;  %831 = vmatpush.msra.mxu3 %v4303_v23 }
 0x251   :  { %1171 = vmatpush.msrb.mxu2 %v4021_v11  ;;  %v4295_v11 = vld [vmem:[%s5084_s13] sm:$0xff] }
 0x252   :  { %992 = vmatpush.msrb.mxu0 %v4295_v11  ;;  %832 = vmatpush.msra.mxu3 %v4308_v27 }
 0x254   :  { %1113 = vmatpush.msra.mxu0 %v3864_v7  ;;  %833 = vmatpush.msra.mxu3 %v4317_v30 }
 0x256   :  { %1114 = vmatpush.msra.mxu0 %v3859_v6  ;;  %834 = vmatpush.msra.mxu3 %v4322_v31 }
 0x2bd   :  { %v662_v32 = vpop.f32.mrf.mxu2 }
 0x2be   :  { %v672_v7 = vrot.slane %v662_v32, 7  ;;  %v4353_v32 = vld [vmem:[%s5086_s12 + $0x10] sm:$0xff] }
 0x2bf   :  { %v640_v33 = vpop.f32.mrf.mxu1 }
 0x2c0   :  { %v673_v34 = vsel %vm97_vm2, %v672_v7, %v640_v33  ;;  %v4359_v7 = vld [vmem:[%s5086_s12 + $0x8] sm:$0xff]  ;;  %v4365_v33 = vld [vmem:[%s5086_s12] sm:$0xff] }
 0x2c1   :  { %3311 = vmatmul.msk.f32.vlgmr.msrb.gmra.mxu3 %vm59_vm0, %v673_v34  ;;  %3318 = vmatmul.msk.f32.vlgmr.msra.gmra.mxu1 %vm59_vm0, %v673_v34 }
 0x2c2   :  { %3347 = vmatmul.msk.f32.vlgmr.msrb.gmra.mxu0 %vm59_vm0, %v673_v34  ;;  %3348 = vmatpush.xpose.msk.msra.mxu1 %vm59_vm0, %v4060_v24 }
 0x2c3   :  { %1239 = vmatpush.msrb.mxu0 %v4140_v47  ;;  %964 = vmatpush.msrb.mxu3 %v4347_v19 }
 0x2c5   :  { %1240 = vmatpush.msrb.mxu0 %v4145_v48  ;;  %v790_v6 = vpop.f32.mrf.mxu2  ;;  %965 = vmatpush.msrb.mxu3 %v4353_v32 }
 0x2c6   :  { %3349 = vmatpush.xpose.msk.msra.mxu1 %vm59_vm0, %v4066_v25 }
 0x2c7   :  { %1241 = vmatpush.msrb.mxu0 %v4151_v49  ;;  %966 = vmatpush.msrb.mxu3 %v4359_v7 }
 0x2c9   :  { %3329 = vmatmul.msk.f32.vlgmr.msra.gmra.mxu3 %vm59_vm0, %v673_v34  ;;  %3339 = vmatmul.msk.f32.vlgmr.msrb.gmra.mxu1 %vm59_vm0, %v673_v34 }
 0x2ca   :  { %1242 = vmatpush.msrb.mxu0 %v4158_v50  ;;  %1143 = vmatpush.msrb.mxu1 %v4175_v53 }
 0x2cb   :  { %967 = vmatpush.msrb.mxu3 %v4365_v33 }
 0x2cc   :  { %1144 = vmatpush.msrb.mxu1 %v4191_v56 }
 0x2cd   :  { %v916_v61 = vpop.f32.mrf.mxu2  ;;  %1091 = vmatpush.msra.mxu3 %v3854_v5 }
 0x2ce   :  { %1145 = vmatpush.msrb.mxu1 %v4267_v22 }
 0x2cf   :  { %1092 = vmatpush.msra.mxu3 %v3849_v4 }
 0x2d0   :  { %1146 = vmatpush.msrb.mxu1 %v4285_v9 }
 0x33e   :  { %v764_v36 = vpop.f32.mrf.mxu1 }
 0x33f   :  { %v767_v37 = vadd.f32 %v764_v36, %v741_v35 }
 0x341   :  { %v793_v38 = vadd.f32 %v790_v6, %v767_v37 }
 0x343   :  { %v3324_v39 = vmul.f32 -1.442695, %v793_v38 }
 0x344   :  { %v693_v41 = vpop.f32.mrf.mxu3 }
 0x345   :  { %3602 = vpow2.f32 %v3324_v39  ;;  %v696_v42 = vadd.f32 %v693_v41, %v665_v40  ;;  %v813_v40 = vld [vmem:[#allocation2 + $0x18] sm:$0x3] }
 0x346   :  { %v890_v46 = vpop.f32.mrf.mxu1 }
 0x347   :  { %v721_v59 = vadd.f32 %v718_v44, %v696_v42  ;;  %v893_v60 = vadd.f32 %v890_v46, %v867_v45  ;;  %v862_v44 = vpop.f32.mrf.mxu0 }
 0x349   :  { %v3313_v62 = vmul.f32 -1.442695, %v721_v59  ;;  %v919_v3 = vadd.f32 %v916_v61, %v893_v60 }
 0x34b   :  { %v3603_v12 = vpop.eup %3602  ;;  %3604 = vpow2.f32 %v3313_v62  ;;  %v3345_v16 = vmul.f32 -1.442695, %v919_v3 }
 0x34c   :  { %v797_v21 = vadd.f32 1.0, %v3603_v12  ;;  %v836_v36 = vpop.f32.mrf.mxu3 }
 0x34d   :  { %3606 = vpow2.f32 %v3345_v16  ;;  %v839_v41 = vadd.f32 %v836_v36, %v813_v40 }
 0x34e   :  { %3608 = vrcp.f32 %v797_v21  ;;  %v809_v3 = vand.u32 2147483648, %v797_v21  ;;  %vm803_vm7 = vweird.f32 %v797_v21  ;;  %v807_v16 = vand.u32 2147483647, %v797_v21 }
 0x34f   :  { %v865_v59 = vadd.f32 %v862_v44, %v839_v41 }
 0x350   :  { %v810_v41 = vor.u32 1.1754944e-38, %v809_v3  ;;  %vm808_vm11 = vcmp.eq.f32.partialorder %v807_v16, 8.507059e+37 }
 0x351   :  { %v3605_v34 = vpop.eup %3604 }
 0x352   :  { %v725_v6 = vadd.f32 1.0, %v3605_v34 }
 0x353   :  { %v3607_v35 = vpop.eup %3606 }
 0x354   :  { %v3609_v37 = vpop.eup %3608  ;;  %3610 = vrcp.f32 %v725_v6  ;;  %v923_v38 = vadd.f32 1.0, %v3607_v35  ;;  %v737_v4 = vand.u32 2147483648, %v725_v6  ;;  %v3588_v35 = vld [vmem:[%s5081_s5] ss:$0 sm:$0xff]  ;;  %vm731_vm10 = vweird.f32 %v725_v6 }
 0x355   :  { %v799_v39 = vmul.f32 %v3609_v37, %v797_v21  ;;  %vm804_vm6 = vweird.f32 %v3609_v37 }
 0x356   :  { %3612 = vrcp.f32 %v923_v38  ;;  %vm4370_vm8 = vmor %vm803_vm7, %vm804_vm6  ;;  %v738_v21 = vor.u32 1.1754944e-38, %v737_v4  ;;  %vm929_vm15 = vweird.f32 %v923_v38 }
 0x357   :  { %v800_v42 = vsub.f32 1.0, %v799_v39  ;;  %3614 = vtanh.f32 %v865_v59  ;;  %v735_v39 = vand.u32 2147483647, %v725_v6  ;;  %v147_v59 = vadd.f32 %v3588_v35, %v4098_v43 }
 0x359   :  { %v801_v45 = vmul.f32 %v3609_v37, %v800_v42  ;;  %vm736_vm13 = vcmp.eq.f32.partialorder %v735_v39, 8.507059e+37 }
 0x35a   :  { %v3611_v46 = vpop.eup %3610 }
 0x35b   :  { %v727_v60 = vmul.f32 %v3611_v46, %v725_v6  ;;  %v802_v61 = vadd.f32 %v3609_v37, %v801_v45  ;;  %vm732_vm9 = vweird.f32 %v3611_v46  ;;  %v933_v6 = vand.u32 2147483647, %v923_v38 }
 0x35c   :  { %v3613_v62 = vpop.eup %3612  ;;  %vm733_vm12 = vmor %vm731_vm10, %vm732_vm9 }
 0x35d   :  { %v728_v5 = vsub.f32 1.0, %v727_v60  ;;  %v925_v12 = vmul.f32 %v3613_v62, %v923_v38  ;;  %v806_v40 = vsel %vm4370_vm8, %v3609_v37, %v802_v61  ;;  %v3615_v9 = vpop.eup %3614  ;;  %vm930_vm14 = vweird.f32 %v3613_v62 }
 0x35e   :  { %v811_v45 = vsel %vm808_vm11, %v810_v41, %v806_v40  ;;  %v935_v61 = vand.u32 2147483648, %v923_v38  ;;  %vm931_vm1 = vmor %vm929_vm15, %vm930_vm14  ;;  %vm934_vm6 = vcmp.eq.f32.partialorder %v933_v6, 8.507059e+37 }
 0x35f   :  { %v729_v36 = vmul.f32 %v3611_v46, %v728_v5  ;;  %v926_v42 = vsub.f32 1.0, %v925_v12  ;;  %v939_v56 = vmul.f32 %v811_v45, %v147_v59 }
 0x360   :  { %v936_v12 = vor.u32 1.1754944e-38, %v935_v61 }
 0x361   :  { %v730_v44 = vadd.f32 %v3611_v46, %v729_v36  ;;  %v927_v22 = vmul.f32 %v3613_v62, %v926_v42 }
 0x363   :  { %v734_v60 = vsel %vm733_vm12, %v3611_v46, %v730_v44  ;;  %v928_v37 = vadd.f32 %v3613_v62, %v927_v22  ;;  %v944_v22 = vld [vmem:[#allocation3] sm:$0x3] }
 0x364   :  { %v739_v5 = vsel %vm736_vm13, %v738_v21, %v734_v60 }
 0x365   :  { %v940_v53 = vmul.f32 %v3615_v9, %v739_v5  ;;  %v932_v3 = vsel %vm931_vm1, %v3613_v62, %v928_v37  ;;  %v994_v62 = vpop.f32.mrf.mxu0 }
 0x366   :  { %v937_v46 = vsel %vm934_vm6, %v936_v12, %v932_v3 }
 0x367   :  { %v4380_v50 = vadd.f32 %v940_v53, %v939_v56 }
 0x369   :  { %3616 = vtanh.f32 %v4380_v50 }
 0x36f   :  { %v3617_v43 = vpop.eup %3616 }
 0x370   :  { %v4383_v16 = vmul.f32 %v3617_v43, %v937_v46 }
 0x372   :  { %3346 = vmatmul.msk.f32.vlgmr.msrb.gmra.mxu3 %vm59_vm0, %v4383_v16  ;;  %3350 = vmatmul.msk.f32.vlgmr.msra.gmra.mxu1 %vm59_vm0, %v4383_v16  ;;  %v1000_v53 = vrot.slane %v4383_v16, 1 }
 0x373   :  { %1214 = vmatpush.msrb.mxu3 %v4164_v51  ;;  %1285 = vmatpush.msra.mxu1 %v4303_v23 }
 0x374   :  { %3353 = vmatmul.msk.f32.vlgmr.msra.gmra.mxu2 %vm59_vm0, %v1000_v53 }
 0x375   :  { %1310 = vmatpush.msra.mxu2 %v4027_v13  ;;  %1215 = vmatpush.msrb.mxu3 %v4169_v52  ;;  %v4414_v13 = vld [vmem:[%s5099_s19 + $0x18] sm:$0xff] }
 0x376   :  { %1286 = vmatpush.msra.mxu1 %v4308_v27 }
 0x377   :  { %1311 = vmatpush.msra.mxu2 %v4036_v14  ;;  %1216 = vmatpush.msrb.mxu3 %v4180_v54  ;;  %v4420_v14 = vld [vmem:[%s5099_s19 + $0x10] sm:$0xff] }
 0x378   :  { %1287 = vmatpush.msra.mxu1 %v4317_v30 }
 0x379   :  { %1312 = vmatpush.msra.mxu2 %v4042_v15  ;;  %1217 = vmatpush.msrb.mxu3 %v4203_v58 }
 0x37a   :  { %1288 = vmatpush.msra.mxu1 %v4322_v31 }
 0x37b   :  { %1313 = vmatpush.msra.mxu2 %v4048_v17 }
 0x37c   :  { %3358 = vmatmul.msk.f32.vlgmr.msrb.gmra.mxu2 %vm59_vm0, %v4383_v16 }
 0x37d   :  { %1442 = vmatpush.msrb.mxu2 %v4186_v55 }
 0x37f   :  { %1443 = vmatpush.msrb.mxu2 %v4198_v57 }
 0x381   :  { %1444 = vmatpush.msrb.mxu2 %v4277_v8 }
 0x383   :  { %1445 = vmatpush.msrb.mxu2 %v4295_v11 }
 0x384   :  { %3380 = vmatmul.msk.f32.vlgmr.msra.gmra.mxu2 %vm59_vm0, %v4383_v16 }
 0x385   :  { %1567 = vmatpush.msra.mxu2 %v4414_v13 }
 0x387   :  { %1568 = vmatpush.msra.mxu2 %v4420_v14 }
 0x3ef   :  { %v1018_v15 = vpop.f32.mrf.mxu1 }
 0x3f0   :  { %v1043_v17 = vmul.f32 0.17677669, %v1018_v15 }
 0x3f2   :  { %v1045_v56 = vsel %vm591_vm5, %v1043_v17, -inf }
 0x3f3   :  { %1046 = vmax.xlane.f32.xlu2 %v1045_v56 }
 0x3f5   :  { %v969_v9 = vpop.f32.mrf.mxu3 }
 0x3f6   :  { %v972_v38 = vadd.f32 %v969_v9, %v944_v22 }
 0x3f7   :  { %v1040_v34 = vpop.f32.mrf.mxu2 }
 0x3f8   :  { %v997_v4 = vadd.f32 %v994_v62, %v972_v38  ;;  %v1044_v35 = vmul.f32 0.17677669, %v1040_v34  ;;  %v5109_v62 = vld [vmem:[#allocation6_spill] sm:$0xff]  ;;  %v5110_v34 = vld [vmem:[#allocation7_spill] sm:$0xff] }
 0x3fa   :  { %v998_v36 = vmax.f32 %v997_v4, 0.0  ;;  %v1048_v39 = vsel %vm591_vm5, %v1044_v35, -inf  ;;  %v5111_v4 = vld [vmem:[#allocation8_spill] sm:$0xff] }
 0x3fb   :  { %1049 = vmax.xlane.f32.xlu2 %v1048_v39 }
 0x3fc   :  { %999 = vst.msk [vmem:[%s5087_s16] sm:$0x3] %vm267_vm4, %v998_v36 }
 0x466   :  { %v1047_v40 = vpop.xlane.xlu2 %1046 }
 0x467   :  { %v1051_v41 = vsub.f32 %v1043_v17, %v1047_v40  ;;  %v1173_v40 = vpop.f32.mrf.mxu2 }
 0x469   :  { %v1053_v42 = vmul.f32 1.442695, %v1051_v41 }
 0x46b   :  { %3618 = vpow2.f32 %v1053_v42 }
 0x46e   :  { %v1050_v44 = vpop.xlane.xlu2 %1049 }
 0x46f   :  { %v1052_v21 = vsub.f32 %v1044_v35, %v1050_v44  ;;  %v1120_v35 = vld [vmem:[#allocation2 + $0x2] sm:$0x3] }
 0x471   :  { %v3619_v45 = vpop.eup %3618  ;;  %v1055_v59 = vmul.f32 1.442695, %v1052_v21  ;;  %v1197_v21 = vld [vmem:[#allocation2 + $0xe] sm:$0x3] }
 0x472   :  { %v1057_v60 = vsel %vm591_vm5, %v3619_v45, 0.0 }
 0x473   :  { %3620 = vpow2.f32 %v1055_v59  ;;  %1058 = vadd.xlane.f32.xlu0 %v1057_v60 }
 0x479   :  { %v3621_v5 = vpop.eup %3620 }
 0x47a   :  { %v1060_v37 = vsel %vm591_vm5, %v3621_v5, 0.0 }
 0x47b   :  { %1061 = vadd.xlane.f32.xlu1 %v1060_v37 }
 0x4e6   :  { %v1059_v61 = vpop.xlane.xlu0 %1058 }
 0x4e7   :  { %3622 = vrcp.f32 %v1059_v61 }
 0x4ed   :  { %v3623_v6 = vpop.eup %3622 }
 0x4ee   :  { %v1065_v3 = vmul.f32 %v3623_v6, %v3619_v45  ;;  %v1062_v12 = vpop.xlane.xlu1 %1061  ;;  %v1321_v6 = vld [vmem:[#allocation2 + $0x26] sm:$0x3] }
 0x4ef   :  { %3624 = vrcp.f32 %v1062_v12 }
 0x4f0   :  { %3355 = vmatmul.msk.f32.vlgmr.msra.gmra.mxu3 %vm229_vm3, %v1065_v3 }
 0x4f1   :  { %1338 = vmatpush.msra.mxu3 %v4236_v18 }
 0x4f3   :  { %1339 = vmatpush.msra.mxu3 %v4246_v20 }
 0x4f5   :  { %v3625_v43 = vpop.eup %3624  ;;  %1340 = vmatpush.msra.mxu3 %v4272_v26 }
 0x4f6   :  { %v1066_v46 = vmul.f32 %v3625_v43, %v3621_v5 }
 0x4f7   :  { %1341 = vmatpush.msra.mxu3 %v4290_v10 }
 0x4f8   :  { %v1069_v53 = vrot.slane %v1066_v46, 7  ;;  %3356 = vmatmul.msk.f32.vlgmr.msra.gmra.mxu0 %vm229_vm3, %v1066_v46 }
 0x4f9   :  { %1363 = vmatpush.msra.mxu0 %v4212_v63 }
 0x4fa   :  { %v1070_v15 = vsel %vm97_vm2, %v1069_v53, %v1065_v3 }
 0x4fb   :  { %v1072_v17 = vsel %vm229_vm3, %v1070_v15, 0.0  ;;  %1364 = vmatpush.msra.mxu0 %v4218_v0 }
 0x4fc   :  { %3354 = vst [vmem:[%s5085_s17 + $0x2] sm:$0x3] %v1072_v17 }
 0x4fd   :  { %1365 = vmatpush.msra.mxu0 %v4224_v1 }
 0x4ff   :  { %1366 = vmatpush.msra.mxu0 %v4230_v2 }
 0x500   :  { %3369 = vmatmul.msk.f32.vlgmr.msrb.gmra.mxu0 %vm59_vm0, %v4383_v16 }
 0x501   :  { %3398 = vmatpush.xpose.msk.msrb.mxu0 %vm59_vm0, %v4076_v28 }
 0x505   :  { %3399 = vmatpush.xpose.msk.msrb.mxu0 %vm59_vm0, %v4080_v29 }
 0x508   :  { %3390 = vmatmul.msk.f32.vlgmr.msra.gmra.mxu0 %vm59_vm0, %v4383_v16  ;;  %v5107_v16 = vld [vmem:[#allocation4_spill] sm:$0xff] }
 0x573   :  { %v1094_v9 = vpop.f32.mrf.mxu3 }
 0x575   :  { %v1116_v56 = vpop.f32.mrf.mxu0 }
 0x576   :  { %v1127_v22 = vrot.slane %v1116_v56, 7 }
 0x578   :  { %v1128_v38 = vsel %vm97_vm2, %v1127_v22, %v1094_v9  ;;  %v4491_v9 = vld [vmem:[%s5080_s10 + $0x18] sm:$0xff] }
 0x579   :  { %3357 = vmatmul.msk.f32.vlgmr.msrb.gmra.mxu1 %vm59_vm0, %v1128_v38  ;;  %3364 = vmatmul.msk.f32.vlgmr.msrb.gmra.mxu3 %vm59_vm0, %v1128_v38 }
 0x57a   :  { %3393 = vmatmul.msk.f32.vlgmr.msrb.gmra.mxu2 %vm59_vm0, %v1128_v38  ;;  %3395 = vmatpush.xpose.msk.msrb.mxu3 %vm59_vm0, %v4060_v24 }
 0x57b   :  { %1417 = vmatpush.msrb.mxu1 %v4347_v19  ;;  %1693 = vmatpush.msrb.mxu2 %v4140_v47  ;;  %v4475_v47 = vld [vmem:[%s5099_s19 + $0x8] sm:$0xff] }
 0x57c   :  { %1622 = vmatpush.msra.mxu0 %v4491_v9 }
 0x57d   :  { %1418 = vmatpush.msrb.mxu1 %v4353_v32  ;;  %1694 = vmatpush.msrb.mxu2 %v4145_v48  ;;  %v5108_v48 = vld [vmem:[#allocation5_spill] sm:$0xff]  ;;  %v1244_v44 = vpop.f32.mrf.mxu0 }
 0x57e   :  { %3396 = vmatpush.xpose.msk.msrb.mxu3 %vm59_vm0, %v4066_v25 }
 0x57f   :  { %1419 = vmatpush.msrb.mxu1 %v4359_v7  ;;  %1695 = vmatpush.msrb.mxu2 %v4151_v49  ;;  %v4482_v49 = vld [vmem:[%s5099_s19] sm:$0xff] }
 0x581   :  { %3375 = vmatmul.msk.f32.vlgmr.msra.gmra.mxu1 %vm59_vm0, %v1128_v38  ;;  %3385 = vmatmul.msk.f32.vlgmr.msra.gmra.mxu3 %vm59_vm0, %v1128_v38  ;;  %v4496_v38 = vld [vmem:[%s5080_s10 + $0x10] sm:$0xff] }
 0x582   :  { %1420 = vmatpush.msrb.mxu1 %v4365_v33  ;;  %1696 = vmatpush.msrb.mxu2 %v5107_v16 }
 0x583   :  { %1597 = vmatpush.msra.mxu3 %v5108_v48  ;;  %v1268_v48 = vld [vmem:[#allocation2 + $0x1a] sm:$0x3]  ;;  %1623 = vmatpush.msra.mxu0 %v4496_v38 }
 0x584   :  { %1545 = vmatpush.msra.mxu1 %v4475_v47 }
 0x585   :  { %1598 = vmatpush.msra.mxu3 %v5109_v62  ;;  %v1368_v43 = vpop.f32.mrf.mxu0 }
 0x586   :  { %1546 = vmatpush.msra.mxu1 %v4482_v49 }
 0x587   :  { %1599 = vmatpush.msra.mxu3 %v5110_v34  ;;  %v4502_v34 = vld [vmem:[%s5080_s10 + $0x8] sm:$0xff] }
 0x588   :  { %1624 = vmatpush.msra.mxu0 %v4502_v34 }
 0x589   :  { %1600 = vmatpush.msra.mxu3 %v5111_v4 }
 0x5f6   :  { %v1148_v36 = vpop.f32.mrf.mxu1 }
 0x5f7   :  { %v1151_v39 = vadd.f32 %v1148_v36, %v1120_v35  ;;  %v4508_v35 = vld [vmem:[%s5080_s10] sm:$0xff] }
 0x5f8   :  { %1625 = vmatpush.msra.mxu0 %v4508_v35 }
 0x5f9   :  { %v1176_v41 = vadd.f32 %v1173_v40, %v1151_v39  ;;  %v1315_v39 = vpop.f32.mrf.mxu2 }
 0x5fb   :  { %v3359_v42 = vmul.f32 -1.442695, %v1176_v41 }
 0x5fc   :  { %v1219_v45 = vpop.f32.mrf.mxu3 }
 0x5fd   :  { %3626 = vpow2.f32 %v3359_v42  ;;  %v1222_v59 = vadd.f32 %v1219_v45, %v1197_v21 }
 0x5fe   :  { %v1290_v56 = vpop.f32.mrf.mxu1 }
 0x5ff   :  { %v1247_v60 = vadd.f32 %v1244_v44, %v1222_v59  ;;  %v1293_v62 = vadd.f32 %v1290_v56, %v1268_v48 }
 0x601   :  { %v3370_v5 = vmul.f32 -1.442695, %v1247_v60  ;;  %v1318_v42 = vadd.f32 %v1315_v39, %v1293_v62 }
 0x603   :  { %v3627_v37 = vpop.eup %3626  ;;  %3628 = vpow2.f32 %v3370_v5 }
 0x604   :  { %v1180_v61 = vadd.f32 1.0, %v3627_v37  ;;  %v1343_v3 = vpop.f32.mrf.mxu3 }
 0x605   :  { %v1346_v12 = vadd.f32 %v1343_v3, %v1321_v6 }
 0x606   :  { %3630 = vrcp.f32 %v1180_v61  ;;  %v1192_v59 = vand.u32 2147483648, %v1180_v61  ;;  %vm1186_vm8 = vweird.f32 %v1180_v61  ;;  %v1190_v5 = vand.u32 2147483647, %v1180_v61 }
 0x607   :  { %v1371_v46 = vadd.f32 %v1368_v43, %v1346_v12 }
 0x608   :  { %v1193_v43 = vor.u32 1.1754944e-38, %v1192_v59  ;;  %vm1191_vm12 = vcmp.eq.f32.partialorder %v1190_v5, 8.507059e+37 }
 0x609   :  { %v3629_v53 = vpop.eup %3628  ;;  %v3391_v15 = vmul.f32 -1.442695, %v1371_v46 }
 0x60a   :  { %v1251_v17 = vadd.f32 1.0, %v3629_v53 }
 0x60b   :  { %3632 = vpow2.f32 %v3391_v15 }
 0x60c   :  { %v3631_v22 = vpop.eup %3630  ;;  %3634 = vrcp.f32 %v1251_v17  ;;  %v1263_v37 = vand.u32 2147483648, %v1251_v17  ;;  %v1261_v12 = vand.u32 2147483647, %v1251_v17  ;;  %vm1257_vm11 = vweird.f32 %v1251_v17 }
 0x60d   :  { %v1182_v16 = vmul.f32 %v3631_v22, %v1180_v61  ;;  %vm1187_vm7 = vweird.f32 %v3631_v22 }
 0x60e   :  { %vm1188_vm9 = vmor %vm1186_vm8, %vm1187_vm7  ;;  %v1264_v15 = vor.u32 1.1754944e-38, %v1263_v37  ;;  %vm1262_vm14 = vcmp.eq.f32.partialorder %v1261_v12, 8.507059e+37  ;;  %v4534_v37 = vld [vmem:[%s5080_s10 + $0x50] sm:$0xff] }
 0x60f   :  { %v1183_v4 = vsub.f32 1.0, %v1182_v16 }
 0x611   :  { %v3633_v36 = vpop.eup %3632  ;;  %v1184_v40 = vmul.f32 %v3631_v22, %v1183_v4 }
 0x612   :  { %v3635_v41 = vpop.eup %3634  ;;  %v1375_v44 = vadd.f32 1.0, %v3633_v36 }
 0x613   :  { %v1253_v21 = vmul.f32 %v3635_v41, %v1251_v17  ;;  %v1185_v45 = vadd.f32 %v3631_v22, %v1184_v40  ;;  %vm1258_vm10 = vweird.f32 %v3635_v41 }
 0x614   :  { %3636 = vrcp.f32 %v1375_v44  ;;  %vm1259_vm13 = vmor %vm1257_vm11, %vm1258_vm10  ;;  %vm1381_vm1 = vweird.f32 %v1375_v44 }
 0x615   :  { %v1254_v60 = vsub.f32 1.0, %v1253_v21  ;;  %3638 = vtanh.f32 %v1318_v42  ;;  %v1189_v3 = vsel %vm1188_vm9, %v3631_v22, %v1185_v45  ;;  %v1387_v42 = vand.u32 2147483648, %v1375_v44 }
 0x616   :  { %v1194_v56 = vsel %vm1191_vm12, %v1193_v43, %v1189_v3  ;;  %v1385_v21 = vand.u32 2147483647, %v1375_v44 }
 0x617   :  { %v1255_v6 = vmul.f32 %v3635_v41, %v1254_v60  ;;  %v1388_v45 = vor.u32 1.1754944e-38, %v1387_v42 }
 0x618   :  { %vm1386_vm7 = vcmp.eq.f32.partialorder %v1385_v21, 8.507059e+37 }
 0x619   :  { %v1256_v46 = vadd.f32 %v3635_v41, %v1255_v6  ;;  %v4541_v6 = vld [vmem:[%s5080_s10 + $0x48] sm:$0xff] }
 0x61a   :  { %v3637_v53 = vpop.eup %3636 }
 0x61b   :  { %v1260_v16 = vsel %vm1259_vm13, %v3635_v41, %v1256_v46  ;;  %v1377_v48 = vmul.f32 %v3637_v53, %v1375_v44  ;;  %v3639_v62 = vpop.eup %3638  ;;  %vm1382_vm15 = vweird.f32 %v3637_v53  ;;  %v4526_v44 = vld [vmem:[%s5080_s10 + $0x58] sm:$0xff] }
 0x61c   :  { %v1265_v61 = vsel %vm1262_vm14, %v1264_v15, %v1260_v16  ;;  %v1392_v36 = vmul.f32 %v3639_v62, %v1194_v56  ;;  %vm1383_vm6 = vmor %vm1381_vm1, %vm1382_vm15 }
 0x61d   :  { %v1391_v4 = vmul.f32 %v1265_v61, %v4380_v50  ;;  %v1378_v39 = vsub.f32 1.0, %v1377_v48 }
 0x61f   :  { %v4513_v40 = vadd.f32 %v1392_v36, %v1391_v4  ;;  %v1379_v22 = vmul.f32 %v3637_v53, %v1378_v39 }
 0x621   :  { %3640 = vtanh.f32 %v4513_v40  ;;  %v1380_v17 = vadd.f32 %v3637_v53, %v1379_v22 }
 0x623   :  { %v1384_v41 = vsel %vm1383_vm6, %v3637_v53, %v1380_v17 }
 0x624   :  { %v1389_v60 = vsel %vm1386_vm7, %v1388_v45, %v1384_v41 }
 0x627   :  { %v3641_v59 = vpop.eup %3640 }
 0x628   :  { %v4516_v5 = vmul.f32 %v3641_v59, %v1389_v60  ;;  %v1574_v59 = vld [vmem:[#allocation2 + $0x4] sm:$0x3] }
 0x62a   :  { %3392 = vmatmul.msk.f32.vlgmr.msrb.gmra.mxu1 %vm59_vm0, %v4516_v5  ;;  %3397 = vmatmul.msk.f32.vlgmr.msrb.gmra.mxu3 %vm59_vm0, %v4516_v5  ;;  %v1454_v50 = vrot.slane %v4516_v5, 1 }
 0x62b   :  { %1668 = vmatpush.msrb.mxu1 %v4164_v51  ;;  %1739 = vmatpush.msrb.mxu3 %v4303_v23  ;;  %v4549_v51 = vld [vmem:[%s5080_s10 + $0x40] sm:$0xff]  ;;  %v1447_v23 = vpop.f32.mrf.mxu2 }
 0x62c   :  { %3400 = vmatmul.msk.f32.vlgmr.msrb.gmra.mxu0 %vm59_vm0, %v1454_v50  ;;  %v1775_v50 = vld [vmem:[#allocation2 + $0x28] sm:$0x3] }
 0x62d   :  { %1764 = vmatpush.msrb.mxu0 %v4526_v44  ;;  %1669 = vmatpush.msrb.mxu1 %v4169_v52  ;;  %v1397_v52 = vld [vmem:[#allocation3 + $0x2] sm:$0x3] }
 0x62e   :  { %1740 = vmatpush.msrb.mxu3 %v4308_v27 }
 0x62f   :  { %1765 = vmatpush.msrb.mxu0 %v4534_v37  ;;  %1670 = vmatpush.msrb.mxu1 %v4180_v54 }
 0x630   :  { %1741 = vmatpush.msrb.mxu3 %v4317_v30 }
 0x631   :  { %1766 = vmatpush.msrb.mxu0 %v4541_v6  ;;  %1671 = vmatpush.msrb.mxu1 %v4203_v58 }
 0x632   :  { %1742 = vmatpush.msrb.mxu3 %v4322_v31 }
 0x633   :  { %1767 = vmatpush.msrb.mxu0 %v4549_v51 }
 0x634   :  { %3405 = vmatmul.msk.f32.vlgmr.msra.gmra.mxu0 %vm59_vm0, %v4516_v5 }
 0x635   :  { %1896 = vmatpush.msra.mxu0 %v4186_v55 }
 0x637   :  { %1897 = vmatpush.msra.mxu0 %v4198_v57 }
 0x639   :  { %1898 = vmatpush.msra.mxu0 %v4277_v8 }
 0x63b   :  { %1899 = vmatpush.msra.mxu0 %v4295_v11 }
 0x63c   :  { %3427 = vmatmul.msk.f32.vlgmr.msrb.gmra.mxu0 %vm59_vm0, %v4516_v5 }
 0x63d   :  { %2021 = vmatpush.msrb.mxu0 %v4414_v13 }
 0x63f   :  { %2022 = vmatpush.msrb.mxu0 %v4420_v14 }
 0x6a7   :  { %v1422_v54 = vpop.f32.mrf.mxu1 }
 0x6a8   :  { %v1425_v58 = vadd.f32 %v1422_v54, %v1397_v52 }
 0x6a9   :  { %v1494_v27 = vpop.f32.mrf.mxu0 }
 0x6aa   :  { %v1450_v30 = vadd.f32 %v1447_v23, %v1425_v58  ;;  %v1498_v55 = vmul.f32 0.17677669, %v1494_v27 }
 0x6ac   :  { %v1451_v31 = vmax.f32 %v1450_v30, 0.0  ;;  %v1502_v57 = vsel %vm591_vm5, %v1498_v55, -inf }
 0x6ad   :  { %v1472_v8 = vpop.f32.mrf.mxu3  ;;  %1503 = vmax.xlane.f32.xlu2 %v1502_v57 }
 0x6ae   :  { %3394 = vst.msk [vmem:[%s5087_s16 + $0x2] sm:$0x3] %vm267_vm4, %v1451_v31  ;;  %v1497_v11 = vmul.f32 0.17677669, %v1472_v8 }
 0x6b0   :  { %v1499_v3 = vsel %vm591_vm5, %v1497_v11, -inf }
 0x6b1   :  { %1500 = vmax.xlane.f32.xlu0 %v1499_v3 }
 0x720   :  { %v1504_v12 = vpop.xlane.xlu2 %1503 }
 0x721   :  { %v1506_v43 = vsub.f32 %v1498_v55, %v1504_v12 }
 0x723   :  { %v1509_v46 = vmul.f32 1.442695, %v1506_v43 }
 0x724   :  { %v1501_v53 = vpop.xlane.xlu0 %1500 }
 0x725   :  { %3642 = vpow2.f32 %v1509_v46  ;;  %v1505_v15 = vsub.f32 %v1497_v11, %v1501_v53  ;;  %v1722_v53 = vld [vmem:[#allocation2 + $0x1c] sm:$0x3] }
 0x727   :  { %v1507_v56 = vmul.f32 1.442695, %v1505_v15 }
 0x729   :  { %3644 = vpow2.f32 %v1507_v56 }
 0x72b   :  { %v3643_v16 = vpop.eup %3642 }
 0x72c   :  { %v1514_v48 = vsel %vm591_vm5, %v3643_v16, 0.0 }
 0x72d   :  { %1515 = vadd.xlane.f32.xlu1 %v1514_v48 }
 0x72f   :  { %v3645_v62 = vpop.eup %3644 }
 0x730   :  { %v1511_v61 = vsel %vm591_vm5, %v3645_v62, 0.0 }
 0x731   :  { %1512 = vadd.xlane.f32.xlu2 %v1511_v61 }
 0x7a0   :  { %v1516_v4 = vpop.xlane.xlu1 %1515 }
 0x7a1   :  { %3646 = vrcp.f32 %v1516_v4 }
 0x7a4   :  { %v1513_v36 = vpop.xlane.xlu2 %1512 }
 0x7a5   :  { %3648 = vrcp.f32 %v1513_v36 }
 0x7a7   :  { %v3647_v39 = vpop.eup %3646 }
 0x7a8   :  { %v1520_v22 = vmul.f32 %v3647_v39, %v3643_v16 }
 0x7aa   :  { %3403 = vmatmul.msk.f32.vlgmr.msra.gmra.mxu2 %vm229_vm3, %v1520_v22  ;;  %v1523_v42 = vrot.slane %v1520_v22, 7 }
 0x7ab   :  { %v3649_v17 = vpop.eup %3648  ;;  %1817 = vmatpush.msra.mxu2 %v4212_v63 }
 0x7ac   :  { %v1519_v21 = vmul.f32 %v3649_v17, %v3645_v62 }
 0x7ad   :  { %1818 = vmatpush.msra.mxu2 %v4218_v0 }
 0x7ae   :  { %v1524_v41 = vsel %vm97_vm2, %v1523_v42, %v1519_v21  ;;  %3402 = vmatmul.msk.f32.vlgmr.msra.gmra.mxu1 %vm229_vm3, %v1519_v21 }
 0x7af   :  { %v1526_v45 = vsel %vm229_vm3, %v1524_v41, 0.0  ;;  %1819 = vmatpush.msra.mxu2 %v4224_v1  ;;  %1792 = vmatpush.msra.mxu1 %v4236_v18 }
 0x7b0   :  { %3401 = vst [vmem:[%s5085_s17 + $0x4] sm:$0x3] %v1526_v45 }
 0x7b1   :  { %1820 = vmatpush.msra.mxu2 %v4230_v2  ;;  %1793 = vmatpush.msra.mxu1 %v4246_v20  ;;  %v1651_v20 = vld [vmem:[#allocation2 + $0x10] sm:$0x3] }
 0x7b2   :  { %3416 = vmatmul.msk.f32.vlgmr.msrb.gmra.mxu2 %vm59_vm0, %v4516_v5 }
 0x7b3   :  { %3445 = vmatpush.xpose.msk.msrb.mxu2 %vm59_vm0, %v4076_v28  ;;  %1794 = vmatpush.msra.mxu1 %v4272_v26 }
 0x7b5   :  { %1795 = vmatpush.msra.mxu1 %v4290_v10 }
 0x7b7   :  { %3446 = vmatpush.xpose.msk.msrb.mxu2 %vm59_vm0, %v4080_v29 }
 0x7ba   :  { %3437 = vmatmul.msk.f32.vlgmr.msra.gmra.mxu2 %vm59_vm0, %v4516_v5  ;;  %v1627_v5 = vpop.f32.mrf.mxu0 }
 0x7bb   :  { %2076 = vmatpush.msra.mxu2 %v4491_v9 }
 0x7bd   :  { %2077 = vmatpush.msra.mxu2 %v4496_v38 }
 0x7bf   :  { %2078 = vmatpush.msra.mxu2 %v4502_v34 }
 0x7c1   :  { %2079 = vmatpush.msra.mxu2 %v4508_v35 }
 0x7c2   :  { %v1769_v16 = vpop.f32.mrf.mxu0 }
 0x82b   :  { %v1548_v1 = vpop.f32.mrf.mxu1 }
 0x82d   :  { %v1570_v63 = vpop.f32.mrf.mxu2 }
 0x82e   :  { %v1581_v0 = vrot.slane %v1570_v63, 7 }
 0x830   :  { %v1582_v2 = vsel %vm97_vm2, %v1581_v0, %v1548_v1 }
 0x831   :  { %3404 = vmatmul.msk.f32.vlgmr.msra.gmra.mxu3 %vm59_vm0, %v1582_v2  ;;  %3411 = vmatmul.msk.f32.vlgmr.msrb.gmra.mxu1 %vm59_vm0, %v1582_v2 }
 0x832   :  { %3440 = vmatmul.msk.f32.vlgmr.msra.gmra.mxu0 %vm59_vm0, %v1582_v2  ;;  %3442 = vmatpush.xpose.msk.msrb.mxu1 %vm59_vm0, %v4060_v24 }
 0x833   :  { %1871 = vmatpush.msra.mxu3 %v4347_v19 }
 0x835   :  { %1872 = vmatpush.msra.mxu3 %v4353_v32  ;;  %v1698_v18 = vpop.f32.mrf.mxu2 }
 0x836   :  { %3443 = vmatpush.xpose.msk.msrb.mxu1 %vm59_vm0, %v4066_v25 }
 0x837   :  { %1873 = vmatpush.msra.mxu3 %v4359_v7 }
 0x839   :  { %3422 = vmatmul.msk.f32.vlgmr.msrb.gmra.mxu3 %vm59_vm0, %v1582_v2  ;;  %3432 = vmatmul.msk.f32.vlgmr.msra.gmra.mxu1 %vm59_vm0, %v1582_v2 }
 0x83a   :  { %1874 = vmatpush.msra.mxu3 %v4365_v33 }
 0x83c   :  { %1999 = vmatpush.msrb.mxu3 %v4475_v47 }
 0x83d   :  { %v1822_v33 = vpop.f32.mrf.mxu2 }
 0x83e   :  { %2000 = vmatpush.msrb.mxu3 %v4482_v49 }
 0x8ae   :  { %v1673_v26 = vpop.f32.mrf.mxu1 }
 0x8af   :  { %v1676_v10 = vadd.f32 %v1673_v26, %v1651_v20 }
 0x8b1   :  { %v1701_v19 = vadd.f32 %v1698_v18, %v1676_v10 }
 0x8b3   :  { %v3417_v32 = vmul.f32 -1.442695, %v1701_v19 }
 0x8b4   :  { %v1602_v60 = vpop.f32.mrf.mxu3 }
 0x8b5   :  { %3650 = vpow2.f32 %v3417_v32  ;;  %v1605_v7 = vadd.f32 %v1602_v60, %v1574_v59 }
 0x8b6   :  { %v1797_v52 = vpop.f32.mrf.mxu1 }
 0x8b7   :  { %v1630_v54 = vadd.f32 %v1627_v5, %v1605_v7  ;;  %v1800_v58 = vadd.f32 %v1797_v52, %v1775_v50 }
 0x8b9   :  { %v3406_v23 = vmul.f32 -1.442695, %v1630_v54  ;;  %v1825_v27 = vadd.f32 %v1822_v33, %v1800_v58 }
 0x8bb   :  { %v3651_v30 = vpop.eup %3650  ;;  %3652 = vpow2.f32 %v3406_v23  ;;  %v3438_v55 = vmul.f32 -1.442695, %v1825_v27 }
 0x8bc   :  { %v1705_v31 = vadd.f32 1.0, %v3651_v30  ;;  %v1744_v3 = vpop.f32.mrf.mxu3 }
 0x8bd   :  { %3654 = vpow2.f32 %v3438_v55  ;;  %v1747_v15 = vadd.f32 %v1744_v3, %v1722_v53 }
 0x8be   :  { %3656 = vrcp.f32 %v1705_v31  ;;  %v1717_v22 = vand.u32 2147483648, %v1705_v31  ;;  %vm1711_vm9 = vweird.f32 %v1705_v31  ;;  %v1715_v21 = vand.u32 2147483647, %v1705_v31 }
 0x8bf   :  { %v1772_v61 = vadd.f32 %v1769_v16, %v1747_v15 }
 0x8c0   :  { %v1718_v1 = vor.u32 1.1754944e-38, %v1717_v22  ;;  %vm1716_vm13 = vcmp.eq.f32.partialorder %v1715_v21, 8.507059e+37  ;;  %v4648_v21 = vld [vmem:[%s5080_s10 + $0x38] sm:$0xff] }
 0x8c1   :  { %v3653_v57 = vpop.eup %3652  ;;  %2147 = vmatpush.msra.mxu0 %v4648_v21 }
 0x8c2   :  { %v1634_v8 = vadd.f32 1.0, %v3653_v57 }
 0x8c3   :  { %v3655_v11 = vpop.eup %3654 }
 0x8c4   :  { %v3657_v12 = vpop.eup %3656  ;;  %3658 = vrcp.f32 %v1634_v8  ;;  %v1829_v43 = vadd.f32 1.0, %v3655_v11  ;;  %v1646_v41 = vand.u32 2147483648, %v1634_v8  ;;  %v1644_v63 = vand.u32 2147483647, %v1634_v8 }
 0x8c5   :  { %v1707_v46 = vmul.f32 %v3657_v12, %v1705_v31  ;;  %vm1712_vm8 = vweird.f32 %v3657_v12  ;;  %vm1640_vm12 = vweird.f32 %v1634_v8 }
 0x8c6   :  { %3660 = vrcp.f32 %v1829_v43  ;;  %vm1713_vm10 = vmor %vm1711_vm9, %vm1712_vm8  ;;  %v1647_v20 = vor.u32 1.1754944e-38, %v1646_v41  ;;  %vm1645_vm15 = vcmp.eq.f32.partialorder %v1644_v63, 8.507059e+37  ;;  %v1841_v52 = vand.u32 2147483648, %v1829_v43  ;;  %v4654_v41 = vld [vmem:[%s5080_s10 + $0x30] sm:$0xff]  ;;  %v4666_v63 = vld [vmem:[%s5080_s10 + $0x20] sm:$0xff] }
 0x8c7   :  { %v1708_v56 = vsub.f32 1.0, %v1707_v46  ;;  %3662 = vtanh.f32 %v1772_v61  ;;  %vm1835_vm6 = vweird.f32 %v1829_v43  ;;  %v1839_v54 = vand.u32 2147483647, %v1829_v43  ;;  %2148 = vmatpush.msra.mxu0 %v4654_v41 }
 0x8c8   :  { %v1842_v33 = vor.u32 1.1754944e-38, %v1841_v52  ;;  %v4715_v52 = vld [vmem:[%s5080_s10 + $0x78] sm:$0xff] }
 0x8c9   :  { %v1709_v48 = vmul.f32 %v3657_v12, %v1708_v56  ;;  %vm1840_vm8 = vcmp.eq.f32.partialorder %v1839_v54, 8.507059e+37 }
 0x8ca   :  { %v3659_v62 = vpop.eup %3658 }
 0x8cb   :  { %v1636_v4 = vmul.f32 %v3659_v62, %v1634_v8  ;;  %v1710_v36 = vadd.f32 %v3657_v12, %v1709_v48  ;;  %vm1641_vm11 = vweird.f32 %v3659_v62  ;;  %v1851_v8 = vld [vmem:[#allocation3 + $0x4] sm:$0x3] }
 0x8cc   :  { %v3661_v39 = vpop.eup %3660  ;;  %vm1642_vm14 = vmor %vm1640_vm12, %vm1641_vm11 }
 0x8cd   :  { %v1637_v17 = vsub.f32 1.0, %v1636_v4  ;;  %v1831_v42 = vmul.f32 %v3661_v39, %v1829_v43  ;;  %v1714_v0 = vsel %vm1713_vm10, %v3657_v12, %v1710_v36  ;;  %v3663_v19 = vpop.eup %3662  ;;  %vm1836_vm1 = vweird.f32 %v3661_v39  ;;  %v1901_v12 = vpop.f32.mrf.mxu0 }
 0x8ce   :  { %v1719_v26 = vsel %vm1716_vm13, %v1718_v1, %v1714_v0  ;;  %vm1837_vm7 = vmor %vm1835_vm6, %vm1836_vm1  ;;  %v4672_v1 = vld [vmem:[%s5083_s9 + $0x38] sm:$0xff] }
 0x8cf   :  { %v1638_v45 = vmul.f32 %v3659_v62, %v1637_v17  ;;  %v1832_v2 = vsub.f32 1.0, %v1831_v42  ;;  %v1845_v60 = vmul.f32 %v1719_v26, %v4513_v40  ;;  %v4694_v26 = vld [vmem:[%s5084_s13 + $0x18] sm:$0xff] }
 0x8d1   :  { %v1639_v18 = vadd.f32 %v3659_v62, %v1638_v45  ;;  %v1833_v32 = vmul.f32 %v3661_v39, %v1832_v2  ;;  %v4660_v45 = vld [vmem:[%s5080_s10 + $0x28] sm:$0xff]  ;;  %v4677_v2 = vld [vmem:[%s5083_s9 + $0x30] sm:$0xff] }
 0x8d2   :  { %2149 = vmatpush.msra.mxu0 %v4660_v45 }
 0x8d3   :  { %v1643_v10 = vsel %vm1642_vm14, %v3659_v62, %v1639_v18  ;;  %v1834_v50 = vadd.f32 %v3661_v39, %v1833_v32  ;;  %v4683_v18 = vld [vmem:[%s5083_s9 + $0x18] sm:$0xff] }
 0x8d4   :  { %v1648_v59 = vsel %vm1645_vm15, %v1647_v20, %v1643_v10  ;;  %2150 = vmatpush.msra.mxu0 %v4666_v63  ;;  %v4688_v20 = vld [vmem:[%s5083_s9 + $0x28] sm:$0xff]  ;;  %2051 = vmatpush.msra.mxu1 %v4683_v18  ;;  %v4701_v10 = vld [vmem:[%s5083_s9 + $0x20] sm:$0xff] }
 0x8d5   :  { %v1846_v7 = vmul.f32 %v3663_v19, %v1648_v59  ;;  %v1838_v58 = vsel %vm1837_vm7, %v3661_v39, %v1834_v50 }
 0x8d6   :  { %v1843_v27 = vsel %vm1840_vm8, %v1842_v33, %v1838_v58  ;;  %v4721_v58 = vld [vmem:[%s5080_s10 + $0x70] sm:$0xff] }
 0x8d7   :  { %v4618_v5 = vadd.f32 %v1846_v7, %v1845_v60  ;;  %v4707_v60 = vld [vmem:[%s5083_s9 + $0x78] sm:$0xff] }
 0x8d9   :  { %3664 = vtanh.f32 %v4618_v5 }
 0x8df   :  { %v3665_v23 = vpop.eup %3664 }
 0x8e0   :  { %v4621_v30 = vmul.f32 %v3665_v23, %v1843_v27  ;;  %v4728_v23 = vld [vmem:[%s5080_s10 + $0x68] sm:$0xff] }
 0x8e2   :  { %3439 = vmatmul.msk.f32.vlgmr.msra.gmra.mxu3 %vm59_vm0, %v4621_v30  ;;  %3444 = vmatmul.msk.f32.vlgmr.msrb.gmra.mxu1 %vm59_vm0, %v4621_v30  ;;  %v1908_v40 = vrot.slane %v4621_v30, 1 }
 0x8e3   :  { %2122 = vmatpush.msra.mxu3 %v4672_v1 }
 0x8e4   :  { %3447 = vmatmul.msk.f32.vlgmr.msrb.gmra.mxu2 %vm59_vm0, %v1908_v40  ;;  %v4738_v40 = vld [vmem:[%s5080_s10 + $0x60] sm:$0xff] }
 0x8e5   :  { %2218 = vmatpush.msrb.mxu2 %v4526_v44  ;;  %2123 = vmatpush.msra.mxu3 %v4677_v2 }
 0x8e7   :  { %2219 = vmatpush.msrb.mxu2 %v4534_v37  ;;  %2124 = vmatpush.msra.mxu3 %v4688_v20 }
 0x8e9   :  { %2220 = vmatpush.msrb.mxu2 %v4541_v6  ;;  %2125 = vmatpush.msra.mxu3 %v4701_v10 }
 0x8eb   :  { %2221 = vmatpush.msrb.mxu2 %v4549_v51 }
 0x8ec   :  { %3452 = vmatmul.msk.f32.vlgmr.msra.gmra.mxu2 %vm59_vm0, %v4621_v30 }
 0x8ed   :  { %2350 = vmatpush.msra.mxu2 %v4694_v26 }
 0x8f4   :  { %3474 = vmatmul.msk.f32.vlgmr.msrb.gmra.mxu2 %vm59_vm0, %v4621_v30 }
 0x95f   :  { %v1926_v55 = vpop.f32.mrf.mxu1 }
 0x960   :  { %v1951_v31 = vmul.f32 0.17677669, %v1926_v55  ;;  %v4757_v55 = vld [vmem:[%s5083_s9 + $0x10] sm:$0xff] }
 0x961   :  { %2052 = vmatpush.msra.mxu1 %v4757_v55 }
 0x962   :  { %v1953_v57 = vsel %vm591_vm5, %v1951_v31, -inf }
 0x963   :  { %1954 = vmax.xlane.f32.xlu0 %v1953_v57  ;;  %v4798_v57 = vld [vmem:[%s5083_s9 + $0x60] sm:$0xff] }
 0x965   :  { %v1876_v11 = vpop.f32.mrf.mxu3 }
 0x966   :  { %v1879_v3 = vadd.f32 %v1876_v11, %v1851_v8  ;;  %v4803_v8 = vld [vmem:[%s5084_s13] sm:$0xff]  ;;  %v4811_v11 = vld [vmem:[%s5083_s9 + $0x58] sm:$0xff] }
 0x967   :  { %v1948_v43 = vpop.f32.mrf.mxu2 }
 0x968   :  { %v1904_v46 = vadd.f32 %v1901_v12, %v1879_v3  ;;  %v1952_v53 = vmul.f32 0.17677669, %v1948_v43  ;;  %v4816_v3 = vld [vmem:[%s5083_s9 + $0x50] sm:$0xff]  ;;  %v4825_v12 = vld [vmem:[%s5083_s9 + $0x48] sm:$0xff]  ;;  %v4830_v43 = vld [vmem:[%s5083_s9 + $0x40] sm:$0xff] }
 0x96a   :  { %v1905_v15 = vmax.f32 %v1904_v46, 0.0  ;;  %v1956_v56 = vsel %vm591_vm5, %v1952_v53, -inf }
 0x96b   :  { %1957 = vmax.xlane.f32.xlu1 %v1956_v56 }
 0x96c   :  { %3441 = vst.msk [vmem:[%s5087_s16 + $0x4] sm:$0x3] %vm267_vm4, %v1905_v15 }
 0x9d6   :  { %v1955_v16 = vpop.xlane.xlu0 %1954 }
 0x9d7   :  { %v1959_v48 = vsub.f32 %v1951_v31, %v1955_v16  ;;  %v4762_v31 = vld [vmem:[%s5083_s9 + $0x70] sm:$0xff] }
 0x9d9   :  { %v1961_v62 = vmul.f32 1.442695, %v1959_v48  ;;  %v2081_v48 = vpop.f32.mrf.mxu2 }
 0x9db   :  { %3666 = vpow2.f32 %v1961_v62 }
 0x9de   :  { %v1958_v61 = vpop.xlane.xlu1 %1957 }
 0x9df   :  { %v1960_v4 = vsub.f32 %v1952_v53, %v1958_v61 }
 0x9e1   :  { %v3667_v36 = vpop.eup %3666  ;;  %v1963_v39 = vmul.f32 1.442695, %v1960_v4 }
 0x9e2   :  { %v1965_v22 = vsel %vm591_vm5, %v3667_v36, 0.0 }
 0x9e3   :  { %3668 = vpow2.f32 %v1963_v39  ;;  %1966 = vadd.xlane.f32.xlu2 %v1965_v22 }
 0x9e9   :  { %v3669_v17 = vpop.eup %3668 }
 0x9ea   :  { %v1968_v42 = vsel %vm591_vm5, %v3669_v17, 0.0 }
 0x9eb   :  { %1969 = vadd.xlane.f32.xlu0 %v1968_v42 }
 0xa56   :  { %v1967_v0 = vpop.xlane.xlu2 %1966 }
 0xa57   :  { %3670 = vrcp.f32 %v1967_v0 }
 0xa5d   :  { %v3671_v19 = vpop.eup %3670 }
 0xa5e   :  { %v1973_v32 = vmul.f32 %v3671_v19, %v3667_v36  ;;  %v1970_v59 = vpop.xlane.xlu0 %1969  ;;  %v2105_v36 = vld [vmem:[#allocation2 + $0x12] sm:$0x3] }
 0xa5f   :  { %3672 = vrcp.f32 %v1970_v59  ;;  %v4855_v19 = vld [vmem:[%s5086_s12 + $0x18] sm:$0xff]  ;;  %v2229_v59 = vld [vmem:[#allocation2 + $0x2a] sm:$0x3] }
 0xa60   :  { %3449 = vmatmul.msk.f32.vlgmr.msrb.gmra.mxu3 %vm229_vm3, %v1973_v32 }
 0xa61   :  { %2246 = vmatpush.msrb.mxu3 %v4707_v60 }
 0xa63   :  { %2247 = vmatpush.msrb.mxu3 %v4762_v31 }
 0xa65   :  { %v3673_v7 = vpop.eup %3672 }
 0xa66   :  { %v1974_v50 = vmul.f32 %v3673_v7, %v3669_v17 }
 0xa68   :  { %v1977_v54 = vrot.slane %v1974_v50, 7  ;;  %3450 = vmatmul.msk.f32.vlgmr.msrb.gmra.mxu0 %vm229_vm3, %v1974_v50 }
 0xa69   :  { %2271 = vmatpush.msrb.mxu0 %v4715_v52 }
 0xa6a   :  { %v1978_v33 = vsel %vm97_vm2, %v1977_v54, %v1973_v32  ;;  %v4861_v54 = vld [vmem:[%s5086_s12 + $0x10] sm:$0xff] }
 0xa6b   :  { %v1980_v27 = vsel %vm229_vm3, %v1978_v33, 0.0  ;;  %2272 = vmatpush.msrb.mxu0 %v4721_v58 }
 0xa6c   :  { %3448 = vst [vmem:[%s5085_s17 + $0x6] sm:$0x3] %v1980_v27 }
 0xa6d   :  { %2273 = vmatpush.msrb.mxu0 %v4728_v23 }
 0xa6f   :  { %2274 = vmatpush.msrb.mxu0 %v4738_v40 }
 0xa70   :  { %3463 = vmatmul.msk.f32.vlgmr.msra.gmra.mxu0 %vm59_vm0, %v4621_v30 }
 0xa71   :  { %3492 = vmatpush.xpose.msk.msra.mxu0 %vm59_vm0, %v4076_v28 }
 0xa75   :  { %3493 = vmatpush.xpose.msk.msra.mxu0 %vm59_vm0, %v4080_v29 }
 0xa78   :  { %3484 = vmatmul.msk.f32.vlgmr.msrb.gmra.mxu0 %vm59_vm0, %v4621_v30  ;;  %v4793_v30 = vld [vmem:[%s5083_s9] sm:$0xff] }
 0xa79   :  { %2530 = vmatpush.msrb.mxu0 %v4491_v9  ;;  %v4767_v9 = vld [vmem:[%s5084_s13 + $0x10] sm:$0xff]  ;;  %5112 = vst [vmem:[#allocation4_spill] sm:$0xff] %v4793_v30 }
 0xa7a   :  { %2351 = vmatpush.msra.mxu2 %v4767_v9 }
 0xa7b   :  { %2531 = vmatpush.msrb.mxu0 %v4496_v38  ;;  %v4775_v38 = vld [vmem:[%s5083_s9 + $0x8] sm:$0xff] }
 0xa7c   :  { %2053 = vmatpush.msra.mxu1 %v4775_v38 }
 0xa7d   :  { %2532 = vmatpush.msrb.mxu0 %v4502_v34  ;;  %v4780_v34 = vld [vmem:[%s5083_s9 + $0x68] sm:$0xff] }
 0xa7e   :  { %2248 = vmatpush.msrb.mxu3 %v4780_v34  ;;  %2054 = vmatpush.msra.mxu1 %v4793_v30 }
 0xa7f   :  { %2533 = vmatpush.msrb.mxu0 %v4508_v35  ;;  %v4785_v35 = vld [vmem:[%s5084_s13 + $0x8] sm:$0xff] }
 0xa80   :  { %2352 = vmatpush.msra.mxu2 %v4785_v35  ;;  %2249 = vmatpush.msrb.mxu3 %v4798_v57 }
 0xa81   :  { %2193 = vmatpush.msrb.mxu1 %v4811_v11 }
 0xa82   :  { %2353 = vmatpush.msra.mxu2 %v4803_v8 }
 0xa83   :  { %2194 = vmatpush.msrb.mxu1 %v4816_v3 }
 0xa84   :  { %2475 = vmatpush.msrb.mxu2 %v4414_v13 }
 0xa85   :  { %2195 = vmatpush.msrb.mxu1 %v4825_v12 }
 0xa86   :  { %2476 = vmatpush.msrb.mxu2 %v4420_v14  ;;  %v2028_v14 = vld [vmem:[#allocation2 + $0x6] sm:$0x3] }
 0xa87   :  { %2196 = vmatpush.msrb.mxu1 %v4830_v43 }
 0xae3   :  { %v2002_v53 = vpop.f32.mrf.mxu3 }
 0xae5   :  { %v2024_v46 = vpop.f32.mrf.mxu0 }
 0xae6   :  { %v2035_v13 = vrot.slane %v2024_v46, 7  ;;  %v4867_v46 = vld [vmem:[%s5086_s12 + $0x8] sm:$0xff] }
 0xae8   :  { %v2036_v15 = vsel %vm97_vm2, %v2035_v13, %v2002_v53  ;;  %v4873_v13 = vld [vmem:[%s5086_s12] sm:$0xff] }
 0xae9   :  { %3451 = vmatmul.msk.f32.vlgmr.msra.gmra.mxu1 %vm59_vm0, %v2036_v15  ;;  %3458 = vmatmul.msk.f32.vlgmr.msra.gmra.mxu3 %vm59_vm0, %v2036_v15 }
 0xaea   :  { %3487 = vmatmul.msk.f32.vlgmr.msra.gmra.mxu2 %vm59_vm0, %v2036_v15  ;;  %3489 = vmatpush.xpose.msk.msra.mxu3 %vm59_vm0, %v4060_v24 }
 0xaeb   :  { %2601 = vmatpush.msra.mxu2 %v4648_v21  ;;  %2325 = vmatpush.msra.mxu1 %v4855_v19 }
 0xaed   :  { %2602 = vmatpush.msra.mxu2 %v4654_v41  ;;  %v2152_v4 = vpop.f32.mrf.mxu0  ;;  %2326 = vmatpush.msra.mxu1 %v4861_v54 }
 0xaee   :  { %3490 = vmatpush.xpose.msk.msra.mxu3 %vm59_vm0, %v4066_v25 }
 0xaef   :  { %2603 = vmatpush.msra.mxu2 %v4660_v45  ;;  %2327 = vmatpush.msra.mxu1 %v4867_v46 }
 0xaf1   :  { %3469 = vmatmul.msk.f32.vlgmr.msrb.gmra.mxu1 %vm59_vm0, %v2036_v15  ;;  %3479 = vmatmul.msk.f32.vlgmr.msrb.gmra.mxu3 %vm59_vm0, %v2036_v15 }
 0xaf2   :  { %2604 = vmatpush.msra.mxu2 %v4666_v63  ;;  %2505 = vmatpush.msrb.mxu3 %v4683_v18 }
 0xaf3   :  { %2328 = vmatpush.msra.mxu1 %v4873_v13 }
 0xaf4   :  { %2506 = vmatpush.msrb.mxu3 %v4757_v55 }
 0xaf5   :  { %v2276_v33 = vpop.f32.mrf.mxu0  ;;  %2453 = vmatpush.msrb.mxu1 %v4475_v47 }
 0xaf6   :  { %2507 = vmatpush.msrb.mxu3 %v4775_v38 }
 0xaf7   :  { %2454 = vmatpush.msrb.mxu1 %v4482_v49 }
 0xaf8   :  { %2508 = vmatpush.msrb.mxu3 %v4793_v30 }
 0xb66   :  { %v2056_v56 = vpop.f32.mrf.mxu1 }
 0xb67   :  { %v2059_v16 = vadd.f32 %v2056_v56, %v2028_v14 }
 0xb69   :  { %v2084_v62 = vadd.f32 %v2081_v48, %v2059_v16 }
 0xb6b   :  { %v3453_v61 = vmul.f32 -1.442695, %v2084_v62  ;;  %v2176_v62 = vld [vmem:[#allocation2 + $0x1e] sm:$0x3] }
 0xb6c   :  { %v2127_v39 = vpop.f32.mrf.mxu3 }
 0xb6d   :  { %3674 = vpow2.f32 %v3453_v61  ;;  %v2130_v22 = vadd.f32 %v2127_v39, %v2105_v36  ;;  %v2223_v39 = vpop.f32.mrf.mxu2 }
 0xb6e   :  { %v2198_v56 = vpop.f32.mrf.mxu1 }
 0xb6f   :  { %v2155_v17 = vadd.f32 %v2152_v4, %v2130_v22  ;;  %v2201_v61 = vadd.f32 %v2198_v56, %v2176_v62 }
 0xb71   :  { %v3464_v42 = vmul.f32 -1.442695, %v2155_v17 }
 0xb73   :  { %v3675_v0 = vpop.eup %3674  ;;  %3676 = vpow2.f32 %v3464_v42  ;;  %v2226_v42 = vadd.f32 %v2223_v39, %v2201_v61 }
 0xb74   :  { %v2088_v32 = vadd.f32 1.0, %v3675_v0  ;;  %v2251_v7 = vpop.f32.mrf.mxu3 }
 0xb75   :  { %v2254_v50 = vadd.f32 %v2251_v7, %v2229_v59 }
 0xb76   :  { %3678 = vrcp.f32 %v2088_v32  ;;  %vm2094_vm10 = vweird.f32 %v2088_v32 }
 0xb77   :  { %v2279_v27 = vadd.f32 %v2276_v33, %v2254_v50  ;;  %v2100_v50 = vand.u32 2147483648, %v2088_v32  ;;  %v2098_v33 = vand.u32 2147483647, %v2088_v32 }
 0xb79   :  { %v3677_v53 = vpop.eup %3676  ;;  %v3485_v15 = vmul.f32 -1.442695, %v2279_v27  ;;  %v2101_v56 = vor.u32 1.1754944e-38, %v2100_v50  ;;  %vm2099_vm14 = vcmp.eq.f32.partialorder %v2098_v33, 8.507059e+37 }
 0xb7a   :  { %v2159_v14 = vadd.f32 1.0, %v3677_v53 }
 0xb7b   :  { %3680 = vpow2.f32 %v3485_v15 }
 0xb7c   :  { %v3679_v16 = vpop.eup %3678  ;;  %3682 = vrcp.f32 %v2159_v14  ;;  %v2171_v27 = vand.u32 2147483648, %v2159_v14  ;;  %v2169_v15 = vand.u32 2147483647, %v2159_v14  ;;  %vm2165_vm13 = vweird.f32 %v2159_v14 }
 0xb7d   :  { %v2090_v48 = vmul.f32 %v3679_v16, %v2088_v32  ;;  %vm2095_vm9 = vweird.f32 %v3679_v16 }
 0xb7e   :  { %vm2096_vm11 = vmor %vm2094_vm10, %vm2095_vm9  ;;  %v2172_v61 = vor.u32 1.1754944e-38, %v2171_v27  ;;  %vm2170_vm1 = vcmp.eq.f32.partialorder %v2169_v15, 8.507059e+37  ;;  %v2355_v15 = vpop.f32.mrf.mxu2 }
 0xb7f   :  { %v2091_v4 = vsub.f32 1.0, %v2090_v48 }
 0xb81   :  { %v3681_v36 = vpop.eup %3680  ;;  %v2092_v22 = vmul.f32 %v3679_v16, %v2091_v4 }
 0xb82   :  { %v3683_v17 = vpop.eup %3682  ;;  %v2283_v0 = vadd.f32 1.0, %v3681_v36 }
 0xb83   :  { %v2161_v59 = vmul.f32 %v3683_v17, %v2159_v14  ;;  %v2093_v7 = vadd.f32 %v3679_v16, %v2092_v22  ;;  %vm2166_vm12 = vweird.f32 %v3683_v17 }
 0xb84   :  { %3684 = vrcp.f32 %v2283_v0  ;;  %vm2167_vm15 = vmor %vm2165_vm13, %vm2166_vm12  ;;  %vm2289_vm7 = vweird.f32 %v2283_v0  ;;  %v2293_v50 = vand.u32 2147483647, %v2283_v0 }
 0xb85   :  { %v2162_v47 = vsub.f32 1.0, %v2161_v59  ;;  %3686 = vtanh.f32 %v2226_v42  ;;  %v2097_v53 = vsel %vm2096_vm11, %v3679_v16, %v2093_v7  ;;  %v2295_v7 = vand.u32 2147483648, %v2283_v0 }
 0xb86   :  { %v2102_v4 = vsel %vm2099_vm14, %v2101_v56, %v2097_v53  ;;  %vm2294_vm9 = vcmp.eq.f32.partialorder %v2293_v50, 8.507059e+37 }
 0xb87   :  { %v2163_v49 = vmul.f32 %v3683_v17, %v2162_v47  ;;  %v2296_v33 = vor.u32 1.1754944e-38, %v2295_v7 }
 0xb89   :  { %v2164_v48 = vadd.f32 %v3683_v17, %v2163_v49 }
 0xb8a   :  { %v3685_v62 = vpop.eup %3684 }
 0xb8b   :  { %v2168_v36 = vsel %vm2167_vm15, %v3683_v17, %v2164_v48  ;;  %v2285_v39 = vmul.f32 %v3685_v62, %v2283_v0  ;;  %v3687_v22 = vpop.eup %3686  ;;  %vm2290_vm6 = vweird.f32 %v3685_v62 }
 0xb8c   :  { %v2173_v32 = vsel %vm2170_vm1, %v2172_v61, %v2168_v36  ;;  %v2300_v42 = vmul.f32 %v3687_v22, %v2102_v4  ;;  %vm2291_vm8 = vmor %vm2289_vm7, %vm2290_vm6 }
 0xb8d   :  { %v2299_v59 = vmul.f32 %v2173_v32, %v4618_v5  ;;  %v2286_v47 = vsub.f32 1.0, %v2285_v39 }
 0xb8f   :  { %v4879_v30 = vadd.f32 %v2300_v42, %v2299_v59  ;;  %v2287_v16 = vmul.f32 %v3685_v62, %v2286_v47 }
 0xb91   :  { %3688 = vtanh.f32 %v4879_v30  ;;  %v2288_v14 = vadd.f32 %v3685_v62, %v2287_v16 }
 0xb93   :  { %v2292_v17 = vsel %vm2291_vm8, %v3685_v62, %v2288_v14 }
 0xb94   :  { %v2297_v49 = vsel %vm2294_vm9, %v2296_v33, %v2292_v17 }
 0xb97   :  { %v3689_v27 = vpop.eup %3688 }
 0xb98   :  { %v4882_v53 = vmul.f32 %v3689_v27, %v2297_v49 }
 0xb9a   :  { %3486 = vmatmul.msk.f32.vlgmr.msra.gmra.mxu1 %vm59_vm0, %v4882_v53  ;;  %3491 = vmatmul.msk.f32.vlgmr.msra.gmra.mxu3 %vm59_vm0, %v4882_v53  ;;  %v2362_v5 = vrot.slane %v4882_v53, 1 }
 0xb9b   :  { %2576 = vmatpush.msra.mxu1 %v4672_v1  ;;  %2647 = vmatpush.msra.mxu3 %v4811_v11 }
 0xb9c   :  { %3494 = vmatmul.msk.f32.vlgmr.msra.gmra.mxu0 %vm59_vm0, %v2362_v5 }
 0xb9d   :  { %2672 = vmatpush.msra.mxu0 %v4526_v44  ;;  %2577 = vmatpush.msra.mxu1 %v4677_v2  ;;  %v3742_v44 = vld [vmem:[%s5099_s19 + $0x18] sm:$0xff] }
 0xb9e   :  { %2648 = vmatpush.msra.mxu3 %v4816_v3 }
 0xb9f   :  { %2673 = vmatpush.msra.mxu0 %v4534_v37  ;;  %2578 = vmatpush.msra.mxu1 %v4688_v20  ;;  %v3743_v37 = vld [vmem:[%s5099_s19 + $0x10] sm:$0xff] }
 0xba0   :  { %2649 = vmatpush.msra.mxu3 %v4825_v12 }
 0xba1   :  { %2674 = vmatpush.msra.mxu0 %v4541_v6  ;;  %2579 = vmatpush.msra.mxu1 %v4701_v10  ;;  %v2305_v6 = vld [vmem:[#allocation3 + $0x6] sm:$0x3] }
 0xba2   :  { %2650 = vmatpush.msra.mxu3 %v4830_v43 }
 0xba3   :  { %2675 = vmatpush.msra.mxu0 %v4549_v51 }
 0xba4   :  { %3499 = vmatmul.msk.f32.vlgmr.msrb.gmra.mxu0 %vm59_vm0, %v4882_v53 }
 0xba5   :  { %2804 = vmatpush.msrb.mxu0 %v4694_v26 }
 0xba7   :  { %2805 = vmatpush.msrb.mxu0 %v4767_v9 }
 0xba9   :  { %2806 = vmatpush.msrb.mxu0 %v4785_v35 }
 0xbab   :  { %2807 = vmatpush.msrb.mxu0 %v4803_v8 }
 0xbac   :  { %3521 = vmatmul.msk.f32.vlgmr.msra.gmra.mxu0 %vm59_vm0, %v4882_v53 }
 0xbad   :  { %2929 = vmatpush.msra.mxu0 %v3742_v44 }
 0xbaf   :  { %2930 = vmatpush.msra.mxu0 %v3743_v37 }
 0xc17   :  { %v2330_v51 = vpop.f32.mrf.mxu1 }
 0xc18   :  { %v2333_v0 = vadd.f32 %v2330_v51, %v2305_v6 }
 0xc19   :  { %v2402_v56 = vpop.f32.mrf.mxu0 }
 0xc1a   :  { %v2358_v48 = vadd.f32 %v2355_v15, %v2333_v0  ;;  %v2406_v62 = vmul.f32 0.17677669, %v2402_v56 }
 0xc1c   :  { %v2359_v61 = vmax.f32 %v2358_v48, 0.0  ;;  %v2410_v4 = vsel %vm591_vm5, %v2406_v62, -inf }
 0xc1d   :  { %v2380_v36 = vpop.f32.mrf.mxu3  ;;  %2411 = vmax.xlane.f32.xlu1 %v2410_v4  ;;  %v2482_v4 = vld [vmem:[#allocation2 + $0x8] sm:$0x3] }
 0xc1e   :  { %3488 = vst.msk [vmem:[%s5087_s16 + $0x6] sm:$0x3] %vm267_vm4, %v2359_v61  ;;  %v2405_v39 = vmul.f32 0.17677669, %v2380_v36 }
 0xc20   :  { %v2407_v22 = vsel %vm591_vm5, %v2405_v39, -inf }
 0xc21   :  { %2408 = vmax.xlane.f32.xlu2 %v2407_v22  ;;  %v2683_v22 = vld [vmem:[#allocation2 + $0x2c] sm:$0x3] }
 0xc90   :  { %v2412_v32 = vpop.xlane.xlu1 %2411 }
 0xc91   :  { %v2414_v59 = vsub.f32 %v2406_v62, %v2412_v32 }
 0xc93   :  { %v2417_v42 = vmul.f32 1.442695, %v2414_v59 }
 0xc94   :  { %v2409_v47 = vpop.xlane.xlu2 %2408 }
 0xc95   :  { %3690 = vpow2.f32 %v2417_v42  ;;  %v2413_v16 = vsub.f32 %v2405_v39, %v2409_v47  ;;  %v2535_v39 = vpop.f32.mrf.mxu0 }
 0xc97   :  { %v2415_v14 = vmul.f32 1.442695, %v2413_v16 }
 0xc99   :  { %3692 = vpow2.f32 %v2415_v14 }
 0xc9b   :  { %v3691_v7 = vpop.eup %3690 }
 0xc9c   :  { %v2422_v50 = vsel %vm591_vm5, %v3691_v7, 0.0 }
 0xc9d   :  { %2423 = vadd.xlane.f32.xlu0 %v2422_v50 }
 0xc9f   :  { %v3693_v17 = vpop.eup %3692 }
 0xca0   :  { %v2419_v33 = vsel %vm591_vm5, %v3693_v17, 0.0 }
 0xca1   :  { %2420 = vadd.xlane.f32.xlu1 %v2419_v33 }
 0xd10   :  { %v2424_v27 = vpop.xlane.xlu0 %2423 }
 0xd11   :  { %3694 = vrcp.f32 %v2424_v27 }
 0xd14   :  { %v2421_v49 = vpop.xlane.xlu1 %2420 }
 0xd15   :  { %3696 = vrcp.f32 %v2421_v49 }
 0xd17   :  { %v3695_v5 = vpop.eup %3694 }
 0xd18   :  { %v2428_v44 = vmul.f32 %v3695_v5, %v3691_v7 }
 0xd1a   :  { %3497 = vmatmul.msk.f32.vlgmr.msrb.gmra.mxu2 %vm229_vm3, %v2428_v44  ;;  %v2431_v6 = vrot.slane %v2428_v44, 7  ;;  %v2971_v44 = vld [vmem:[%s5080_s10 + $0x18] sm:$0xff] }
 0xd1b   :  { %v3697_v37 = vpop.eup %3696  ;;  %2725 = vmatpush.msrb.mxu2 %v4715_v52 }
 0xd1c   :  { %v2427_v51 = vmul.f32 %v3697_v37, %v3693_v17  ;;  %v2970_v37 = vld [vmem:[%s5080_s10 + $0x10] sm:$0xff] }
 0xd1d   :  { %2726 = vmatpush.msrb.mxu2 %v4721_v58 }
 0xd1e   :  { %v2432_v0 = vsel %vm97_vm2, %v2431_v6, %v2427_v51  ;;  %3496 = vmatmul.msk.f32.vlgmr.msrb.gmra.mxu1 %vm229_vm3, %v2427_v51  ;;  %v2630_v51 = vld [vmem:[#allocation2 + $0x20] sm:$0x3] }
 0xd1f   :  { %v2434_v15 = vsel %vm229_vm3, %v2432_v0, 0.0  ;;  %2727 = vmatpush.msrb.mxu2 %v4728_v23  ;;  %2700 = vmatpush.msrb.mxu1 %v4707_v60 }
 0xd20   :  { %3495 = vst [vmem:[%s5085_s17 + $0x8] sm:$0x3] %v2434_v15  ;;  %v2969_v15 = vld [vmem:[%s5080_s10 + $0x8] sm:$0xff] }
 0xd21   :  { %2728 = vmatpush.msrb.mxu2 %v4738_v40  ;;  %2701 = vmatpush.msrb.mxu1 %v4762_v31 }
 0xd22   :  { %3510 = vmatmul.msk.f32.vlgmr.msra.gmra.mxu2 %vm59_vm0, %v4882_v53 }
 0xd23   :  { %3539 = vmatpush.xpose.msk.msra.mxu2 %vm59_vm0, %v4076_v28  ;;  %2702 = vmatpush.msrb.mxu1 %v4780_v34  ;;  %v5113_v28 = vld [vmem:[#allocation4_spill] sm:$0xff] }
 0xd25   :  { %2703 = vmatpush.msrb.mxu1 %v4798_v57 }
 0xd27   :  { %3540 = vmatpush.xpose.msk.msra.mxu2 %vm59_vm0, %v4080_v29 }
 0xd2a   :  { %3531 = vmatmul.msk.f32.vlgmr.msrb.gmra.mxu2 %vm59_vm0, %v4882_v53 }
 0xd2b   :  { %2984 = vmatpush.msrb.mxu2 %v2971_v44 }
 0xd2d   :  { %2985 = vmatpush.msrb.mxu2 %v2970_v37 }
 0xd2f   :  { %2986 = vmatpush.msrb.mxu2 %v2969_v15  ;;  %v3566_v15 = vld [vmem:[%s5080_s10 + $0x50] sm:$0xff] }
 0xd9b   :  { %v2456_v62 = vpop.f32.mrf.mxu1 }
 0xd9d   :  { %v2478_v56 = vpop.f32.mrf.mxu2 }
 0xd9e   :  { %v2489_v48 = vrot.slane %v2478_v56, 7 }
 0xda0   :  { %v2490_v61 = vsel %vm97_vm2, %v2489_v48, %v2456_v62  ;;  %v2968_v48 = vld [vmem:[%s5080_s10] sm:$0xff]  ;;  %v2677_v62 = vpop.f32.mrf.mxu0 }
 0xda1   :  { %3498 = vmatmul.msk.f32.vlgmr.msrb.gmra.mxu3 %vm59_vm0, %v2490_v61  ;;  %3505 = vmatmul.msk.f32.vlgmr.msra.gmra.mxu1 %vm59_vm0, %v2490_v61 }
 0xda2   :  { %3534 = vmatmul.msk.f32.vlgmr.msrb.gmra.mxu0 %vm59_vm0, %v2490_v61  ;;  %3536 = vmatpush.xpose.msk.msra.mxu1 %vm59_vm0, %v4060_v24  ;;  %v3744_v24 = vld [vmem:[%s5099_s19 + $0x8] sm:$0xff] }
 0xda3   :  { %2779 = vmatpush.msrb.mxu3 %v4855_v19  ;;  %3055 = vmatpush.msrb.mxu0 %v4648_v21  ;;  %v2559_v21 = vld [vmem:[#allocation2 + $0x14] sm:$0x3] }
 0xda4   :  { %2987 = vmatpush.msrb.mxu2 %v2968_v48 }
 0xda5   :  { %2780 = vmatpush.msrb.mxu3 %v4861_v54  ;;  %3056 = vmatpush.msrb.mxu0 %v4654_v41  ;;  %v2606_v29 = vpop.f32.mrf.mxu2 }
 0xda6   :  { %3537 = vmatpush.xpose.msk.msra.mxu1 %vm59_vm0, %v4066_v25  ;;  %v3745_v25 = vld [vmem:[%s5099_s19] sm:$0xff] }
 0xda7   :  { %2781 = vmatpush.msrb.mxu3 %v4867_v46  ;;  %3057 = vmatpush.msrb.mxu0 %v4660_v45 }
 0xda9   :  { %3516 = vmatmul.msk.f32.vlgmr.msra.gmra.mxu3 %vm59_vm0, %v2490_v61  ;;  %3526 = vmatmul.msk.f32.vlgmr.msrb.gmra.mxu1 %vm59_vm0, %v2490_v61 }
 0xdaa   :  { %2782 = vmatpush.msrb.mxu3 %v4873_v13  ;;  %3058 = vmatpush.msrb.mxu0 %v4666_v63 }
 0xdab   :  { %2959 = vmatpush.msrb.mxu1 %v4683_v18 }
 0xdac   :  { %2907 = vmatpush.msra.mxu3 %v3744_v24 }
 0xdad   :  { %2960 = vmatpush.msrb.mxu1 %v4757_v55  ;;  %v2730_v55 = vpop.f32.mrf.mxu2 }
 0xdae   :  { %2908 = vmatpush.msra.mxu3 %v3745_v25 }
 0xdaf   :  { %2961 = vmatpush.msrb.mxu1 %v4775_v38 }
 0xdb1   :  { %2962 = vmatpush.msrb.mxu1 %v5113_v28 }
 0xe1e   :  { %v2581_v41 = vpop.f32.mrf.mxu1 }
 0xe1f   :  { %v2584_v45 = vadd.f32 %v2581_v41, %v2559_v21 }
 0xe21   :  { %v2609_v63 = vadd.f32 %v2606_v29, %v2584_v45 }
 0xe23   :  { %v3511_v53 = vmul.f32 -1.442695, %v2609_v63 }
 0xe24   :  { %v2510_v36 = vpop.f32.mrf.mxu3 }
 0xe25   :  { %3698 = vpow2.f32 %v3511_v53  ;;  %v2513_v18 = vadd.f32 %v2510_v36, %v2482_v4 }
 0xe26   :  { %v2705_v32 = vpop.f32.mrf.mxu1 }
 0xe27   :  { %v2538_v59 = vadd.f32 %v2535_v39, %v2513_v18  ;;  %v2708_v42 = vadd.f32 %v2705_v32, %v2683_v22 }
 0xe29   :  { %v3500_v47 = vmul.f32 -1.442695, %v2538_v59  ;;  %v2733_v38 = vadd.f32 %v2730_v55, %v2708_v42 }
 0xe2b   :  { %v3699_v16 = vpop.eup %3698  ;;  %3700 = vpow2.f32 %v3500_v47  ;;  %v3532_v14 = vmul.f32 -1.442695, %v2733_v38 }
 0xe2c   :  { %v2613_v7 = vadd.f32 1.0, %v3699_v16  ;;  %v2652_v27 = vpop.f32.mrf.mxu3 }
 0xe2d   :  { %3702 = vpow2.f32 %v3532_v14  ;;  %v2655_v0 = vadd.f32 %v2652_v27, %v2630_v51 }
 0xe2e   :  { %3704 = vrcp.f32 %v2613_v7  ;;  %v2625_v41 = vand.u32 2147483648, %v2613_v7  ;;  %vm2619_vm11 = vweird.f32 %v2613_v7  ;;  %v2623_v53 = vand.u32 2147483647, %v2613_v7 }
 0xe2f   :  { %v2680_v25 = vadd.f32 %v2677_v62, %v2655_v0 }
 0xe30   :  { %v2626_v22 = vor.u32 1.1754944e-38, %v2625_v41  ;;  %vm2624_vm15 = vcmp.eq.f32.partialorder %v2623_v53, 8.507059e+37 }
 0xe31   :  { %v3701_v50 = vpop.eup %3700 }
 0xe32   :  { %v2542_v17 = vadd.f32 1.0, %v3701_v50 }
 0xe33   :  { %v3703_v33 = vpop.eup %3702 }
 0xe34   :  { %v3705_v49 = vpop.eup %3704  ;;  %3706 = vrcp.f32 %v2542_v17  ;;  %v2737_v5 = vadd.f32 1.0, %v3703_v33  ;;  %v2554_v4 = vand.u32 2147483648, %v2542_v17  ;;  %v2552_v18 = vand.u32 2147483647, %v2542_v17 }
 0xe35   :  { %v2615_v6 = vmul.f32 %v3705_v49, %v2613_v7  ;;  %vm2620_vm10 = vweird.f32 %v3705_v49  ;;  %vm2548_vm14 = vweird.f32 %v2542_v17 }
 0xe36   :  { %3708 = vrcp.f32 %v2737_v5  ;;  %vm2621_vm12 = vmor %vm2619_vm11, %vm2620_vm10  ;;  %v2555_v42 = vor.u32 1.1754944e-38, %v2554_v4  ;;  %vm2553_vm6 = vcmp.eq.f32.partialorder %v2552_v18, 8.507059e+37  ;;  %vm2743_vm8 = vweird.f32 %v2737_v5 }
 0xe37   :  { %v2616_v56 = vsub.f32 1.0, %v2615_v6  ;;  %3710 = vtanh.f32 %v2680_v25 }
 0xe39   :  { %v2617_v61 = vmul.f32 %v3705_v49, %v2616_v56  ;;  %v3565_v56 = vld [vmem:[%s5080_s10 + $0x48] sm:$0xff] }
 0xe3a   :  { %v3707_v24 = vpop.eup %3706 }
 0xe3b   :  { %v2544_v28 = vmul.f32 %v3707_v24, %v2542_v17  ;;  %v2618_v29 = vadd.f32 %v3705_v49, %v2617_v61  ;;  %vm2549_vm13 = vweird.f32 %v3707_v24  ;;  %v2747_v17 = vand.u32 2147483647, %v2737_v5 }
 0xe3c   :  { %v3709_v21 = vpop.eup %3708  ;;  %vm2550_vm1 = vmor %vm2548_vm14, %vm2549_vm13 }
 0xe3d   :  { %v2545_v45 = vsub.f32 1.0, %v2544_v28  ;;  %v2739_v63 = vmul.f32 %v3709_v21, %v2737_v5  ;;  %v2622_v39 = vsel %vm2621_vm12, %v3705_v49, %v2618_v29  ;;  %v3711_v38 = vpop.eup %3710  ;;  %vm2744_vm7 = vweird.f32 %v3709_v21 }
 0xe3e   :  { %v2627_v55 = vsel %vm2624_vm15, %v2626_v22, %v2622_v39  ;;  %v2749_v49 = vand.u32 2147483648, %v2737_v5  ;;  %vm2745_vm9 = vmor %vm2743_vm8, %vm2744_vm7  ;;  %vm2748_vm10 = vcmp.eq.f32.partialorder %v2747_v17, 8.507059e+37  ;;  %v3567_v5 = vld [vmem:[%s5080_s10 + $0x58] sm:$0xff] }
 0xe3f   :  { %v2546_v36 = vmul.f32 %v3707_v24, %v2545_v45  ;;  %v2740_v32 = vsub.f32 1.0, %v2739_v63  ;;  %v2753_v7 = vmul.f32 %v2627_v55, %v4879_v30 }
 0xe40   :  { %v2750_v37 = vor.u32 1.1754944e-38, %v2749_v49 }
 0xe41   :  { %v2547_v59 = vadd.f32 %v3707_v24, %v2546_v36  ;;  %v2741_v16 = vmul.f32 %v3709_v21, %v2740_v32 }
 0xe43   :  { %v2551_v47 = vsel %vm2550_vm1, %v3707_v24, %v2547_v59  ;;  %v2742_v27 = vadd.f32 %v3709_v21, %v2741_v16  ;;  %v3013_v16 = vld [vmem:[#allocation2 + $0x16] sm:$0x3] }
 0xe44   :  { %v2556_v14 = vsel %vm2553_vm6, %v2555_v42, %v2551_v47 }
 0xe45   :  { %v2754_v50 = vmul.f32 %v3711_v38, %v2556_v14  ;;  %v2746_v44 = vsel %vm2745_vm9, %v3709_v21, %v2742_v27 }
 0xe46   :  { %v2751_v51 = vsel %vm2748_vm10, %v2750_v37, %v2746_v44 }
 0xe47   :  { %v4988_v33 = vadd.f32 %v2754_v50, %v2753_v7  ;;  %v3137_v50 = vld [vmem:[#allocation2 + $0x2e] sm:$0x3] }
 0xe49   :  { %3712 = vtanh.f32 %v4988_v33 }
 0xe4f   :  { %v3713_v6 = vpop.eup %3712 }
 0xe50   :  { %v4991_v0 = vmul.f32 %v3713_v6, %v2751_v51 }
 0xe52   :  { %3533 = vmatmul.msk.f32.vlgmr.msrb.gmra.mxu3 %vm59_vm0, %v4991_v0  ;;  %3538 = vmatmul.msk.f32.vlgmr.msra.gmra.mxu1 %vm59_vm0, %v4991_v0  ;;  %v2816_v30 = vrot.slane %v4991_v0, 1 }
 0xe53   :  { %3030 = vmatpush.msrb.mxu3 %v4672_v1  ;;  %3101 = vmatpush.msra.mxu1 %v4811_v11  ;;  %v3564_v1 = vld [vmem:[%s5080_s10 + $0x40] sm:$0xff] }
 0xe54   :  { %3541 = vmatmul.msk.f32.vlgmr.msra.gmra.mxu2 %vm59_vm0, %v2816_v30  ;;  %v2759_v11 = vld [vmem:[#allocation3 + $0x8] sm:$0x3] }
 0xe55   :  { %3126 = vmatpush.msra.mxu2 %v3567_v5  ;;  %3031 = vmatpush.msrb.mxu3 %v4677_v2 }
 0xe56   :  { %3102 = vmatpush.msra.mxu1 %v4816_v3 }
 0xe57   :  { %3127 = vmatpush.msra.mxu2 %v3566_v15  ;;  %3032 = vmatpush.msrb.mxu3 %v4688_v20  ;;  %v3084_v15 = vld [vmem:[#allocation2 + $0x22] sm:$0x3] }
 0xe58   :  { %3103 = vmatpush.msra.mxu1 %v4825_v12 }
 0xe59   :  { %3128 = vmatpush.msra.mxu2 %v3565_v56  ;;  %3033 = vmatpush.msrb.mxu3 %v4701_v10 }
 0xe5a   :  { %3104 = vmatpush.msra.mxu1 %v4830_v43  ;;  %v2809_v43 = vpop.f32.mrf.mxu0 }
 0xe5b   :  { %3129 = vmatpush.msra.mxu2 %v3564_v1 }
 0xe5c   :  { %3546 = vmatmul.msk.f32.vlgmr.msrb.gmra.mxu2 %vm59_vm0, %v4991_v0 }
 0xe5d   :  { %3258 = vmatpush.msrb.mxu2 %v4694_v26 }
 0xe5f   :  { %3259 = vmatpush.msrb.mxu2 %v4767_v9 }
 0xe61   :  { %3260 = vmatpush.msrb.mxu2 %v4785_v35 }
 0xe63   :  { %3261 = vmatpush.msrb.mxu2 %v4803_v8 }
 0xe64   :  { %3568 = vmatmul.msk.f32.vlgmr.msra.gmra.mxu2 %vm59_vm0, %v4991_v0 }
 0xecf   :  { %v2834_v2 = vpop.f32.mrf.mxu1 }
 0xed0   :  { %v2859_v20 = vmul.f32 0.17677669, %v2834_v2 }
 0xed2   :  { %v2861_v10 = vsel %vm591_vm5, %v2859_v20, -inf }
 0xed3   :  { %2862 = vmax.xlane.f32.xlu2 %v2861_v10 }
 0xed5   :  { %v2784_v3 = vpop.f32.mrf.mxu3 }
 0xed6   :  { %v2787_v12 = vadd.f32 %v2784_v3, %v2759_v11 }
 0xed7   :  { %v2856_v48 = vpop.f32.mrf.mxu2 }
 0xed8   :  { %v2812_v26 = vadd.f32 %v2809_v43, %v2787_v12  ;;  %v2860_v62 = vmul.f32 0.17677669, %v2856_v48 }
 0xeda   :  { %v2813_v9 = vmax.f32 %v2812_v26, 0.0  ;;  %v2864_v35 = vsel %vm591_vm5, %v2860_v62, -inf }
 0xedb   :  { %2865 = vmax.xlane.f32.xlu0 %v2864_v35 }
 0xedc   :  { %3535 = vst.msk [vmem:[%s5087_s16 + $0x8] sm:$0x3] %vm267_vm4, %v2813_v9 }
 0xf46   :  { %v2863_v8 = vpop.xlane.xlu2 %2862 }
 0xf47   :  { %v2867_v61 = vsub.f32 %v2859_v20, %v2863_v8 }
 0xf49   :  { %v2869_v24 = vmul.f32 1.442695, %v2867_v61 }
 0xf4b   :  { %3714 = vpow2.f32 %v2869_v24 }
 0xf4e   :  { %v2866_v25 = vpop.xlane.xlu0 %2865 }
 0xf4f   :  { %v2868_v28 = vsub.f32 %v2860_v62, %v2866_v25 }
 0xf51   :  { %v3715_v29 = vpop.eup %3714  ;;  %v2871_v21 = vmul.f32 1.442695, %v2868_v28 }
 0xf52   :  { %v2873_v41 = vsel %vm591_vm5, %v3715_v29, 0.0 }
 0xf53   :  { %3716 = vpow2.f32 %v2871_v21  ;;  %2874 = vadd.xlane.f32.xlu1 %v2873_v41 }
 0xf59   :  { %v3717_v45 = vpop.eup %3716 }
 0xf5a   :  { %v2876_v63 = vsel %vm591_vm5, %v3717_v45, 0.0 }
 0xf5b   :  { %2877 = vadd.xlane.f32.xlu2 %v2876_v63 }
 0xfc6   :  { %v2875_v53 = vpop.xlane.xlu1 %2874 }
 0xfc7   :  { %3718 = vrcp.f32 %v2875_v53 }
 0xfcd   :  { %v3719_v4 = vpop.eup %3718 }
 0xfce   :  { %v2881_v36 = vmul.f32 %v3719_v4, %v3715_v29  ;;  %v2878_v18 = vpop.xlane.xlu2 %2877 }
 0xfcf   :  { %3720 = vrcp.f32 %v2878_v18 }
 0xfd0   :  { %3543 = vmatmul.msk.f32.vlgmr.msra.gmra.mxu3 %vm229_vm3, %v2881_v36 }
 0xfd1   :  { %3154 = vmatpush.msra.mxu3 %v4707_v60 }
 0xfd3   :  { %3155 = vmatpush.msra.mxu3 %v4762_v31 }
 0xfd5   :  { %v3721_v39 = vpop.eup %3720  ;;  %3156 = vmatpush.msra.mxu3 %v4780_v34 }
 0xfd6   :  { %v2882_v22 = vmul.f32 %v3721_v39, %v3717_v45 }
 0xfd7   :  { %3157 = vmatpush.msra.mxu3 %v4798_v57  ;;  %v2989_v57 = vpop.f32.mrf.mxu2 }
 0xfd8   :  { %v2885_v32 = vrot.slane %v2882_v22, 7  ;;  %3544 = vmatmul.msk.f32.vlgmr.msra.gmra.mxu0 %vm229_vm3, %v2882_v22 }
 0xfd9   :  { %3179 = vmatpush.msra.mxu0 %v4715_v52 }
 0xfda   :  { %v2886_v59 = vsel %vm97_vm2, %v2885_v32, %v2881_v36 }
 0xfdb   :  { %v2888_v42 = vsel %vm229_vm3, %v2886_v59, 0.0  ;;  %3180 = vmatpush.msra.mxu0 %v4721_v58  ;;  %v2936_v58 = vld [vmem:[#allocation2 + $0xa] sm:$0x3] }
 0xfdc   :  { %3542 = vst [vmem:[%s5085_s17 + $0xa] sm:$0x3] %v2888_v42 }
 0xfdd   :  { %3181 = vmatpush.msra.mxu0 %v4728_v23 }
 0xfdf   :  { %3182 = vmatpush.msra.mxu0 %v4738_v40  ;;  %v3131_v20 = vpop.f32.mrf.mxu2 }
 0xfe0   :  { %3557 = vmatmul.msk.f32.vlgmr.msrb.gmra.mxu0 %vm59_vm0, %v4991_v0 }
 0xfe8   :  { %3578 = vmatmul.msk.f32.vlgmr.msra.gmra.mxu0 %vm59_vm0, %v4991_v0 }
0x1053   :  { %v2910_v31 = vpop.f32.mrf.mxu3 }
0x1055   :  { %v2932_v60 = vpop.f32.mrf.mxu0 }
0x1056   :  { %v2943_v52 = vrot.slane %v2932_v60, 7 }
0x1058   :  { %v2944_v34 = vsel %vm97_vm2, %v2943_v52, %v2910_v31 }
0x1059   :  { %3545 = vmatmul.msk.f32.vlgmr.msrb.gmra.mxu1 %vm59_vm0, %v2944_v34  ;;  %3552 = vmatmul.msk.f32.vlgmr.msrb.gmra.mxu3 %vm59_vm0, %v2944_v34 }
0x105a   :  { %3581 = vmatmul.msk.f32.vlgmr.msrb.gmra.mxu2 %vm59_vm0, %v2944_v34  ;;  %3233 = vmatpush.msrb.mxu1 %v4855_v19 }
0x105c   :  { %3234 = vmatpush.msrb.mxu1 %v4861_v54 }
0x105d   :  { %v3060_v38 = vpop.f32.mrf.mxu0 }
0x105e   :  { %3235 = vmatpush.msrb.mxu1 %v4867_v46 }
0x1060   :  { %3236 = vmatpush.msrb.mxu1 %v4873_v13 }
0x1061   :  { %3563 = vmatmul.msk.f32.vlgmr.msra.gmra.mxu1 %vm59_vm0, %v2944_v34  ;;  %3573 = vmatmul.msk.f32.vlgmr.msra.gmra.mxu3 %vm59_vm0, %v2944_v34 }
0x1065   :  { %v3184_v17 = vpop.f32.mrf.mxu0 }
0x10d6   :  { %v2964_v23 = vpop.f32.mrf.mxu1 }
0x10d7   :  { %v2967_v40 = vadd.f32 %v2964_v23, %v2936_v58 }
0x10d9   :  { %v2992_v55 = vadd.f32 %v2989_v57, %v2967_v40 }
0x10db   :  { %v3547_v47 = vmul.f32 -1.442695, %v2992_v55 }
0x10dc   :  { %v3035_v14 = vpop.f32.mrf.mxu3 }
0x10dd   :  { %3722 = vpow2.f32 %v3547_v47  ;;  %v3038_v19 = vadd.f32 %v3035_v14, %v3013_v16  ;;  %v3263_v55 = vpop.f32.mrf.mxu2 }
0x10de   :  { %v3106_v0 = vpop.f32.mrf.mxu1 }
0x10df   :  { %v3063_v54 = vadd.f32 %v3060_v38, %v3038_v19  ;;  %v3109_v56 = vadd.f32 %v3106_v0, %v3084_v15 }
0x10e1   :  { %v3558_v7 = vmul.f32 -1.442695, %v3063_v54  ;;  %v3134_v3 = vadd.f32 %v3131_v20, %v3109_v56 }
0x10e3   :  { %v3723_v46 = vpop.eup %3722  ;;  %3724 = vpow2.f32 %v3558_v7 }
0x10e4   :  { %v2996_v13 = vadd.f32 1.0, %v3723_v46  ;;  %v3159_v27 = vpop.f32.mrf.mxu3 }
0x10e5   :  { %v3162_v49 = vadd.f32 %v3159_v27, %v3137_v50 }
0x10e6   :  { %3726 = vrcp.f32 %v2996_v13  ;;  %v3008_v26 = vand.u32 2147483648, %v2996_v13  ;;  %vm3002_vm3 = vweird.f32 %v2996_v13  ;;  %v3006_v9 = vand.u32 2147483647, %v2996_v13 }
0x10e7   :  { %v3187_v44 = vadd.f32 %v3184_v17, %v3162_v49 }
0x10e8   :  { %v3009_v25 = vor.u32 1.1754944e-38, %v3008_v26  ;;  %vm3007_vm13 = vcmp.eq.f32.partialorder %v3006_v9, 8.507059e+37 }
0x10e9   :  { %v3725_v37 = vpop.eup %3724  ;;  %v3579_v6 = vmul.f32 -1.442695, %v3187_v44 }
0x10ea   :  { %v3067_v51 = vadd.f32 1.0, %v3725_v37 }
0x10eb   :  { %3728 = vpow2.f32 %v3579_v6 }
0x10ec   :  { %v3727_v30 = vpop.eup %3726  ;;  %3730 = vrcp.f32 %v3067_v51  ;;  %v3079_v35 = vand.u32 2147483648, %v3067_v51  ;;  %v3077_v24 = vand.u32 2147483647, %v3067_v51  ;;  %vm3073_vm12 = vweird.f32 %v3067_v51 }
0x10ed   :  { %v2998_v5 = vmul.f32 %v3727_v30, %v2996_v13  ;;  %vm3003_vm2 = vweird.f32 %v3727_v30 }
0x10ee   :  { %vm3004_vm5 = vmor %vm3002_vm3, %vm3003_vm2  ;;  %v3080_v21 = vor.u32 1.1754944e-38, %v3079_v35  ;;  %vm3078_vm15 = vcmp.eq.f32.partialorder %v3077_v24, 8.507059e+37 }
0x10ef   :  { %v2999_v1 = vsub.f32 1.0, %v2998_v5 }
0x10f1   :  { %v3729_v2 = vpop.eup %3728  ;;  %v3000_v10 = vmul.f32 %v3727_v30, %v2999_v1 }
0x10f2   :  { %v3731_v11 = vpop.eup %3730  ;;  %v3191_v12 = vadd.f32 1.0, %v3729_v2 }
0x10f3   :  { %v3069_v43 = vmul.f32 %v3731_v11, %v3067_v51  ;;  %v3001_v48 = vadd.f32 %v3727_v30, %v3000_v10  ;;  %vm3074_vm11 = vweird.f32 %v3731_v11 }
0x10f4   :  { %3732 = vrcp.f32 %v3191_v12  ;;  %vm3075_vm14 = vmor %vm3073_vm12, %vm3074_vm11  ;;  %v3203_v42 = vand.u32 2147483648, %v3191_v12  ;;  %vm3197_vm6 = vweird.f32 %v3191_v12  ;;  %v3201_v60 = vand.u32 2147483647, %v3191_v12 }
0x10f5   :  { %v3070_v62 = vsub.f32 1.0, %v3069_v43  ;;  %3734 = vtanh.f32 %v3134_v3  ;;  %v3005_v61 = vsel %vm3004_vm5, %v3727_v30, %v3001_v48 }
0x10f6   :  { %v3010_v41 = vsel %vm3007_vm13, %v3009_v25, %v3005_v61  ;;  %v3204_v31 = vor.u32 1.1754944e-38, %v3203_v42  ;;  %vm3202_vm8 = vcmp.eq.f32.partialorder %v3201_v60, 8.507059e+37 }
0x10f7   :  { %v3071_v8 = vmul.f32 %v3731_v11, %v3070_v62 }
0x10f9   :  { %v3072_v28 = vadd.f32 %v3731_v11, %v3071_v8 }
0x10fa   :  { %v3733_v29 = vpop.eup %3732 }
0x10fb   :  { %v3076_v45 = vsel %vm3075_vm14, %v3731_v11, %v3072_v28  ;;  %v3193_v63 = vmul.f32 %v3733_v29, %v3191_v12  ;;  %v3735_v53 = vpop.eup %3734  ;;  %vm3198_vm1 = vweird.f32 %v3733_v29 }
0x10fc   :  { %v3081_v4 = vsel %vm3078_vm15, %v3080_v21, %v3076_v45  ;;  %v3208_v18 = vmul.f32 %v3735_v53, %v3010_v41  ;;  %vm3199_vm7 = vmor %vm3197_vm6, %vm3198_vm1 }
0x10fd   :  { %v3207_v36 = vmul.f32 %v3081_v4, %v4988_v33  ;;  %v3194_v39 = vsub.f32 1.0, %v3193_v63  ;;  %v3213_v33 = vld [vmem:[#allocation3 + $0xa] sm:$0x3] }
0x10ff   :  { %v3209_v22 = vadd.f32 %v3208_v18, %v3207_v36  ;;  %v3195_v32 = vmul.f32 %v3733_v29, %v3194_v39 }
0x1101   :  { %3736 = vtanh.f32 %v3209_v22  ;;  %v3196_v59 = vadd.f32 %v3733_v29, %v3195_v32 }
0x1103   :  { %v3200_v52 = vsel %vm3199_vm7, %v3733_v29, %v3196_v59 }
0x1104   :  { %v3205_v58 = vsel %vm3202_vm8, %v3204_v31, %v3200_v52 }
0x1107   :  { %v3737_v34 = vpop.eup %3736 }
0x1108   :  { %v3211_v23 = vmul.f32 %v3737_v34, %v3205_v58 }
0x110a   :  { %3580 = vmatmul.msk.f32.vlgmr.msrb.gmra.mxu1 %vm59_vm0, %v3211_v23 }
0x1187   :  { %v3238_v40 = vpop.f32.mrf.mxu1 }
0x1188   :  { %v3241_v57 = vadd.f32 %v3238_v40, %v3213_v33 }
0x118a   :  { %v3266_v47 = vadd.f32 %v3263_v55, %v3241_v57 }
0x118c   :  { %v3267_v38 = vmax.f32 %v3266_v47, 0.0 }
0x118e   :  { %3582 = vst.msk [vmem:[%s5087_s16 + $0xa] sm:$0x3] %vm267_vm4, %v3267_v38 }

</bundles_post_ra>
